<compile_context>
chip_gen: v7x
topology: tpu7x:2x2x1
jax: 0.10.0
libtpu: 0.0.40
codegen_flags: <defaults>
</compile_context>

<pallas_src>
import functools

import jax
import jax.numpy as jnp
import numpy as np
from jax.experimental import pallas as pl
from jax.experimental.pallas import tpu as pltpu


# ---------------------------------------------------------------------------
# Fused kernel: r0..r3 + g1 + CALayer for one batch element, channel-major.
# ---------------------------------------------------------------------------
def fused_block_kernel(x_ref, dww_ref, dwb_ref, pwt_ref, pwb_ref,
                       gt_ref, gb_ref, wa_ref, ba_ref, w4t_ref, b4_ref,
                       mneg_ref, mpos_ref, o_ref, pad_ref, *, H, W, C, PAD):
    f32 = jnp.float32
    bf16 = jnp.bfloat16
    HW = H * W
    P = PAD

    # Zero only the two halo quarters (dense, lane-aligned stores).  The interior
    # is fully overwritten every grid step, so no full-buffer clear is needed and
    # nothing is gated on program_id (megacore-safe).
    pad_ref[:, :P] = jnp.zeros((C, P), f32)
    pad_ref[:, P + HW:] = jnp.zeros((C, P), f32)
    # Interior store at a lane-aligned offset (P = 128) -> unmasked vst.
    pad_ref[:, P:P + HW] = x_ref[0].astype(f32)

    m_neg = mneg_ref[...]      # (1, HW): 1.0 where column w-1 exists (w > 0)
    m_pos = mpos_ref[...]      # (1, HW): 1.0 where column w+1 exists (w < W-1)

    outs = []                  # bf16 stash of the 4 block outputs (K=128 g1 matmul)
    for i in range(4):         # r0, r1, r2, r3 — static unroll
        # ---- depthwise 3x3: 9 shifted halo-window reads, f32 VPU, lane-dense ----
        parts = []
        for dxi, dx in enumerate((-1, 0, 1)):
            part = jnp.zeros((C, HW), f32)
            for dyi, dy in enumerate((-1, 0, 1)):
                k = i * 9 + dyi * 3 + dxi
                w_tap = dww_ref[:, k:k + 1]                     # (C, 1) per-channel tap
                off = dy * W + dx
                part = part + pad_ref[:, P + off:P + off + HW] * w_tap
            parts.append(part)
        # w-boundary taps are masked (row-wrap); h-boundary handled by zero halo.
        acc = (parts[0] * m_neg + parts[1] + parts[2] * m_pos
               + dwb_ref[:, i:i + 1])                           # (C, HW)

        # ---- pointwise 1x1 conv: (C,C)@(C,HW) on the MXU, bf16 in / f32 acc ----
        out = jnp.dot(pwt_ref[i], acc.astype(bf16), preferred_element_type=f32)
        out = jnp.maximum(out + pwb_ref[:, i:i + 1], 0.0)       # ReLU, (C, HW)

        outs.append(out.astype(bf16))                           # register stash
        if i < 3:
            pad_ref[:, P:P + HW] = out                          # next block's input (aligned)

    # ---- g1: one K = 4*C (=128) matmul over the stacked branch outputs ----
    stash = jnp.concatenate(outs, axis=0)                       # (4C, HW) bf16
    g1 = jnp.dot(gt_ref[...], stash, preferred_element_type=f32)
    g1 = jnp.maximum(g1 + gb_ref[...], 0.0)                     # (C, HW)

    # ---- CALayer on the pooled vector (tiny; broadcast-mul + axis reductions) ----
    y = jnp.sum(g1, axis=1, keepdims=True) * (1.0 / HW)         # (C, 1) pooled column
    cat = jnp.maximum(jnp.sum(wa_ref[...] * y, axis=0, keepdims=True)
                      + ba_ref[...], 0.0)                       # (1, 3cr)
    a = jnp.sum(w4t_ref[...] * cat, axis=1, keepdims=True) + b4_ref[...]   # (C, 1)
    gate = 1.0 / (1.0 + jnp.exp(-a))                            # sigmoid (exp on EUP)

    o_ref[0] = (g1 * gate).astype(o_ref.dtype)                  # dense lane-packed store


# ---------------------------------------------------------------------------
# Weight repacking (pure JAX, once per forward; a few KB of ops)
# ---------------------------------------------------------------------------
def prepare_fused_params(params, C, split):
    f32, bf16 = jnp.float32, jnp.bfloat16
    dch = int(C * split)
    rch = C - dch
    assert 4 * dch == C, "Block assumes 4 * distilled_channels == in_channels"

    def pad_block(blk, cin, cout):
        # "remaining" input channels live at the top of the channel dim; zero
        # weights elsewhere so every block consumes the full C-channel tensor.
        off = C - cin
        dw = jnp.zeros((9, C), f32).at[:, off:].set(blk["dw_w"].reshape(9, cin))
        dwb = jnp.zeros((C,), f32).at[off:].set(blk["dw_b"][0])
        pwt = jnp.zeros((C, C), f32).at[:cout, off:].set(blk["pw_w"].T)   # out x in
        pwb = jnp.zeros((C,), f32).at[:cout].set(blk["pw_b"][0])
        return dw, dwb, pwt, pwb

    blocks = [pad_block(params["r0"], C, C),
              pad_block(params["r1"], rch, C),
              pad_block(params["r2"], rch, C),
              pad_block(params["r3"], rch, dch)]
    dw_w = jnp.concatenate([b[0].T for b in blocks], axis=1)     # (C, 36): col = i*9 + tap
    dw_b = jnp.stack([b[1] for b in blocks], axis=1)             # (C, 4)
    pw_t = jnp.stack([b[2] for b in blocks]).astype(bf16)        # (4, C, C), bf16 for MXU
    pw_b = jnp.stack([b[3] for b in blocks], axis=1)             # (C, 4)

    # g1 (1x1 depthwise + 1x1 pointwise): fold the per-channel dw scale/bias into
    # the pointwise matmul, then lay it out channel-major with K = 4*C so the
    # concat of the four branch outputs becomes a single matmul.
    g = params["g1"]
    s = g["dw_w"][0, 0]                       # (C,)  dw-1x1 scale
    t = g["dw_b"][0]                          # (C,)  dw-1x1 bias
    Wg = g["pw_w"]                            # (C, Cout)
    Cout = Wg.shape[1]
    assert Cout == C, "CALayer(in_channels) requires out_channels == in_channels"
    Pp = s[:, None] * Wg                      # (C, Cout)
    g_b = (g["pw_b"][0] + t @ Wg).reshape(Cout, 1)
    gt = jnp.zeros((Cout, 4 * C), f32)
    for i in range(4):
        gt = gt.at[:, i * C:i * C + dch].set(Pp[i * dch:(i + 1) * dch, :].T)
    gt = gt.astype(bf16)

    ca = params["ca"]
    wa = jnp.concatenate([ca["w1"], ca["w2"], ca["w3"]], axis=1)   # (C, 3cr)
    ba = jnp.concatenate([ca["b1"], ca["b2"], ca["b3"]], axis=1)   # (1, 3cr)
    w4t = ca["w4"].T                                               # (C, 3cr)
    b4 = ca["b4"].reshape(C, 1)                                    # (C, 1)
    return dict(dw_w=dw_w, dw_b=dw_b, pw_t=pw_t, pw_b=pw_b, gt=gt, g_b=g_b,
                wa=wa, ba=ba, w4t=w4t, b4=b4)


def make_shift_masks(H, W):
    w_idx = np.arange(H * W, dtype=np.int32) % W
    m_neg = (w_idx > 0).astype(np.float32).reshape(1, H * W)       # dx = -1 valid
    m_pos = (w_idx < W - 1).astype(np.float32).reshape(1, H * W)   # dx = +1 valid
    return jnp.asarray(m_neg), jnp.asarray(m_pos)


# ---------------------------------------------------------------------------
# Block forward: one fused pallas_call, batch on a "parallel" grid axis
# ---------------------------------------------------------------------------
def block_forward(x_nchw, params, *, split=0.25):
    N, C, H, W = x_nchw.shape
    HW = H * W
    x = x_nchw.reshape(N, C, HW)           # channel-major: contiguous, no transpose
    fp = prepare_fused_params(params, C, split)
    cr3 = fp["wa"].shape[1]
    m_neg, m_pos = make_shift_masks(H, W)
    PAD = 128                               # lane-aligned halo; needs PAD >= W + 1
    assert PAD >= W + 1

    # NOTE: at production super-resolution sizes, add a second "parallel" grid
    # axis tiling HW with a halo and size the tile for v7x's 64 MiB VMEM; at the
    # test size one image per step (~0.5 MiB of VMEM including weights) is fine.
    kern = functools.partial(fused_block_kernel, H=H, W=W, C=C, PAD=PAD)
    out = pl.pallas_call(
        kern,
        out_shape=jax.ShapeDtypeStruct((N, C, HW), x.dtype),
        grid=(N,),
        in_specs=[
            pl.BlockSpec((1, C, HW), lambda n: (n, 0, 0)),        # x (channel-major)
            pl.BlockSpec((C, 36), lambda n: (0, 0)),              # depthwise taps
            pl.BlockSpec((C, 4), lambda n: (0, 0)),               # depthwise biases
            pl.BlockSpec((4, C, C), lambda n: (0, 0, 0)),         # pointwise weights (bf16)
            pl.BlockSpec((C, 4), lambda n: (0, 0)),               # pointwise biases
            pl.BlockSpec((C, 4 * C), lambda n: (0, 0)),           # g1 weight, K = 4C (bf16)
            pl.BlockSpec((C, 1), lambda n: (0, 0)),               # g1 bias
            pl.BlockSpec((C, cr3), lambda n: (0, 0)),             # CA branch weights
            pl.BlockSpec((1, cr3), lambda n: (0, 0)),             # CA branch biases
            pl.BlockSpec((C, cr3), lambda n: (0, 0)),             # CA c4 weight (transposed)
            pl.BlockSpec((C, 1), lambda n: (0, 0)),               # CA c4 bias
            pl.BlockSpec((1, HW), lambda n: (0, 0)),              # dx = -1 validity mask
            pl.BlockSpec((1, HW), lambda n: (0, 0)),              # dx = +1 validity mask
        ],
        out_specs=pl.BlockSpec((1, C, HW), lambda n: (n, 0, 0)),
        scratch_shapes=[pltpu.VMEM((C, HW + 2 * PAD), jnp.float32)],  # halo'd activations
        compiler_params=pltpu.CompilerParams(
            dimension_semantics=("parallel",)),
    )(x, fp["dw_w"], fp["dw_b"], fp["pw_t"], fp["pw_b"],
      fp["gt"], fp["g_b"], fp["wa"], fp["ba"], fp["w4t"], fp["b4"],
      m_neg, m_pos)
    return out.reshape(N, C, H, W)


# ---------------------------------------------------------------------------
# Deterministic parameter init (PyTorch weight layouts, converted per block)
# ---------------------------------------------------------------------------
def init_dw_sep(key, cin, cout, k):
    k1, k2, k3, k4 = jax.random.split(key, 4)
    dw_w = jax.random.normal(k1, (cin, 1, k, k), jnp.float32) * 0.1     # torch dw conv
    dw_b = jax.random.normal(k2, (cin,), jnp.float32) * 0.1
    pw_w = jax.random.normal(k3, (cout, cin, 1, 1), jnp.float32) * 0.1  # torch 1x1 conv
    pw_b = jax.random.normal(k4, (cout,), jnp.float32) * 0.1
    return {
        "dw_w": jnp.transpose(dw_w[:, 0], (1, 2, 0)),      # (k, k, cin)
        "dw_b": dw_b.reshape(1, cin),
        "pw_w": jnp.transpose(pw_w[:, :, 0, 0], (1, 0)),   # (cin, cout)
        "pw_b": pw_b.reshape(1, cout),
    }


def init_ca(key, C, reduction=16):
    cr = max(C // reduction, 1)
    ks = jax.random.split(key, 8)

    def conv_w(k_, co, ci):
        return jax.random.normal(k_, (co, ci, 3, 3), jnp.float32) * 0.1

    w1, w2, w3 = conv_w(ks[0], cr, C), conv_w(ks[2], cr, C), conv_w(ks[4], cr, C)
    w4 = conv_w(ks[6], C, 3 * cr)
    b1 = jax.random.normal(ks[1], (cr,), jnp.float32) * 0.1
    b2 = jax.random.normal(ks[3], (cr,), jnp.float32) * 0.1
    b3 = jax.random.normal(ks[5], (cr,), jnp.float32) * 0.1
    b4 = jax.random.normal(ks[7], (C,), jnp.float32) * 0.1
    # On a 1x1 pooled map with pad == dilation only the centre tap contributes.
    return {
        "w1": jnp.transpose(w1[:, :, 1, 1], (1, 0)), "b1": b1.reshape(1, cr),
        "w2": jnp.transpose(w2[:, :, 1, 1], (1, 0)), "b2": b2.reshape(1, cr),
        "w3": jnp.transpose(w3[:, :, 1, 1], (1, 0)), "b3": b3.reshape(1, cr),
        "w4": jnp.transpose(w4[:, :, 1, 1], (1, 0)), "b4": b4.reshape(1, C),
    }


def init_block(key, cin, cout, split=0.25):
    dch = int(cin * split)
    rch = cin - dch
    keys = jax.random.split(key, 6)
    return {
        "r0": init_dw_sep(keys[0], cin, cin, 3),
        "r1": init_dw_sep(keys[1], rch, cin, 3),
        "r2": init_dw_sep(keys[2], rch, cin, 3),
        "r3": init_dw_sep(keys[3], rch, dch, 3),
        "g1": init_dw_sep(keys[4], cin, cout, 1),
        "ca": init_ca(keys[5], cin),
    }


# ---------------------------------------------------------------------------
# Pure-JAX reference (lax conv) for a correctness cross-check
# ---------------------------------------------------------------------------
def ref_dw_sep(x, p, *, k, pad):
    cin = x.shape[-1]
    w = p["dw_w"].reshape(k, k, 1, cin)                    # HWIO, groups=cin
    y = jax.lax.conv_general_dilated(
        x, w, (1, 1), [(pad, pad), (pad, pad)],
        dimension_numbers=("NHWC", "HWIO", "NHWC"), feature_group_count=cin)
    y = y + p["dw_b"][0]
    y = jnp.einsum("nhwc,cd->nhwd", y, p["pw_w"]) + p["pw_b"][0]
    return jax.nn.relu(y)


def ref_ca(x, p):
    y = jnp.mean(x, axis=(1, 2))                           # (N, C)
    c1 = jax.nn.relu(y @ p["w1"] + p["b1"][0])
    c2 = jax.nn.relu(y @ p["w2"] + p["b2"][0])
    c3 = jax.nn.relu(y @ p["w3"] + p["b3"][0])
    cc = jnp.concatenate([c1, c2, c3], axis=-1)
    g = jax.nn.sigmoid(cc @ p["w4"] + p["b4"][0])
    return x * g[:, None, None, :]


def ref_block(x_nchw, params, *, split=0.25):
    x = jnp.transpose(x_nchw, (0, 2, 3, 1))
    C = x.shape[-1]
    dch = int(C * split)
    out0 = ref_dw_sep(x, params["r0"], k=3, pad=1)
    d0, r0 = out0[..., :dch], out0[..., dch:]
    out1 = ref_dw_sep(r0, params["r1"], k=3, pad=1)
    d1, r1 = out1[..., :dch], out1[..., dch:]
    out2 = ref_dw_sep(r1, params["r2"], k=3, pad=1)
    d2, r2 = out2[..., :dch], out2[..., dch:]
    d3 = ref_dw_sep(r2, params["r3"], k=3, pad=1)
    c0 = jnp.concatenate([d0, d1, d2, d3], axis=-1)
    g1 = ref_dw_sep(c0, params["g1"], k=1, pad=0)
    return jnp.transpose(ref_ca(g1, params["ca"]), (0, 3, 1, 2))


if __name__ == "__main__":
    N, C, H, W = 2, 32, 16, 16        # batch=2, in_channels=out_channels=32, spatial=16
    key = jax.random.PRNGKey(0)
    kx, kp = jax.random.split(key)
    x = jax.random.normal(kx, (N, C, H, W), jnp.float32)   # PyTorch NCHW input
    params = init_block(kp, C, C)

    out = jax.block_until_ready(jax.jit(block_forward)(x, params))
    ref = jax.block_until_ready(ref_block(x, params))

    assert out.shape == (N, C, H, W)
    # Pointwise / g1 matmuls feed the MXU in bf16 (f32 accumulation); tolerance
    # is sized for that mixed precision against the pure-f32 reference.
    np.testing.assert_allclose(np.asarray(out), np.asarray(ref), rtol=2e-2, atol=2e-2)

    print("KERNEL_OK")
</pallas_src>

<mosaic_0001>
module attributes {stable_mosaic.version = 11 : i64} {
  func.func @fused_block_kernel(%arg0: i32, %arg1: memref<1x32x256xf32, #tpu.memory_space<vmem>>, %arg2: memref<32x36xf32, #tpu.memory_space<vmem>>, %arg3: memref<32x4xf32, #tpu.memory_space<vmem>>, %arg4: memref<4x32x32xbf16, #tpu.memory_space<vmem>>, %arg5: memref<32x4xf32, #tpu.memory_space<vmem>>, %arg6: memref<32x128xbf16, #tpu.memory_space<vmem>>, %arg7: memref<32x1xf32, #tpu.memory_space<vmem>>, %arg8: memref<32x6xf32, #tpu.memory_space<vmem>>, %arg9: memref<1x6xf32, #tpu.memory_space<vmem>>, %arg10: memref<32x6xf32, #tpu.memory_space<vmem>>, %arg11: memref<32x1xf32, #tpu.memory_space<vmem>>, %arg12: memref<1x256xf32, #tpu.memory_space<vmem>>, %arg13: memref<1x256xf32, #tpu.memory_space<vmem>>, %arg14: memref<1x32x256xf32, #tpu.memory_space<vmem>>, %arg15: memref<32x512xf32, #tpu.memory_space<vmem>>) attributes {dimension_semantics = [#tpu.dimension_semantics<parallel>], iteration_bounds = array<i64: 2>, scalar_prefetch = 0 : i64, scratch_operands = 1 : i64, tpu.core_type = #tpu.core_type<tc>, window_params = [{transform_indices = @transform_0, window_bounds = array<i64: 1, 32, 256>}, {pipeline_mode = #tpu.pipeline_mode<synchronous>, transform_indices = @transform_1, window_bounds = array<i64: 32, 36>}, {pipeline_mode = #tpu.pipeline_mode<synchronous>, transform_indices = @transform_2, window_bounds = array<i64: 32, 4>}, {pipeline_mode = #tpu.pipeline_mode<synchronous>, transform_indices = @transform_3, window_bounds = array<i64: 4, 32, 32>}, {pipeline_mode = #tpu.pipeline_mode<synchronous>, transform_indices = @transform_4, window_bounds = array<i64: 32, 4>}, {pipeline_mode = #tpu.pipeline_mode<synchronous>, transform_indices = @transform_5, window_bounds = array<i64: 32, 128>}, {pipeline_mode = #tpu.pipeline_mode<synchronous>, transform_indices = @transform_6, window_bounds = array<i64: 32, 1>}, {pipeline_mode = #tpu.pipeline_mode<synchronous>, transform_indices = @transform_7, window_bounds = array<i64: 32, 6>}, {pipeline_mode = #tpu.pipeline_mode<synchronous>, transform_indices = @transform_8, window_bounds = array<i64: 1, 6>}, {pipeline_mode = #tpu.pipeline_mode<synchronous>, transform_indices = @transform_9, window_bounds = array<i64: 32, 6>}, {pipeline_mode = #tpu.pipeline_mode<synchronous>, transform_indices = @transform_10, window_bounds = array<i64: 32, 1>}, {pipeline_mode = #tpu.pipeline_mode<synchronous>, transform_indices = @transform_11, window_bounds = array<i64: 1, 256>}, {pipeline_mode = #tpu.pipeline_mode<synchronous>, transform_indices = @transform_12, window_bounds = array<i64: 1, 256>}, {transform_indices = @transform_13, window_bounds = array<i64: 1, 32, 256>}]} {
    %cst = arith.constant 0.000000e+00 : f32
    %0 = vector.broadcast %cst : f32 to vector<32x128xf32>
    %c0 = arith.constant 0 : index
    %c0_0 = arith.constant 0 : index
    %1 = vector.load %arg15[%c0, %c0_0] : memref<32x512xf32, #tpu.memory_space<vmem>>, vector<32x128xf32>
    tpu.vector_store %arg15[%c0, %c0_0], %0 {strides = array<i32>} : memref<32x512xf32, #tpu.memory_space<vmem>>, vector<32x128xf32>,
    %cst_1 = arith.constant 0.000000e+00 : f32
    %2 = vector.broadcast %cst_1 : f32 to vector<32x128xf32>
    %c0_2 = arith.constant 0 : index
    %c384 = arith.constant 384 : index
    %3 = vector.load %arg15[%c0_2, %c384] : memref<32x512xf32, #tpu.memory_space<vmem>>, vector<32x128xf32>
    tpu.vector_store %arg15[%c0_2, %c384], %2 {strides = array<i32>} : memref<32x512xf32, #tpu.memory_space<vmem>>, vector<32x128xf32>,
    %c0_3 = arith.constant 0 : index
    %c0_4 = arith.constant 0 : index
    %c0_5 = arith.constant 0 : index
    %4 = vector.load %arg1[%c0_3, %c0_4, %c0_5] : memref<1x32x256xf32, #tpu.memory_space<vmem>>, vector<1x32x256xf32>
    %5 = vector.shape_cast %4 : vector<1x32x256xf32> to vector<32x256xf32>
    %c0_6 = arith.constant 0 : index
    %c128 = arith.constant 128 : index
    %6 = vector.load %arg15[%c0_6, %c128] : memref<32x512xf32, #tpu.memory_space<vmem>>, vector<32x256xf32>
    tpu.vector_store %arg15[%c0_6, %c128], %5 {strides = array<i32>} : memref<32x512xf32, #tpu.memory_space<vmem>>, vector<32x256xf32>,
    %c0_7 = arith.constant 0 : index
    %c0_8 = arith.constant 0 : index
    %7 = vector.load %arg12[%c0_7, %c0_8] : memref<1x256xf32, #tpu.memory_space<vmem>>, vector<1x256xf32>
    %c0_9 = arith.constant 0 : index
    %c0_10 = arith.constant 0 : index
    %8 = vector.load %arg13[%c0_9, %c0_10] : memref<1x256xf32, #tpu.memory_space<vmem>>, vector<1x256xf32>
    %cst_11 = arith.constant 0.000000e+00 : f32
    %9 = vector.broadcast %cst_11 : f32 to vector<32x256xf32>
    %c0_12 = arith.constant 0 : index
    %c0_13 = arith.constant 0 : index
    %10 = vector.load %arg2[%c0_12, %c0_13] : memref<32x36xf32, #tpu.memory_space<vmem>>, vector<32x1xf32>
    %c0_14 = arith.constant 0 : index
    %c111 = arith.constant 111 : index
    %11 = vector.load %arg15[%c0_14, %c111] : memref<32x512xf32, #tpu.memory_space<vmem>>, vector<32x256xf32>
    %12 = vector.broadcast %10 : vector<32x1xf32> to vector<32x256xf32>
    %13 = arith.mulf %11, %12 : vector<32x256xf32>
    %14 = arith.addf %9, %13 : vector<32x256xf32>
    %c0_15 = arith.constant 0 : index
    %c3 = arith.constant 3 : index
    %15 = vector.load %arg2[%c0_15, %c3] : memref<32x36xf32, #tpu.memory_space<vmem>>, vector<32x1xf32>
    %c0_16 = arith.constant 0 : index
    %c127 = arith.constant 127 : index
    %16 = vector.load %arg15[%c0_16, %c127] : memref<32x512xf32, #tpu.memory_space<vmem>>, vector<32x256xf32>
    %17 = vector.broadcast %15 : vector<32x1xf32> to vector<32x256xf32>
    %18 = arith.mulf %16, %17 : vector<32x256xf32>
    %19 = arith.addf %14, %18 : vector<32x256xf32>
    %c0_17 = arith.constant 0 : index
    %c6 = arith.constant 6 : index
    %20 = vector.load %arg2[%c0_17, %c6] : memref<32x36xf32, #tpu.memory_space<vmem>>, vector<32x1xf32>
    %c0_18 = arith.constant 0 : index
    %c143 = arith.constant 143 : index
    %21 = vector.load %arg15[%c0_18, %c143] : memref<32x512xf32, #tpu.memory_space<vmem>>, vector<32x256xf32>
    %22 = vector.broadcast %20 : vector<32x1xf32> to vector<32x256xf32>
    %23 = arith.mulf %21, %22 : vector<32x256xf32>
    %24 = arith.addf %19, %23 : vector<32x256xf32>
    %cst_19 = arith.constant 0.000000e+00 : f32
    %25 = vector.broadcast %cst_19 : f32 to vector<32x256xf32>
    %c0_20 = arith.constant 0 : index
    %c1 = arith.constant 1 : index
    %26 = vector.load %arg2[%c0_20, %c1] : memref<32x36xf32, #tpu.memory_space<vmem>>, vector<32x1xf32>
    %c0_21 = arith.constant 0 : index
    %c112 = arith.constant 112 : index
    %27 = vector.load %arg15[%c0_21, %c112] : memref<32x512xf32, #tpu.memory_space<vmem>>, vector<32x256xf32>
    %28 = vector.broadcast %26 : vector<32x1xf32> to vector<32x256xf32>
    %29 = arith.mulf %27, %28 : vector<32x256xf32>
    %30 = arith.addf %25, %29 : vector<32x256xf32>
    %c0_22 = arith.constant 0 : index
    %c4 = arith.constant 4 : index
    %31 = vector.load %arg2[%c0_22, %c4] : memref<32x36xf32, #tpu.memory_space<vmem>>, vector<32x1xf32>
    %c0_23 = arith.constant 0 : index
    %c128_24 = arith.constant 128 : index
    %32 = vector.load %arg15[%c0_23, %c128_24] : memref<32x512xf32, #tpu.memory_space<vmem>>, vector<32x256xf32>
    %33 = vector.broadcast %31 : vector<32x1xf32> to vector<32x256xf32>
    %34 = arith.mulf %32, %33 : vector<32x256xf32>
    %35 = arith.addf %30, %34 : vector<32x256xf32>
    %c0_25 = arith.constant 0 : index
    %c7 = arith.constant 7 : index
    %36 = vector.load %arg2[%c0_25, %c7] : memref<32x36xf32, #tpu.memory_space<vmem>>, vector<32x1xf32>
    %c0_26 = arith.constant 0 : index
    %c144 = arith.constant 144 : index
    %37 = vector.load %arg15[%c0_26, %c144] : memref<32x512xf32, #tpu.memory_space<vmem>>, vector<32x256xf32>
    %38 = vector.broadcast %36 : vector<32x1xf32> to vector<32x256xf32>
    %39 = arith.mulf %37, %38 : vector<32x256xf32>
    %40 = arith.addf %35, %39 : vector<32x256xf32>
    %cst_27 = arith.constant 0.000000e+00 : f32
    %41 = vector.broadcast %cst_27 : f32 to vector<32x256xf32>
    %c0_28 = arith.constant 0 : index
    %c2 = arith.constant 2 : index
    %42 = vector.load %arg2[%c0_28, %c2] : memref<32x36xf32, #tpu.memory_space<vmem>>, vector<32x1xf32>
    %c0_29 = arith.constant 0 : index
    %c113 = arith.constant 113 : index
    %43 = vector.load %arg15[%c0_29, %c113] : memref<32x512xf32, #tpu.memory_space<vmem>>, vector<32x256xf32>
    %44 = vector.broadcast %42 : vector<32x1xf32> to vector<32x256xf32>
    %45 = arith.mulf %43, %44 : vector<32x256xf32>
    %46 = arith.addf %41, %45 : vector<32x256xf32>
    %c0_30 = arith.constant 0 : index
    %c5 = arith.constant 5 : index
    %47 = vector.load %arg2[%c0_30, %c5] : memref<32x36xf32, #tpu.memory_space<vmem>>, vector<32x1xf32>
    %c0_31 = arith.constant 0 : index
    %c129 = arith.constant 129 : index
    %48 = vector.load %arg15[%c0_31, %c129] : memref<32x512xf32, #tpu.memory_space<vmem>>, vector<32x256xf32>
    %49 = vector.broadcast %47 : vector<32x1xf32> to vector<32x256xf32>
    %50 = arith.mulf %48, %49 : vector<32x256xf32>
    %51 = arith.addf %46, %50 : vector<32x256xf32>
    %c0_32 = arith.constant 0 : index
    %c8 = arith.constant 8 : index
    %52 = vector.load %arg2[%c0_32, %c8] : memref<32x36xf32, #tpu.memory_space<vmem>>, vector<32x1xf32>
    %c0_33 = arith.constant 0 : index
    %c145 = arith.constant 145 : index
    %53 = vector.load %arg15[%c0_33, %c145] : memref<32x512xf32, #tpu.memory_space<vmem>>, vector<32x256xf32>
    %54 = vector.broadcast %52 : vector<32x1xf32> to vector<32x256xf32>
    %55 = arith.mulf %53, %54 : vector<32x256xf32>
    %56 = arith.addf %51, %55 : vector<32x256xf32>
    %57 = vector.broadcast %7 : vector<1x256xf32> to vector<32x256xf32>
    %58 = arith.mulf %24, %57 : vector<32x256xf32>
    %59 = arith.addf %58, %40 : vector<32x256xf32>
    %60 = vector.broadcast %8 : vector<1x256xf32> to vector<32x256xf32>
    %61 = arith.mulf %56, %60 : vector<32x256xf32>
    %62 = arith.addf %59, %61 : vector<32x256xf32>
    %c0_34 = arith.constant 0 : index
    %c0_35 = arith.constant 0 : index
    %63 = vector.load %arg3[%c0_34, %c0_35] : memref<32x4xf32, #tpu.memory_space<vmem>>, vector<32x1xf32>
    %64 = vector.broadcast %63 : vector<32x1xf32> to vector<32x256xf32>
    %65 = arith.addf %62, %64 : vector<32x256xf32>
    %c0_36 = arith.constant 0 : index
    %c0_37 = arith.constant 0 : index
    %c0_38 = arith.constant 0 : index
    %66 = vector.load %arg4[%c0_36, %c0_37, %c0_38] : memref<4x32x32xbf16, #tpu.memory_space<vmem>>, vector<1x32x32xbf16>
    %67 = vector.shape_cast %66 : vector<1x32x32xbf16> to vector<32x32xbf16>
    %68 = arith.truncf %65 : vector<32x256xf32> to vector<32x256xbf16>
    %cst_39 = arith.constant dense<0.000000e+00> : vector<32x256xf32>
    %69 = tpu.matmul %67, %68, %cst_39 {dimension_numbers = #tpu.dot_dimension_numbers<[1], [0], [0], [1], [0, 0, 1, 1], [], []>} : vector<32x32xbf16>, vector<32x256xbf16>, vector<32x256xf32> -> vector<32x256xf32>
    %c0_40 = arith.constant 0 : index
    %c0_41 = arith.constant 0 : index
    %70 = vector.load %arg5[%c0_40, %c0_41] : memref<32x4xf32, #tpu.memory_space<vmem>>, vector<32x1xf32>
    %71 = vector.broadcast %70 : vector<32x1xf32> to vector<32x256xf32>
    %72 = arith.addf %69, %71 : vector<32x256xf32>
    %cst_42 = arith.constant 0.000000e+00 : f32
    %73 = vector.broadcast %cst_42 : f32 to vector<32x256xf32>
    %74 = arith.maximumf %72, %73 : vector<32x256xf32>
    %75 = arith.truncf %74 : vector<32x256xf32> to vector<32x256xbf16>
    %c0_43 = arith.constant 0 : index
    %c128_44 = arith.constant 128 : index
    %76 = vector.load %arg15[%c0_43, %c128_44] : memref<32x512xf32, #tpu.memory_space<vmem>>, vector<32x256xf32>
    tpu.vector_store %arg15[%c0_43, %c128_44], %74 {strides = array<i32>} : memref<32x512xf32, #tpu.memory_space<vmem>>, vector<32x256xf32>,
    %cst_45 = arith.constant 0.000000e+00 : f32
    %77 = vector.broadcast %cst_45 : f32 to vector<32x256xf32>
    %c0_46 = arith.constant 0 : index
    %c9 = arith.constant 9 : index
    %78 = vector.load %arg2[%c0_46, %c9] : memref<32x36xf32, #tpu.memory_space<vmem>>, vector<32x1xf32>
    %c0_47 = arith.constant 0 : index
    %c111_48 = arith.constant 111 : index
    %79 = vector.load %arg15[%c0_47, %c111_48] : memref<32x512xf32, #tpu.memory_space<vmem>>, vector<32x256xf32>
    %80 = vector.broadcast %78 : vector<32x1xf32> to vector<32x256xf32>
    %81 = arith.mulf %79, %80 : vector<32x256xf32>
    %82 = arith.addf %77, %81 : vector<32x256xf32>
    %c0_49 = arith.constant 0 : index
    %c12 = arith.constant 12 : index
    %83 = vector.load %arg2[%c0_49, %c12] : memref<32x36xf32, #tpu.memory_space<vmem>>, vector<32x1xf32>
    %c0_50 = arith.constant 0 : index
    %c127_51 = arith.constant 127 : index
    %84 = vector.load %arg15[%c0_50, %c127_51] : memref<32x512xf32, #tpu.memory_space<vmem>>, vector<32x256xf32>
    %85 = vector.broadcast %83 : vector<32x1xf32> to vector<32x256xf32>
    %86 = arith.mulf %84, %85 : vector<32x256xf32>
    %87 = arith.addf %82, %86 : vector<32x256xf32>
    %c0_52 = arith.constant 0 : index
    %c15 = arith.constant 15 : index
    %88 = vector.load %arg2[%c0_52, %c15] : memref<32x36xf32, #tpu.memory_space<vmem>>, vector<32x1xf32>
    %c0_53 = arith.constant 0 : index
    %c143_54 = arith.constant 143 : index
    %89 = vector.load %arg15[%c0_53, %c143_54] : memref<32x512xf32, #tpu.memory_space<vmem>>, vector<32x256xf32>
    %90 = vector.broadcast %88 : vector<32x1xf32> to vector<32x256xf32>
    %91 = arith.mulf %89, %90 : vector<32x256xf32>
    %92 = arith.addf %87, %91 : vector<32x256xf32>
    %cst_55 = arith.constant 0.000000e+00 : f32
    %93 = vector.broadcast %cst_55 : f32 to vector<32x256xf32>
    %c0_56 = arith.constant 0 : index
    %c10 = arith.constant 10 : index
    %94 = vector.load %arg2[%c0_56, %c10] : memref<32x36xf32, #tpu.memory_space<vmem>>, vector<32x1xf32>
    %c0_57 = arith.constant 0 : index
    %c112_58 = arith.constant 112 : index
    %95 = vector.load %arg15[%c0_57, %c112_58] : memref<32x512xf32, #tpu.memory_space<vmem>>, vector<32x256xf32>
    %96 = vector.broadcast %94 : vector<32x1xf32> to vector<32x256xf32>
    %97 = arith.mulf %95, %96 : vector<32x256xf32>
    %98 = arith.addf %93, %97 : vector<32x256xf32>
    %c0_59 = arith.constant 0 : index
    %c13 = arith.constant 13 : index
    %99 = vector.load %arg2[%c0_59, %c13] : memref<32x36xf32, #tpu.memory_space<vmem>>, vector<32x1xf32>
    %c0_60 = arith.constant 0 : index
    %c128_61 = arith.constant 128 : index
    %100 = vector.load %arg15[%c0_60, %c128_61] : memref<32x512xf32, #tpu.memory_space<vmem>>, vector<32x256xf32>
    %101 = vector.broadcast %99 : vector<32x1xf32> to vector<32x256xf32>
    %102 = arith.mulf %100, %101 : vector<32x256xf32>
    %103 = arith.addf %98, %102 : vector<32x256xf32>
    %c0_62 = arith.constant 0 : index
    %c16 = arith.constant 16 : index
    %104 = vector.load %arg2[%c0_62, %c16] : memref<32x36xf32, #tpu.memory_space<vmem>>, vector<32x1xf32>
    %c0_63 = arith.constant 0 : index
    %c144_64 = arith.constant 144 : index
    %105 = vector.load %arg15[%c0_63, %c144_64] : memref<32x512xf32, #tpu.memory_space<vmem>>, vector<32x256xf32>
    %106 = vector.broadcast %104 : vector<32x1xf32> to vector<32x256xf32>
    %107 = arith.mulf %105, %106 : vector<32x256xf32>
    %108 = arith.addf %103, %107 : vector<32x256xf32>
    %cst_65 = arith.constant 0.000000e+00 : f32
    %109 = vector.broadcast %cst_65 : f32 to vector<32x256xf32>
    %c0_66 = arith.constant 0 : index
    %c11 = arith.constant 11 : index
    %110 = vector.load %arg2[%c0_66, %c11] : memref<32x36xf32, #tpu.memory_space<vmem>>, vector<32x1xf32>
    %c0_67 = arith.constant 0 : index
    %c113_68 = arith.constant 113 : index
    %111 = vector.load %arg15[%c0_67, %c113_68] : memref<32x512xf32, #tpu.memory_space<vmem>>, vector<32x256xf32>
    %112 = vector.broadcast %110 : vector<32x1xf32> to vector<32x256xf32>
    %113 = arith.mulf %111, %112 : vector<32x256xf32>
    %114 = arith.addf %109, %113 : vector<32x256xf32>
    %c0_69 = arith.constant 0 : index
    %c14 = arith.constant 14 : index
    %115 = vector.load %arg2[%c0_69, %c14] : memref<32x36xf32, #tpu.memory_space<vmem>>, vector<32x1xf32>
    %c0_70 = arith.constant 0 : index
    %c129_71 = arith.constant 129 : index
    %116 = vector.load %arg15[%c0_70, %c129_71] : memref<32x512xf32, #tpu.memory_space<vmem>>, vector<32x256xf32>
    %117 = vector.broadcast %115 : vector<32x1xf32> to vector<32x256xf32>
    %118 = arith.mulf %116, %117 : vector<32x256xf32>
    %119 = arith.addf %114, %118 : vector<32x256xf32>
    %c0_72 = arith.constant 0 : index
    %c17 = arith.constant 17 : index
    %120 = vector.load %arg2[%c0_72, %c17] : memref<32x36xf32, #tpu.memory_space<vmem>>, vector<32x1xf32>
    %c0_73 = arith.constant 0 : index
    %c145_74 = arith.constant 145 : index
    %121 = vector.load %arg15[%c0_73, %c145_74] : memref<32x512xf32, #tpu.memory_space<vmem>>, vector<32x256xf32>
    %122 = vector.broadcast %120 : vector<32x1xf32> to vector<32x256xf32>
    %123 = arith.mulf %121, %122 : vector<32x256xf32>
    %124 = arith.addf %119, %123 : vector<32x256xf32>
    %125 = vector.broadcast %7 : vector<1x256xf32> to vector<32x256xf32>
    %126 = arith.mulf %92, %125 : vector<32x256xf32>
    %127 = arith.addf %126, %108 : vector<32x256xf32>
    %128 = vector.broadcast %8 : vector<1x256xf32> to vector<32x256xf32>
    %129 = arith.mulf %124, %128 : vector<32x256xf32>
    %130 = arith.addf %127, %129 : vector<32x256xf32>
    %c0_75 = arith.constant 0 : index
    %c1_76 = arith.constant 1 : index
    %131 = vector.load %arg3[%c0_75, %c1_76] : memref<32x4xf32, #tpu.memory_space<vmem>>, vector<32x1xf32>
    %132 = vector.broadcast %131 : vector<32x1xf32> to vector<32x256xf32>
    %133 = arith.addf %130, %132 : vector<32x256xf32>
    %c1_77 = arith.constant 1 : index
    %c0_78 = arith.constant 0 : index
    %c0_79 = arith.constant 0 : index
    %134 = vector.load %arg4[%c1_77, %c0_78, %c0_79] : memref<4x32x32xbf16, #tpu.memory_space<vmem>>, vector<1x32x32xbf16>
    %135 = vector.shape_cast %134 : vector<1x32x32xbf16> to vector<32x32xbf16>
    %136 = arith.truncf %133 : vector<32x256xf32> to vector<32x256xbf16>
    %cst_80 = arith.constant dense<0.000000e+00> : vector<32x256xf32>
    %137 = tpu.matmul %135, %136, %cst_80 {dimension_numbers = #tpu.dot_dimension_numbers<[1], [0], [0], [1], [0, 0, 1, 1], [], []>} : vector<32x32xbf16>, vector<32x256xbf16>, vector<32x256xf32> -> vector<32x256xf32>
    %c0_81 = arith.constant 0 : index
    %c1_82 = arith.constant 1 : index
    %138 = vector.load %arg5[%c0_81, %c1_82] : memref<32x4xf32, #tpu.memory_space<vmem>>, vector<32x1xf32>
    %139 = vector.broadcast %138 : vector<32x1xf32> to vector<32x256xf32>
    %140 = arith.addf %137, %139 : vector<32x256xf32>
    %cst_83 = arith.constant 0.000000e+00 : f32
    %141 = vector.broadcast %cst_83 : f32 to vector<32x256xf32>
    %142 = arith.maximumf %140, %141 : vector<32x256xf32>
    %143 = arith.truncf %142 : vector<32x256xf32> to vector<32x256xbf16>
    %c0_84 = arith.constant 0 : index
    %c128_85 = arith.constant 128 : index
    %144 = vector.load %arg15[%c0_84, %c128_85] : memref<32x512xf32, #tpu.memory_space<vmem>>, vector<32x256xf32>
    tpu.vector_store %arg15[%c0_84, %c128_85], %142 {strides = array<i32>} : memref<32x512xf32, #tpu.memory_space<vmem>>, vector<32x256xf32>,
    %cst_86 = arith.constant 0.000000e+00 : f32
    %145 = vector.broadcast %cst_86 : f32 to vector<32x256xf32>
    %c0_87 = arith.constant 0 : index
    %c18 = arith.constant 18 : index
    %146 = vector.load %arg2[%c0_87, %c18] : memref<32x36xf32, #tpu.memory_space<vmem>>, vector<32x1xf32>
    %c0_88 = arith.constant 0 : index
    %c111_89 = arith.constant 111 : index
    %147 = vector.load %arg15[%c0_88, %c111_89] : memref<32x512xf32, #tpu.memory_space<vmem>>, vector<32x256xf32>
    %148 = vector.broadcast %146 : vector<32x1xf32> to vector<32x256xf32>
    %149 = arith.mulf %147, %148 : vector<32x256xf32>
    %150 = arith.addf %145, %149 : vector<32x256xf32>
    %c0_90 = arith.constant 0 : index
    %c21 = arith.constant 21 : index
    %151 = vector.load %arg2[%c0_90, %c21] : memref<32x36xf32, #tpu.memory_space<vmem>>, vector<32x1xf32>
    %c0_91 = arith.constant 0 : index
    %c127_92 = arith.constant 127 : index
    %152 = vector.load %arg15[%c0_91, %c127_92] : memref<32x512xf32, #tpu.memory_space<vmem>>, vector<32x256xf32>
    %153 = vector.broadcast %151 : vector<32x1xf32> to vector<32x256xf32>
    %154 = arith.mulf %152, %153 : vector<32x256xf32>
    %155 = arith.addf %150, %154 : vector<32x256xf32>
    %c0_93 = arith.constant 0 : index
    %c24 = arith.constant 24 : index
    %156 = vector.load %arg2[%c0_93, %c24] : memref<32x36xf32, #tpu.memory_space<vmem>>, vector<32x1xf32>
    %c0_94 = arith.constant 0 : index
    %c143_95 = arith.constant 143 : index
    %157 = vector.load %arg15[%c0_94, %c143_95] : memref<32x512xf32, #tpu.memory_space<vmem>>, vector<32x256xf32>
    %158 = vector.broadcast %156 : vector<32x1xf32> to vector<32x256xf32>
    %159 = arith.mulf %157, %158 : vector<32x256xf32>
    %160 = arith.addf %155, %159 : vector<32x256xf32>
    %cst_96 = arith.constant 0.000000e+00 : f32
    %161 = vector.broadcast %cst_96 : f32 to vector<32x256xf32>
    %c0_97 = arith.constant 0 : index
    %c19 = arith.constant 19 : index
    %162 = vector.load %arg2[%c0_97, %c19] : memref<32x36xf32, #tpu.memory_space<vmem>>, vector<32x1xf32>
    %c0_98 = arith.constant 0 : index
    %c112_99 = arith.constant 112 : index
    %163 = vector.load %arg15[%c0_98, %c112_99] : memref<32x512xf32, #tpu.memory_space<vmem>>, vector<32x256xf32>
    %164 = vector.broadcast %162 : vector<32x1xf32> to vector<32x256xf32>
    %165 = arith.mulf %163, %164 : vector<32x256xf32>
    %166 = arith.addf %161, %165 : vector<32x256xf32>
    %c0_100 = arith.constant 0 : index
    %c22 = arith.constant 22 : index
    %167 = vector.load %arg2[%c0_100, %c22] : memref<32x36xf32, #tpu.memory_space<vmem>>, vector<32x1xf32>
    %c0_101 = arith.constant 0 : index
    %c128_102 = arith.constant 128 : index
    %168 = vector.load %arg15[%c0_101, %c128_102] : memref<32x512xf32, #tpu.memory_space<vmem>>, vector<32x256xf32>
    %169 = vector.broadcast %167 : vector<32x1xf32> to vector<32x256xf32>
    %170 = arith.mulf %168, %169 : vector<32x256xf32>
    %171 = arith.addf %166, %170 : vector<32x256xf32>
    %c0_103 = arith.constant 0 : index
    %c25 = arith.constant 25 : index
    %172 = vector.load %arg2[%c0_103, %c25] : memref<32x36xf32, #tpu.memory_space<vmem>>, vector<32x1xf32>
    %c0_104 = arith.constant 0 : index
    %c144_105 = arith.constant 144 : index
    %173 = vector.load %arg15[%c0_104, %c144_105] : memref<32x512xf32, #tpu.memory_space<vmem>>, vector<32x256xf32>
    %174 = vector.broadcast %172 : vector<32x1xf32> to vector<32x256xf32>
    %175 = arith.mulf %173, %174 : vector<32x256xf32>
    %176 = arith.addf %171, %175 : vector<32x256xf32>
    %cst_106 = arith.constant 0.000000e+00 : f32
    %177 = vector.broadcast %cst_106 : f32 to vector<32x256xf32>
    %c0_107 = arith.constant 0 : index
    %c20 = arith.constant 20 : index
    %178 = vector.load %arg2[%c0_107, %c20] : memref<32x36xf32, #tpu.memory_space<vmem>>, vector<32x1xf32>
    %c0_108 = arith.constant 0 : index
    %c113_109 = arith.constant 113 : index
    %179 = vector.load %arg15[%c0_108, %c113_109] : memref<32x512xf32, #tpu.memory_space<vmem>>, vector<32x256xf32>
    %180 = vector.broadcast %178 : vector<32x1xf32> to vector<32x256xf32>
    %181 = arith.mulf %179, %180 : vector<32x256xf32>
    %182 = arith.addf %177, %181 : vector<32x256xf32>
    %c0_110 = arith.constant 0 : index
    %c23 = arith.constant 23 : index
    %183 = vector.load %arg2[%c0_110, %c23] : memref<32x36xf32, #tpu.memory_space<vmem>>, vector<32x1xf32>
    %c0_111 = arith.constant 0 : index
    %c129_112 = arith.constant 129 : index
    %184 = vector.load %arg15[%c0_111, %c129_112] : memref<32x512xf32, #tpu.memory_space<vmem>>, vector<32x256xf32>
    %185 = vector.broadcast %183 : vector<32x1xf32> to vector<32x256xf32>
    %186 = arith.mulf %184, %185 : vector<32x256xf32>
    %187 = arith.addf %182, %186 : vector<32x256xf32>
    %c0_113 = arith.constant 0 : index
    %c26 = arith.constant 26 : index
    %188 = vector.load %arg2[%c0_113, %c26] : memref<32x36xf32, #tpu.memory_space<vmem>>, vector<32x1xf32>
    %c0_114 = arith.constant 0 : index
    %c145_115 = arith.constant 145 : index
    %189 = vector.load %arg15[%c0_114, %c145_115] : memref<32x512xf32, #tpu.memory_space<vmem>>, vector<32x256xf32>
    %190 = vector.broadcast %188 : vector<32x1xf32> to vector<32x256xf32>
    %191 = arith.mulf %189, %190 : vector<32x256xf32>
    %192 = arith.addf %187, %191 : vector<32x256xf32>
    %193 = vector.broadcast %7 : vector<1x256xf32> to vector<32x256xf32>
    %194 = arith.mulf %160, %193 : vector<32x256xf32>
    %195 = arith.addf %194, %176 : vector<32x256xf32>
    %196 = vector.broadcast %8 : vector<1x256xf32> to vector<32x256xf32>
    %197 = arith.mulf %192, %196 : vector<32x256xf32>
    %198 = arith.addf %195, %197 : vector<32x256xf32>
    %c0_116 = arith.constant 0 : index
    %c2_117 = arith.constant 2 : index
    %199 = vector.load %arg3[%c0_116, %c2_117] : memref<32x4xf32, #tpu.memory_space<vmem>>, vector<32x1xf32>
    %200 = vector.broadcast %199 : vector<32x1xf32> to vector<32x256xf32>
    %201 = arith.addf %198, %200 : vector<32x256xf32>
    %c2_118 = arith.constant 2 : index
    %c0_119 = arith.constant 0 : index
    %c0_120 = arith.constant 0 : index
    %202 = vector.load %arg4[%c2_118, %c0_119, %c0_120] : memref<4x32x32xbf16, #tpu.memory_space<vmem>>, vector<1x32x32xbf16>
    %203 = vector.shape_cast %202 : vector<1x32x32xbf16> to vector<32x32xbf16>
    %204 = arith.truncf %201 : vector<32x256xf32> to vector<32x256xbf16>
    %cst_121 = arith.constant dense<0.000000e+00> : vector<32x256xf32>
    %205 = tpu.matmul %203, %204, %cst_121 {dimension_numbers = #tpu.dot_dimension_numbers<[1], [0], [0], [1], [0, 0, 1, 1], [], []>} : vector<32x32xbf16>, vector<32x256xbf16>, vector<32x256xf32> -> vector<32x256xf32>
    %c0_122 = arith.constant 0 : index
    %c2_123 = arith.constant 2 : index
    %206 = vector.load %arg5[%c0_122, %c2_123] : memref<32x4xf32, #tpu.memory_space<vmem>>, vector<32x1xf32>
    %207 = vector.broadcast %206 : vector<32x1xf32> to vector<32x256xf32>
    %208 = arith.addf %205, %207 : vector<32x256xf32>
    %cst_124 = arith.constant 0.000000e+00 : f32
    %209 = vector.broadcast %cst_124 : f32 to vector<32x256xf32>
    %210 = arith.maximumf %208, %209 : vector<32x256xf32>
    %211 = arith.truncf %210 : vector<32x256xf32> to vector<32x256xbf16>
    %c0_125 = arith.constant 0 : index
    %c128_126 = arith.constant 128 : index
    %212 = vector.load %arg15[%c0_125, %c128_126] : memref<32x512xf32, #tpu.memory_space<vmem>>, vector<32x256xf32>
    tpu.vector_store %arg15[%c0_125, %c128_126], %210 {strides = array<i32>} : memref<32x512xf32, #tpu.memory_space<vmem>>, vector<32x256xf32>,
    %cst_127 = arith.constant 0.000000e+00 : f32
    %213 = vector.broadcast %cst_127 : f32 to vector<32x256xf32>
    %c0_128 = arith.constant 0 : index
    %c27 = arith.constant 27 : index
    %214 = vector.load %arg2[%c0_128, %c27] : memref<32x36xf32, #tpu.memory_space<vmem>>, vector<32x1xf32>
    %c0_129 = arith.constant 0 : index
    %c111_130 = arith.constant 111 : index
    %215 = vector.load %arg15[%c0_129, %c111_130] : memref<32x512xf32, #tpu.memory_space<vmem>>, vector<32x256xf32>
    %216 = vector.broadcast %214 : vector<32x1xf32> to vector<32x256xf32>
    %217 = arith.mulf %215, %216 : vector<32x256xf32>
    %218 = arith.addf %213, %217 : vector<32x256xf32>
    %c0_131 = arith.constant 0 : index
    %c30 = arith.constant 30 : index
    %219 = vector.load %arg2[%c0_131, %c30] : memref<32x36xf32, #tpu.memory_space<vmem>>, vector<32x1xf32>
    %c0_132 = arith.constant 0 : index
    %c127_133 = arith.constant 127 : index
    %220 = vector.load %arg15[%c0_132, %c127_133] : memref<32x512xf32, #tpu.memory_space<vmem>>, vector<32x256xf32>
    %221 = vector.broadcast %219 : vector<32x1xf32> to vector<32x256xf32>
    %222 = arith.mulf %220, %221 : vector<32x256xf32>
    %223 = arith.addf %218, %222 : vector<32x256xf32>
    %c0_134 = arith.constant 0 : index
    %c33 = arith.constant 33 : index
    %224 = vector.load %arg2[%c0_134, %c33] : memref<32x36xf32, #tpu.memory_space<vmem>>, vector<32x1xf32>
    %c0_135 = arith.constant 0 : index
    %c143_136 = arith.constant 143 : index
    %225 = vector.load %arg15[%c0_135, %c143_136] : memref<32x512xf32, #tpu.memory_space<vmem>>, vector<32x256xf32>
    %226 = vector.broadcast %224 : vector<32x1xf32> to vector<32x256xf32>
    %227 = arith.mulf %225, %226 : vector<32x256xf32>
    %228 = arith.addf %223, %227 : vector<32x256xf32>
    %cst_137 = arith.constant 0.000000e+00 : f32
    %229 = vector.broadcast %cst_137 : f32 to vector<32x256xf32>
    %c0_138 = arith.constant 0 : index
    %c28 = arith.constant 28 : index
    %230 = vector.load %arg2[%c0_138, %c28] : memref<32x36xf32, #tpu.memory_space<vmem>>, vector<32x1xf32>
    %c0_139 = arith.constant 0 : index
    %c112_140 = arith.constant 112 : index
    %231 = vector.load %arg15[%c0_139, %c112_140] : memref<32x512xf32, #tpu.memory_space<vmem>>, vector<32x256xf32>
    %232 = vector.broadcast %230 : vector<32x1xf32> to vector<32x256xf32>
    %233 = arith.mulf %231, %232 : vector<32x256xf32>
    %234 = arith.addf %229, %233 : vector<32x256xf32>
    %c0_141 = arith.constant 0 : index
    %c31 = arith.constant 31 : index
    %235 = vector.load %arg2[%c0_141, %c31] : memref<32x36xf32, #tpu.memory_space<vmem>>, vector<32x1xf32>
    %c0_142 = arith.constant 0 : index
    %c128_143 = arith.constant 128 : index
    %236 = vector.load %arg15[%c0_142, %c128_143] : memref<32x512xf32, #tpu.memory_space<vmem>>, vector<32x256xf32>
    %237 = vector.broadcast %235 : vector<32x1xf32> to vector<32x256xf32>
    %238 = arith.mulf %236, %237 : vector<32x256xf32>
    %239 = arith.addf %234, %238 : vector<32x256xf32>
    %c0_144 = arith.constant 0 : index
    %c34 = arith.constant 34 : index
    %240 = vector.load %arg2[%c0_144, %c34] : memref<32x36xf32, #tpu.memory_space<vmem>>, vector<32x1xf32>
    %c0_145 = arith.constant 0 : index
    %c144_146 = arith.constant 144 : index
    %241 = vector.load %arg15[%c0_145, %c144_146] : memref<32x512xf32, #tpu.memory_space<vmem>>, vector<32x256xf32>
    %242 = vector.broadcast %240 : vector<32x1xf32> to vector<32x256xf32>
    %243 = arith.mulf %241, %242 : vector<32x256xf32>
    %244 = arith.addf %239, %243 : vector<32x256xf32>
    %cst_147 = arith.constant 0.000000e+00 : f32
    %245 = vector.broadcast %cst_147 : f32 to vector<32x256xf32>
    %c0_148 = arith.constant 0 : index
    %c29 = arith.constant 29 : index
    %246 = vector.load %arg2[%c0_148, %c29] : memref<32x36xf32, #tpu.memory_space<vmem>>, vector<32x1xf32>
    %c0_149 = arith.constant 0 : index
    %c113_150 = arith.constant 113 : index
    %247 = vector.load %arg15[%c0_149, %c113_150] : memref<32x512xf32, #tpu.memory_space<vmem>>, vector<32x256xf32>
    %248 = vector.broadcast %246 : vector<32x1xf32> to vector<32x256xf32>
    %249 = arith.mulf %247, %248 : vector<32x256xf32>
    %250 = arith.addf %245, %249 : vector<32x256xf32>
    %c0_151 = arith.constant 0 : index
    %c32 = arith.constant 32 : index
    %251 = vector.load %arg2[%c0_151, %c32] : memref<32x36xf32, #tpu.memory_space<vmem>>, vector<32x1xf32>
    %c0_152 = arith.constant 0 : index
    %c129_153 = arith.constant 129 : index
    %252 = vector.load %arg15[%c0_152, %c129_153] : memref<32x512xf32, #tpu.memory_space<vmem>>, vector<32x256xf32>
    %253 = vector.broadcast %251 : vector<32x1xf32> to vector<32x256xf32>
    %254 = arith.mulf %252, %253 : vector<32x256xf32>
    %255 = arith.addf %250, %254 : vector<32x256xf32>
    %c0_154 = arith.constant 0 : index
    %c35 = arith.constant 35 : index
    %256 = vector.load %arg2[%c0_154, %c35] : memref<32x36xf32, #tpu.memory_space<vmem>>, vector<32x1xf32>
    %c0_155 = arith.constant 0 : index
    %c145_156 = arith.constant 145 : index
    %257 = vector.load %arg15[%c0_155, %c145_156] : memref<32x512xf32, #tpu.memory_space<vmem>>, vector<32x256xf32>
    %258 = vector.broadcast %256 : vector<32x1xf32> to vector<32x256xf32>
    %259 = arith.mulf %257, %258 : vector<32x256xf32>
    %260 = arith.addf %255, %259 : vector<32x256xf32>
    %261 = vector.broadcast %7 : vector<1x256xf32> to vector<32x256xf32>
    %262 = arith.mulf %228, %261 : vector<32x256xf32>
    %263 = arith.addf %262, %244 : vector<32x256xf32>
    %264 = vector.broadcast %8 : vector<1x256xf32> to vector<32x256xf32>
    %265 = arith.mulf %260, %264 : vector<32x256xf32>
    %266 = arith.addf %263, %265 : vector<32x256xf32>
    %c0_157 = arith.constant 0 : index
    %c3_158 = arith.constant 3 : index
    %267 = vector.load %arg3[%c0_157, %c3_158] : memref<32x4xf32, #tpu.memory_space<vmem>>, vector<32x1xf32>
    %268 = vector.broadcast %267 : vector<32x1xf32> to vector<32x256xf32>
    %269 = arith.addf %266, %268 : vector<32x256xf32>
    %c3_159 = arith.constant 3 : index
    %c0_160 = arith.constant 0 : index
    %c0_161 = arith.constant 0 : index
    %270 = vector.load %arg4[%c3_159, %c0_160, %c0_161] : memref<4x32x32xbf16, #tpu.memory_space<vmem>>, vector<1x32x32xbf16>
    %271 = vector.shape_cast %270 : vector<1x32x32xbf16> to vector<32x32xbf16>
    %272 = arith.truncf %269 : vector<32x256xf32> to vector<32x256xbf16>
    %cst_162 = arith.constant dense<0.000000e+00> : vector<32x256xf32>
    %273 = tpu.matmul %271, %272, %cst_162 {dimension_numbers = #tpu.dot_dimension_numbers<[1], [0], [0], [1], [0, 0, 1, 1], [], []>} : vector<32x32xbf16>, vector<32x256xbf16>, vector<32x256xf32> -> vector<32x256xf32>
    %c0_163 = arith.constant 0 : index
    %c3_164 = arith.constant 3 : index
    %274 = vector.load %arg5[%c0_163, %c3_164] : memref<32x4xf32, #tpu.memory_space<vmem>>, vector<32x1xf32>
    %275 = vector.broadcast %274 : vector<32x1xf32> to vector<32x256xf32>
    %276 = arith.addf %273, %275 : vector<32x256xf32>
    %cst_165 = arith.constant 0.000000e+00 : f32
    %277 = vector.broadcast %cst_165 : f32 to vector<32x256xf32>
    %278 = arith.maximumf %276, %277 : vector<32x256xf32>
    %279 = arith.truncf %278 : vector<32x256xf32> to vector<32x256xbf16>
    %280 = tpu.concatenate %75, %143, %211, %279 in 0 : vector<32x256xbf16>, vector<32x256xbf16>, vector<32x256xbf16>, vector<32x256xbf16> -> vector<128x256xbf16>
    %c0_166 = arith.constant 0 : index
    %c0_167 = arith.constant 0 : index
    %281 = vector.load %arg6[%c0_166, %c0_167] : memref<32x128xbf16, #tpu.memory_space<vmem>>, vector<32x128xbf16>
    %cst_168 = arith.constant dense<0.000000e+00> : vector<32x256xf32>
    %282 = tpu.matmul %281, %280, %cst_168 {dimension_numbers = #tpu.dot_dimension_numbers<[1], [0], [0], [1], [0, 0, 1, 1], [], []>} : vector<32x128xbf16>, vector<128x256xbf16>, vector<32x256xf32> -> vector<32x256xf32>
    %c0_169 = arith.constant 0 : index
    %c0_170 = arith.constant 0 : index
    %283 = vector.load %arg7[%c0_169, %c0_170] : memref<32x1xf32, #tpu.memory_space<vmem>>, vector<32x1xf32>
    %284 = vector.broadcast %283 : vector<32x1xf32> to vector<32x256xf32>
    %285 = arith.addf %282, %284 : vector<32x256xf32>
    %cst_171 = arith.constant 0.000000e+00 : f32
    %286 = vector.broadcast %cst_171 : f32 to vector<32x256xf32>
    %287 = arith.maximumf %285, %286 : vector<32x256xf32>
    %cst_172 = arith.constant dense<0.000000e+00> : vector<32xf32>
    %288 = vector.multi_reduction <add>, %287, %cst_172 [1] : vector<32x256xf32> to vector<32xf32>
    %289 = vector.shape_cast %288 : vector<32xf32> to vector<32x1xf32>
    %cst_173 = arith.constant 3.906250e-03 : f32
    %290 = vector.broadcast %cst_173 : f32 to vector<32x1xf32>
    %291 = arith.mulf %289, %290 : vector<32x1xf32>
    %c0_174 = arith.constant 0 : index
    %c0_175 = arith.constant 0 : index
    %292 = vector.load %arg8[%c0_174, %c0_175] : memref<32x6xf32, #tpu.memory_space<vmem>>, vector<32x6xf32>
    %293 = vector.broadcast %291 : vector<32x1xf32> to vector<32x6xf32>
    %294 = arith.mulf %292, %293 : vector<32x6xf32>
    %cst_176 = arith.constant dense<0.000000e+00> : vector<6xf32>
    %295 = vector.multi_reduction <add>, %294, %cst_176 [0] : vector<32x6xf32> to vector<6xf32>
    %296 = vector.shape_cast %295 : vector<6xf32> to vector<1x6xf32>
    %c0_177 = arith.constant 0 : index
    %c0_178 = arith.constant 0 : index
    %297 = vector.load %arg9[%c0_177, %c0_178] : memref<1x6xf32, #tpu.memory_space<vmem>>, vector<1x6xf32>
    %298 = arith.addf %296, %297 : vector<1x6xf32>
    %cst_179 = arith.constant 0.000000e+00 : f32
    %299 = vector.broadcast %cst_179 : f32 to vector<1x6xf32>
    %300 = arith.maximumf %298, %299 : vector<1x6xf32>
    %c0_180 = arith.constant 0 : index
    %c0_181 = arith.constant 0 : index
    %301 = vector.load %arg10[%c0_180, %c0_181] : memref<32x6xf32, #tpu.memory_space<vmem>>, vector<32x6xf32>
    %302 = vector.broadcast %300 : vector<1x6xf32> to vector<32x6xf32>
    %303 = arith.mulf %301, %302 : vector<32x6xf32>
    %cst_182 = arith.constant dense<0.000000e+00> : vector<32xf32>
    %304 = vector.multi_reduction <add>, %303, %cst_182 [1] : vector<32x6xf32> to vector<32xf32>
    %305 = vector.shape_cast %304 : vector<32xf32> to vector<32x1xf32>
    %c0_183 = arith.constant 0 : index
    %c0_184 = arith.constant 0 : index
    %306 = vector.load %arg11[%c0_183, %c0_184] : memref<32x1xf32, #tpu.memory_space<vmem>>, vector<32x1xf32>
    %307 = arith.addf %305, %306 : vector<32x1xf32>
    %cst_185 = arith.constant 0.000000e+00 : f32
    %308 = vector.broadcast %cst_185 : f32 to vector<32x1xf32>
    %309 = arith.subf %308, %307 : vector<32x1xf32>
    %310 = math.exp %309 : vector<32x1xf32>
    %cst_186 = arith.constant 1.000000e+00 : f32
    %311 = vector.broadcast %cst_186 : f32 to vector<32x1xf32>
    %312 = arith.addf %311, %310 : vector<32x1xf32>
    %cst_187 = arith.constant 1.000000e+00 : f32
    %313 = vector.broadcast %cst_187 : f32 to vector<32x1xf32>
    %314 = arith.divf %313, %312 : vector<32x1xf32>
    %315 = vector.broadcast %314 : vector<32x1xf32> to vector<32x256xf32>
    %316 = arith.mulf %287, %315 : vector<32x256xf32>
    %c0_188 = arith.constant 0 : index
    %c0_189 = arith.constant 0 : index
    %c0_190 = arith.constant 0 : index
    %317 = vector.load %arg14[%c0_188, %c0_189, %c0_190] : memref<1x32x256xf32, #tpu.memory_space<vmem>>, vector<1x32x256xf32>
    %318 = vector.shape_cast %317 : vector<1x32x256xf32> to vector<32x256xf32>
    %319 = vector.shape_cast %316 : vector<32x256xf32> to vector<1x32x256xf32>
    tpu.vector_store %arg14[%c0_188, %c0_189, %c0_190], %319 {strides = array<i32>} : memref<1x32x256xf32, #tpu.memory_space<vmem>>, vector<1x32x256xf32>,
    return
  }
  func.func @transform_0(%arg0: i32) -> (i32, i32, i32) {
    %c0_i32 = arith.constant 0 : i32
    %c0_i32_0 = arith.constant 0 : i32
    %c0_i32_1 = arith.constant 0 : i32
    return %arg0, %c0_i32, %c0_i32_0 : i32, i32, i32
  }
  func.func @transform_1(%arg0: i32) -> (i32, i32) {
    %c0_i32 = arith.constant 0 : i32
    %c0_i32_0 = arith.constant 0 : i32
    %c0_i32_1 = arith.constant 0 : i32
    return %c0_i32, %c0_i32_0 : i32, i32
  }
  func.func @transform_2(%arg0: i32) -> (i32, i32) {
    %c0_i32 = arith.constant 0 : i32
    %c0_i32_0 = arith.constant 0 : i32
    %c0_i32_1 = arith.constant 0 : i32
    return %c0_i32, %c0_i32_0 : i32, i32
  }
  func.func @transform_3(%arg0: i32) -> (i32, i32, i32) {
    %c0_i32 = arith.constant 0 : i32
    %c0_i32_0 = arith.constant 0 : i32
    %c0_i32_1 = arith.constant 0 : i32
    %c0_i32_2 = arith.constant 0 : i32
    return %c0_i32, %c0_i32_0, %c0_i32_1 : i32, i32, i32
  }
  func.func @transform_4(%arg0: i32) -> (i32, i32) {
    %c0_i32 = arith.constant 0 : i32
    %c0_i32_0 = arith.constant 0 : i32
    %c0_i32_1 = arith.constant 0 : i32
    return %c0_i32, %c0_i32_0 : i32, i32
  }
  func.func @transform_5(%arg0: i32) -> (i32, i32) {
    %c0_i32 = arith.constant 0 : i32
    %c0_i32_0 = arith.constant 0 : i32
    %c0_i32_1 = arith.constant 0 : i32
    return %c0_i32, %c0_i32_0 : i32, i32
  }
  func.func @transform_6(%arg0: i32) -> (i32, i32) {
    %c0_i32 = arith.constant 0 : i32
    %c0_i32_0 = arith.constant 0 : i32
    %c0_i32_1 = arith.constant 0 : i32
    return %c0_i32, %c0_i32_0 : i32, i32
  }
  func.func @transform_7(%arg0: i32) -> (i32, i32) {
    %c0_i32 = arith.constant 0 : i32
    %c0_i32_0 = arith.constant 0 : i32
    %c0_i32_1 = arith.constant 0 : i32
    return %c0_i32, %c0_i32_0 : i32, i32
  }
  func.func @transform_8(%arg0: i32) -> (i32, i32) {
    %c0_i32 = arith.constant 0 : i32
    %c0_i32_0 = arith.constant 0 : i32
    %c0_i32_1 = arith.constant 0 : i32
    return %c0_i32, %c0_i32_0 : i32, i32
  }
  func.func @transform_9(%arg0: i32) -> (i32, i32) {
    %c0_i32 = arith.constant 0 : i32
    %c0_i32_0 = arith.constant 0 : i32
    %c0_i32_1 = arith.constant 0 : i32
    return %c0_i32, %c0_i32_0 : i32, i32
  }
  func.func @transform_10(%arg0: i32) -> (i32, i32) {
    %c0_i32 = arith.constant 0 : i32
    %c0_i32_0 = arith.constant 0 : i32
    %c0_i32_1 = arith.constant 0 : i32
    return %c0_i32, %c0_i32_0 : i32, i32
  }
  func.func @transform_11(%arg0: i32) -> (i32, i32) {
    %c0_i32 = arith.constant 0 : i32
    %c0_i32_0 = arith.constant 0 : i32
    %c0_i32_1 = arith.constant 0 : i32
    return %c0_i32, %c0_i32_0 : i32, i32
  }
  func.func @transform_12(%arg0: i32) -> (i32, i32) {
    %c0_i32 = arith.constant 0 : i32
    %c0_i32_0 = arith.constant 0 : i32
    %c0_i32_1 = arith.constant 0 : i32
    return %c0_i32, %c0_i32_0 : i32, i32
  }
  func.func @transform_13(%arg0: i32) -> (i32, i32, i32) {
    %c0_i32 = arith.constant 0 : i32
    %c0_i32_0 = arith.constant 0 : i32
    %c0_i32_1 = arith.constant 0 : i32
    return %arg0, %c0_i32, %c0_i32_0 : i32, i32, i32
  }
}

</mosaic_0001>

<bundles_post_ra>
// kernel: block_forward.1
= control target key start
LH: loop header
LB: loop body
LE: loop exit
PB: predicated region body
PF: predicated region fallthrough
CT: control target
= control target key end

     0   :  { %s5358_s25 = smov 0   ;;  %s8356_s0 = inlined_call_operand.vmem [shape: f32[2,32,256], index: 0, kind: input, shape index: {}]   ;;  %s8357_s1 = inlined_call_operand.vmem [shape: f32[32,36], index: 1, kind: input, shape index: {}]   ;;  %s8358_s2 = inlined_call_operand.vmem [shape: f32[32,4], index: 2, kind: input, shape index: {}]   ;;  %s8359_s3 = inlined_call_operand.vmem [shape: bf16[4,32,32], index: 3, kind: input, shape index: {}]   ;;  %s8360_s4 = inlined_call_operand.vmem [shape: f32[32,4], index: 4, kind: input, shape index: {}]   ;;  %s8361_s5 = inlined_call_operand.vmem [shape: bf16[32,128], index: 5, kind: input, shape index: {}]   ;;  %s8362_s6 = inlined_call_operand.vmem [shape: f32[32,1], index: 6, kind: input, shape index: {}]   ;;  %s8363_s7 = inlined_call_operand.vmem [shape: f32[32,6], index: 7, kind: input, shape index: {}]   ;;  %s8364_s8 = inlined_call_operand.vmem [shape: f32[1,6], index: 8, kind: input, shape index: {}]   ;;  %s8365_s9 = inlined_call_operand.vmem [shape: f32[32,6], index: 9, kind: input, shape index: {}]   ;;  %s8366_s10 = inlined_call_operand.vmem [shape: f32[32,1], index: 10, kind: input, shape index: {}]   ;;  %s8367_s11 = inlined_call_operand.vmem [shape: f32[1,256], index: 11, kind: input, shape index: {}]   ;;  %s8368_s12 = inlined_call_operand.vmem [shape: f32[1,256], index: 12, kind: input, shape index: {}]   ;;  %s8369_s13 = inlined_call_operand.vmem [shape: f32[2,32,256], index: 13, kind: output, shape index: {}]  }
   0x1 LB: > { %s5006_s26 = sadd.s32 4294967295, %s5243_s25   ;;  %p5010_p0 = scmp.ge.s32.totalorder %s5243_s25, 1  ;;  %s5243_s25 = sphi %s5358_s25, %s23_s25  }
   0x2   : > { %p387_p1 = scmp.lt.s32.totalorder %s5243_s25, 3 }
   0x4   : > { %p388_p2 = pnand %p5010_p0, %p387_p1 }
   0x6   : > { %391 = sbr.rel (%p388_p2) target bundleno = 3596 (0xe0c), region = 72 }
   0xd   : > { %v5369_v0 = vld [vmem:[%s8357_s1] sm:$0xff]  ;;  %v5245_v1 = vmov 4   ;;  %v5246_v2 = vmov 5   ;;  %v5376_v3 = vld [vmem:[%s8357_s1 + $0x8] sm:$0xff]  ;;  %v5247_v4 = vmov 8   ;;  %v5248_v5 = vmov 7  }
   0xe   : > { %5100 = vset.pattern.permute.xlu0 %v5245_v1  ;;  %5101 = vset.pattern.permute.xlu1 %v5246_v2  ;;  %v5385_v6 = vld [vmem:[%s8357_s1 + $0x10] sm:$0xff]  ;;  %v5394_v7 = vld [vmem:[%s8357_s1 + $0x18] sm:$0xff]  ;;  %v5249_v8 = vmov 6   ;;  %v8370_v9 = vmov 3   ;;  %v8374_v10 = vmov 1   ;;  %v8372_v11 = vmov 2  }
   0xf   : > { %775 = vperm.xlu0 %5100, %v5369_v0   ;;  %987 = vperm.xlu1 %5101, %v5369_v0   ;;  %v8376_v12 = vmov 0   ;;  %p431_p3 = scmp.lt.s32.totalorder %s5006_s26, 1  ;;  %s5254_s22 = smov 112   ;;  %v1179_v59 = vlaneseq  ;;  %vm701_vm0 = vcmask 785408   ;;  %vm592_vm1 = vcmask 916480  }
  0x10   : > { %1522 = vmatprep.mubr.bf16.mxu1 %v8376_v12  ;;  %3630 = vmatprep.mubr.bf16.mxu0 %v8376_v12  ;;  %s5255_s23 = smov 96   ;;  %s5256_s28 = smov 113   ;;  %vm1290_vm2 = vcmask 924672   ;;  %vm1191_vm3 = vcmask 908288   ;;  %vm1244_vm4 = vcmask 1039360   ;;  %vm1343_vm5 = vcmask 1031168  }
  0x11   : > { %s8509_s26 = smov (!%p431_p3, %s5006_s26), 1  ;;  %v5517_v63 = vshrl.u32 %v1179_v59, 7  ;;  %s5257_s14 = smov 111   ;;  %vm1474_vm6 = vcmask 138240   ;;  %vm1483_vm7 = vcmask 261120   ;;  %vm4842_vm8 = vcmask 48128  }
  0x12   : > { %s5047_s18 = sshll.u32 %s8509_s26, 6  ;;  %s5258_s20 = smov 127  }
  0x13   : > { %779 = vperm.xlu0 %5100, %v5376_v3   ;;  %991 = vperm.xlu1 %5101, %v5376_v3   ;;  %s5443_s21 = scalar_lea.vmem %s8356_s0, %s5047_s18  ;;  %s5260_s30 = smov 17  }
  0x14   : > { %v5446_v13 = vld [vmem:[%s5443_s21] sm:$0xff]  ;;  %v5450_v16 = vld [vmem:[%s5443_s21 + $0x8] sm:$0xff]  ;;  %v5453_v17 = vld [vmem:[%s5443_s21 + $0x10] sm:$0xff]  ;;  %s440_s29 = scalar_lea.vmem %s8369_s13, %s5047_s18 }
  0x15   : > { %v5459_v22 = vld [vmem:[%s5443_s21 + $0x18] sm:$0xff]  ;;  %v5495_v50 = vld [vmem:[%s5443_s21 + $0x20] sm:$0xff]  ;;  %v5501_v54 = vld [vmem:[%s5443_s21 + $0x28] sm:$0xff] }
  0x16   : > { %v5504_v55 = vld [vmem:[%s5443_s21 + $0x30] sm:$0xff]  ;;  %v5511_v60 = vld [vmem:[%s5443_s21 + $0x38] sm:$0xff]  ;;  %s5259_s21 = smov 126  }
  0x17   : > { %5104 = vset.pattern.permute.xlu0 %v5247_v4  ;;  %5102 = vset.pattern.permute.xlu1 %v5248_v5 }
  0x18   : > { %1087 = vperm.xlu0 %5104, %v5376_v3   ;;  %855 = vperm.xlu1 %5102, %v5376_v3  }
  0x1c   : > { %5106 = vset.pattern.permute.xlu0 %v5246_v2  ;;  %5103 = vset.pattern.permute.xlu1 %v5247_v4 }
  0x1d   : > { %995 = vperm.xlu0 %5106, %v5385_v6   ;;  %1083 = vperm.xlu1 %5103, %v5369_v0  }
  0x21   : > { %5107 = vset.pattern.permute.xlu0 %v5248_v5  ;;  %5105 = vset.pattern.permute.xlu1 %v5245_v1 }
  0x22   : > { %851 = vperm.xlu0 %5107, %v5369_v0   ;;  %783 = vperm.xlu1 %5105, %v5385_v6  }
  0x26   : > { %863 = vperm.xlu0 %5107, %v5394_v7   ;;  %787 = vperm.xlu1 %5105, %v5394_v7  }
  0x2a   : > { %5108 = vset.pattern.permute.xlu1 %v5246_v2  ;;  %5113 = vset.pattern.permute.xlu0 %v5249_v8 }
  0x2b   : > { %999 = vperm.xlu1 %5108, %v5394_v7   ;;  %642 = vperm.xlu0 %5113, %v5376_v3  }
  0x2f   : > { %5109 = vset.pattern.permute.xlu1 %v5248_v5  ;;  %5114 = vset.pattern.permute.xlu0 %v8370_v9  ;;  %v5523_v5 = vsub.s32 0, %v5517_v63 }
  0x30   : > { %859 = vperm.xlu1 %5109, %v5385_v6   ;;  %529 = vperm.xlu0 %5114, %v5369_v0  }
  0x31   : > { %8417 = vst [vmem:[#allocation3_spill] sm:$0xff] %v5523_v5 }
  0x34   : > { %5110 = vset.pattern.permute.xlu1 %v5247_v4  ;;  %541 = vperm.xlu0 %5114, %v5394_v7  }
  0x35   : > { %1091 = vperm.xlu1 %5110, %v5385_v6  }
  0x38   : > { %5119 = vset.pattern.permute.xlu0 %v8374_v10 }
  0x39   : > { %1095 = vperm.xlu1 %5110, %v5394_v7   ;;  %743 = vperm.xlu0 %5119, %v5385_v6  }
  0x3d   : > { %5111 = vset.pattern.permute.xlu1 %v8370_v9  ;;  %5120 = vset.pattern.permute.xlu0 %v8372_v11 }
  0x3e   : > { %533 = vperm.xlu1 %5111, %v5376_v3   ;;  %947 = vperm.xlu0 %5120, %v5369_v0  }
  0x42   : > { %5112 = vset.pattern.permute.xlu1 %v5249_v8  ;;  %959 = vperm.xlu0 %5120, %v5394_v7  }
  0x43   : > { %638 = vperm.xlu1 %5112, %v5369_v0  }
  0x46   : > { %5123 = vset.pattern.permute.xlu0 %v8376_v12 }
  0x47   : > { %5115 = vset.pattern.permute.xlu1 %v8374_v10 }
  0x48   : > { %735 = vperm.xlu1 %5115, %v5369_v0  }
  0x4c   : > { %739 = vperm.xlu1 %5115, %v5376_v3  }
  0x50   : > { %5116 = vset.pattern.permute.xlu1 %v8372_v11 }
  0x51   : > { %951 = vperm.xlu1 %5116, %v5376_v3  }
  0x55   : > { %5117 = vset.pattern.permute.xlu1 %v8370_v9 }
  0x56   : > { %537 = vperm.xlu1 %5117, %v5385_v6  }
  0x5a   : > { %5118 = vset.pattern.permute.xlu1 %v5249_v8  ;;  %v467_v8 = vld [vmem:[%s8368_s12] sm:$0x3] }
  0x5b   : > { %646 = vperm.xlu1 %5118, %v5385_v6  }
  0x5f   : > { %650 = vperm.xlu1 %5118, %v5394_v7  }
  0x63   : > { %5121 = vset.pattern.permute.xlu1 %v8374_v10 }
  0x64   : > { %747 = vperm.xlu1 %5121, %v5394_v7  }
  0x68   : > { %5122 = vset.pattern.permute.xlu1 %v8372_v11 }
  0x69   : > { %955 = vperm.xlu1 %5122, %v5385_v6  }
  0x6d   : > { %5124 = vset.pattern.permute.xlu1 %v8376_v12 }
  0x8e   : > { %v776_v14 = vpop.permute.xlu0 %775  ;;  %v988_v19 = vpop.permute.xlu1 %987 }
  0x8f   : > { %v790_v15 = vmul.f32 %v776_v14, %v5446_v13  ;;  %v791_v20 = vmul.f32 %v776_v14, %v5450_v16  ;;  %v1002_v23 = vmul.f32 %v988_v19, %v5446_v13  ;;  %v1004_v26 = vmul.f32 0.0, %v988_v19 }
  0x90   : > { %v1003_v27 = vmul.f32 %v988_v19, %v5450_v16  ;;  %v1281_v19 = vrot.slane %v467_v8, %v5523_v5 }
  0x91   : > { %806 = vrot.lane.b32.xlu1 %v790_v15, %s5254_s22 }
  0x92   : > { %v780_v18 = vpop.permute.xlu0 %779  ;;  %v992_v28 = vpop.permute.xlu1 %991 }
  0x93   : > { %v792_v21 = vmul.f32 %v780_v18, %v5453_v17  ;;  %v793_v24 = vmul.f32 %v780_v18, %v5459_v22  ;;  %v1006_v30 = vmul.f32 %v992_v28, %v5459_v22  ;;  %v1005_v31 = vmul.f32 %v992_v28, %v5453_v17 }
  0x94   : > { %v1007_v35 = vmul.f32 0.0, %v992_v28 }
  0x95   : > { %810 = vrot.lane.b32.xlu0 %v792_v21, %s5254_s22  ;;  %808 = vrot.lane.b32.xlu1 %v791_v20, %s5254_s22  ;;  %v1185_v20 = vsub.s32 1, %v5517_v63  ;;  %v1376_v63 = vld [vmem:[%s8358_s2] sm:$0xff] }
  0x97   : > { %v1088_v25 = vpop.permute.xlu0 %1087  ;;  %v856_v33 = vpop.permute.xlu1 %855 }
  0x98   : > { %v870_v39 = vmul.f32 %v856_v33, %v5459_v22  ;;  %v869_v40 = vmul.f32 %v856_v33, %v5453_v17  ;;  %v871_v43 = vmul.f32 0.0, %v856_v33  ;;  %v1102_v48 = vmul.f32 %v1088_v25, %v5459_v22 }
  0x99   : > { %1026 = vrot.lane.b32.xlu0 %v1002_v23, %s5254_s22  ;;  %812 = vrot.lane.b32.xlu1 %v793_v24, %s5254_s22  ;;  %v1101_v49 = vmul.f32 %v1088_v25, %v5453_v17  ;;  %v1103_v52 = vmul.f32 0.0, %v1088_v25  ;;  %v1285_v23 = vrot.slane %v467_v8, %v1185_v20 }
  0x9c   : > { %v996_v29 = vpop.permute.xlu0 %995  ;;  %v1084_v38 = vpop.permute.xlu1 %1083 }
  0x9d   : > { %1030 = vrot.lane.b32.xlu0 %v1004_v26, %s5254_s22  ;;  %1028 = vrot.lane.b32.xlu1 %v1003_v27, %s5254_s22  ;;  %v1098_v42 = vmul.f32 %v1084_v38, %v5446_v13  ;;  %v1100_v44 = vmul.f32 0.0, %v1084_v38  ;;  %v1099_v45 = vmul.f32 %v1084_v38, %v5450_v16  ;;  %v1008_v62 = vmul.f32 %v996_v29, %v5495_v50 }
  0x9e   : > { %v1010_v1 = vmul.f32 0.0, %v996_v29  ;;  %v1009_v2 = vmul.f32 %v996_v29, %v5501_v54 }
  0xa1   : > { %1034 = vrot.lane.b32.xlu0 %v1006_v30, %s5254_s22  ;;  %1032 = vrot.lane.b32.xlu1 %v1005_v31, %s5254_s22  ;;  %v852_v32 = vpop.permute.xlu0 %851  ;;  %v784_v41 = vpop.permute.xlu1 %783 }
  0xa2   : > { %v866_v34 = vmul.f32 %v852_v32, %v5446_v13  ;;  %v868_v36 = vmul.f32 0.0, %v852_v32  ;;  %v867_v37 = vmul.f32 %v852_v32, %v5450_v16  ;;  %v794_v51 = vmul.f32 %v784_v41, %v5495_v50 }
  0xa3   : > { %v795_v56 = vmul.f32 %v784_v41, %v5501_v54 }
  0xa5   : > { %890 = vrot.lane.b32.xlu0 %v866_v34, %s5255_s23  ;;  %1036 = vrot.lane.b32.xlu1 %v1007_v35, %s5254_s22  ;;  %v788_v46 = vpop.permute.xlu1 %787  ;;  %v864_v29 = vpop.permute.xlu0 %863 }
  0xa6   : > { %v796_v57 = vmul.f32 %v788_v46, %v5504_v55  ;;  %v797_v61 = vmul.f32 %v788_v46, %v5511_v60  ;;  %v876_v30 = vmul.f32 %v864_v29, %v5511_v60  ;;  %v875_v31 = vmul.f32 %v864_v29, %v5504_v55 }
  0xa7   : > { %v877_v34 = vmul.f32 0.0, %v864_v29 }
  0xa9   : > { %894 = vrot.lane.b32.xlu0 %v868_v36, %s5255_s23  ;;  %892 = vrot.lane.b32.xlu1 %v867_v37, %s5255_s23 }
  0xaa   : > { %v1000_v47 = vpop.permute.xlu1 %999  ;;  %v643_v38 = vpop.permute.xlu0 %642 }
  0xab   : > { %v1012_v14 = vmul.f32 %v1000_v47, %v5511_v60  ;;  %v1011_v15 = vmul.f32 %v1000_v47, %v5504_v55  ;;  %v1013_v21 = vmul.f32 0.0, %v1000_v47  ;;  %v657_v8 = vmul.f32 %v643_v38, %v5459_v22 }
  0xad   : > { %898 = vrot.lane.b32.xlu0 %v870_v39, %s5255_s23  ;;  %896 = vrot.lane.b32.xlu1 %v869_v40, %s5255_s23 }
  0xaf   : > { %v860_v53 = vpop.permute.xlu1 %859 }
  0xb0   : > { %v872_v25 = vmul.f32 %v860_v53, %v5495_v50  ;;  %v874_v26 = vmul.f32 0.0, %v860_v53  ;;  %v873_v27 = vmul.f32 %v860_v53, %v5501_v54 }
  0xb1   : > { %1122 = vrot.lane.b32.xlu0 %v1098_v42, %s5255_s23  ;;  %900 = vrot.lane.b32.xlu1 %v871_v43, %s5255_s23  ;;  %v530_v43 = vpop.permute.xlu0 %529 }
  0xb2   : > { %v546_v46 = vmul.f32 %v530_v43, %v5450_v16 }
  0xb4   : > { %v1092_v58 = vpop.permute.xlu1 %1091 }
  0xb5   : > { %1126 = vrot.lane.b32.xlu0 %v1100_v44, %s5255_s23  ;;  %1124 = vrot.lane.b32.xlu1 %v1099_v45, %s5255_s23  ;;  %v1104_v33 = vmul.f32 %v1092_v58, %v5495_v50  ;;  %v1106_v36 = vmul.f32 0.0, %v1092_v58  ;;  %v1105_v37 = vmul.f32 %v1092_v58, %v5501_v54  ;;  %v542_v45 = vpop.permute.xlu0 %541 }
  0xb8   : > { %v1096_v4 = vpop.permute.xlu1 %1095 }
  0xb9   : > { %1130 = vrot.lane.b32.xlu0 %v1102_v48, %s5255_s23  ;;  %1128 = vrot.lane.b32.xlu1 %v1101_v49, %s5255_s23  ;;  %v1108_v40 = vmul.f32 %v1096_v4, %v5511_v60  ;;  %v1107_v41 = vmul.f32 %v1096_v4, %v5504_v55  ;;  %v1109_v42 = vmul.f32 0.0, %v1096_v4  ;;  %v545_v48 = vmul.f32 %v530_v43, %v5446_v13  ;;  %v5578_v49 = vpop.permute.xlu0 %743 }
  0xba   : > { %v658_v4 = vmul.f32 0.0, %v643_v38 }
  0xbd   : > { %814 = vrot.lane.b32.xlu0 %v794_v51, %s5254_s22  ;;  %1132 = vrot.lane.b32.xlu1 %v1103_v52, %s5255_s23  ;;  %v534_v18 = vpop.permute.xlu1 %533  ;;  %v5586_v52 = vpop.permute.xlu0 %947 }
  0xc1   : > { %818 = vrot.lane.b32.xlu0 %v796_v57, %s5254_s22  ;;  %816 = vrot.lane.b32.xlu1 %v795_v56, %s5254_s22  ;;  %v544_v56 = vmul.f32 0.0, %v530_v43  ;;  %v5596_v57 = vpop.permute.xlu0 %959 }
  0xc2   : > { %v5537_v24 = vpop.permute.xlu1 %638 }
  0xc3   : > { %v654_v53 = vmul.f32 %v5537_v24, %v5450_v16  ;;  %v653_v58 = vmul.f32 %v5537_v24, %v5446_v13 }
  0xc5   : > { %1038 = vrot.lane.b32.xlu0 %v1008_v62, %s5254_s22  ;;  %820 = vrot.lane.b32.xlu1 %v797_v61, %s5254_s22  ;;  %v656_v61 = vmul.f32 %v643_v38, %v5453_v17  ;;  %v655_v62 = vmul.f32 0.0, %v5537_v24  ;;  %v553_v38 = vmul.f32 0.0, %v542_v45 }
  0xc7   : > { %v5542_v28 = vpop.permute.xlu1 %735 }
  0xc9   : > { %1042 = vrot.lane.b32.xlu0 %v1010_v1, %s5254_s22  ;;  %1040 = vrot.lane.b32.xlu1 %v1009_v2, %s5254_s22 }
  0xcb   : > { %v5550_v32 = vpop.permute.xlu1 %739 }
  0xcd   : > { %1046 = vrot.lane.b32.xlu0 %v1012_v14, %s5254_s22  ;;  %1044 = vrot.lane.b32.xlu1 %v1011_v15, %s5254_s22 }
  0xd0   : > { %v5555_v35 = vpop.permute.xlu1 %951 }
  0xd1   : > { %1286 = vrot.lane.b32.xlu0 %v1281_v19, %s5256_s28  ;;  %1048 = vrot.lane.b32.xlu1 %v1013_v21, %s5254_s22  ;;  %v466_v19 = vld [vmem:[%s8367_s11] sm:$0x3] }
  0xd5   : > { %902 = vrot.lane.b32.xlu0 %v872_v25, %s5255_s23  ;;  %1288 = vrot.lane.b32.xlu1 %v1285_v23, %s5256_s28  ;;  %v5560_v39 = vpop.permute.xlu1 %537  ;;  %v555_v25 = vmul.f32 %v542_v45, %v5511_v60 }
  0xd6   : > { %v551_v21 = vmul.f32 %v5560_v39, %v5495_v50 }
  0xd9   : > { %906 = vrot.lane.b32.xlu0 %v874_v26, %s5255_s23  ;;  %904 = vrot.lane.b32.xlu1 %v873_v27, %s5255_s23  ;;  %v1186_v26 = vrot.slane %v466_v19, %v1185_v20  ;;  %v554_v27 = vmul.f32 %v542_v45, %v5504_v55 }
  0xda   : > { %v5566_v44 = vpop.permute.xlu1 %646 }
  0xdb   : > { %v660_v43 = vmul.f32 %v5566_v44, %v5501_v54 }
  0xdd   : > { %910 = vrot.lane.b32.xlu0 %v876_v30, %s5255_s23  ;;  %908 = vrot.lane.b32.xlu1 %v875_v31, %s5255_s23  ;;  %v1182_v31 = vrot.slane %v466_v19, %v5523_v5 }
  0xde   : > { %v5573_v47 = vpop.permute.xlu1 %650 }
  0xe1   : > { %1134 = vrot.lane.b32.xlu0 %v1104_v33, %s5255_s23  ;;  %912 = vrot.lane.b32.xlu1 %v877_v34, %s5255_s23  ;;  %v1377_v33 = vld [vmem:[%s8358_s2 + $0x8] sm:$0xff] }
  0xe3   : > { %v5581_v51 = vpop.permute.xlu1 %747 }
  0xe5   : > { %1138 = vrot.lane.b32.xlu0 %v1106_v36, %s5255_s23  ;;  %1136 = vrot.lane.b32.xlu1 %v1105_v37, %s5255_s23 }
  0xe9   : > { %1142 = vrot.lane.b32.xlu0 %v1108_v40, %s5255_s23  ;;  %1140 = vrot.lane.b32.xlu1 %v1107_v41, %s5255_s23  ;;  %v550_v40 = vmul.f32 0.0, %v5560_v39 }
  0xed   : > { %486 = vperm.xlu0 %5123, %v5369_v0   ;;  %1144 = vrot.lane.b32.xlu1 %v1109_v42, %s5255_s23  ;;  %v549_v0 = vmul.f32 %v534_v18, %v5459_v22 }
  0xf1   : > { %501 = vperm.xlu0 %5123, %v5394_v7   ;;  %491 = vperm.xlu1 %5124, %v5376_v3   ;;  %v547_v3 = vmul.f32 0.0, %v534_v18  ;;  %v548_v7 = vmul.f32 %v534_v18, %v5453_v17  ;;  %v552_v18 = vmul.f32 %v5560_v39, %v5501_v54  ;;  %v661_v39 = vmul.f32 0.0, %v5566_v44 }
  0xf5   : > { %572 = vrot.lane.b32.xlu0 %v546_v46, %s5254_s22  ;;  %496 = vperm.xlu1 %5124, %v5385_v6   ;;  %v5590_v6 = vpop.permute.xlu1 %955  ;;  %v659_v46 = vmul.f32 %v5566_v44, %v5495_v50  ;;  %v750_v44 = vmul.f32 0.0, %v5542_v28 }
  0xf9   : > { %578 = vrot.lane.b32.xlu0 %v549_v0, %s5254_s22  ;;  %570 = vrot.lane.b32.xlu1 %v545_v48, %s5254_s22  ;;  %v662_v0 = vmul.f32 %v5573_v47, %v5504_v55 }
  0xfd   : > { %574 = vrot.lane.b32.xlu0 %v547_v3, %s5254_s22  ;;  %576 = vrot.lane.b32.xlu1 %v548_v7, %s5254_s22  ;;  %v664_v3 = vmul.f32 0.0, %v5573_v47  ;;  %v752_v7 = vmul.f32 %v5542_v28, %v5450_v16 }
 0x101   : > { %679 = vrot.lane.b32.xlu0 %v654_v53, %s5255_s23  ;;  %568 = vrot.lane.b32.xlu1 %v544_v56, %s5254_s22 }
 0x103   : > { %v5600_v59 = vpop.permute.xlu1 %806 }
 0x105   : > { %683 = vrot.lane.b32.xlu0 %v656_v61, %s5255_s23  ;;  %677 = vrot.lane.b32.xlu1 %v653_v58, %s5255_s23 }
 0x107   : > { %v5606_v1 = vpop.permute.xlu0 %810  ;;  %v5608_v2 = vpop.permute.xlu1 %808 }
 0x108   : > { %v840_v61 = vadd.f32 %v5608_v2, %v752_v7 }
 0x109   : > { %687 = vrot.lane.b32.xlu0 %v658_v4, %s5255_s23  ;;  %681 = vrot.lane.b32.xlu1 %v655_v62, %s5255_s23  ;;  %v663_v62 = vmul.f32 %v5573_v47, %v5511_v60  ;;  %v755_v4 = vmul.f32 %v5550_v32, %v5459_v22  ;;  %v822_v47 = vsel %vm592_vm1, %v5600_v59, %v5608_v2 }
 0x10b   : > { %v5613_v14 = vpop.permute.xlu0 %1026  ;;  %v5615_v15 = vpop.permute.xlu1 %812 }
 0x10d   : > { %584 = vrot.lane.b32.xlu0 %v552_v18, %s5254_s22  ;;  %685 = vrot.lane.b32.xlu1 %v657_v8, %s5255_s23 }
 0x10f   : > { %v5626_v23 = vpop.permute.xlu0 %1030  ;;  %v5628_v24 = vpop.permute.xlu1 %1028 }
 0x111   : > { %590 = vrot.lane.b32.xlu0 %v555_v25, %s5254_s22  ;;  %582 = vrot.lane.b32.xlu1 %v551_v21, %s5254_s22  ;;  %v838_v25 = vadd.f32 %v5600_v59, %v750_v44  ;;  %v754_v59 = vmul.f32 %v5550_v32, %v5453_v17  ;;  %v963_v44 = vmul.f32 %v5586_v52, %v5446_v13 }
 0x113   : > { %v5636_v29 = vpop.permute.xlu0 %1034  ;;  %v5638_v30 = vpop.permute.xlu1 %1032 }
 0x115   : > { %1189 = vrot.lane.b32.xlu0 %v1186_v26, %s5257_s14  ;;  %588 = vrot.lane.b32.xlu1 %v554_v27, %s5254_s22  ;;  %v843_v26 = vadd.f32 %v5615_v15, %v755_v4  ;;  %v751_v27 = vmul.f32 %v5542_v28, %v5446_v13  ;;  %v823_v28 = vsel %vm592_vm1, %v5606_v1, %v5615_v15 }
 0x117   : > { %v891_v34 = vpop.permute.xlu0 %890  ;;  %v5645_v36 = vpop.permute.xlu1 %1036 }
 0x119   : > { %1387 = vperm.xlu0 %5123, %v1377_v33   ;;  %1187 = vrot.lane.b32.xlu1 %v1182_v31, %s5257_s14  ;;  %v753_v31 = vmul.f32 0.0, %v5550_v32  ;;  %v934_v33 = vadd.f32 %v891_v34, %v838_v25 }
 0x11b   : > { %v895_v20 = vpop.permute.xlu0 %894  ;;  %v893_v37 = vpop.permute.xlu1 %892 }
 0x11c   : > { %v915_v58 = vsel %vm701_vm0, %v893_v37, %v895_v20 }
 0x11d   : > { %586 = vrot.lane.b32.xlu0 %v553_v38, %s5254_s22  ;;  %1382 = vperm.xlu1 %5124, %v1376_v63   ;;  %v936_v8 = vadd.f32 %v915_v58, %v840_v61 }
 0x11f   : > { %v899_v41 = vpop.permute.xlu0 %898  ;;  %v897_v42 = vpop.permute.xlu1 %896 }
 0x121   : > { %691 = vrot.lane.b32.xlu0 %v660_v43, %s5255_s23  ;;  %580 = vrot.lane.b32.xlu1 %v550_v40, %s5254_s22  ;;  %v914_v40 = vsel %vm701_vm0, %v891_v34, %v893_v37  ;;  %v841_v43 = vadd.f32 %v5606_v1, %v753_v31  ;;  %v916_v34 = vsel %vm701_vm0, %v897_v42, %v899_v41 }
 0x122   : > { %v842_v37 = vadd.f32 %v823_v28, %v754_v59  ;;  %v966_v31 = vmul.f32 %v5555_v35, %v5453_v17 }
 0x123   : > { %v5658_v48 = vpop.permute.xlu0 %1122  ;;  %v901_v45 = vpop.permute.xlu1 %900 }
 0x124   : > { %v917_v21 = vsel %vm701_vm0, %v899_v41, %v901_v45  ;;  %v937_v45 = vadd.f32 %v897_v42, %v841_v43  ;;  %v1051_v41 = vsel %vm592_vm1, %v5628_v24, %v5626_v23  ;;  %v964_v42 = vmul.f32 %v5586_v52, %v5450_v16 }
 0x125   : > { %695 = vrot.lane.b32.xlu0 %v662_v0, %s5255_s23  ;;  %689 = vrot.lane.b32.xlu1 %v659_v46, %s5255_s23  ;;  %v939_v63 = vadd.f32 %v917_v21, %v843_v26  ;;  %v839_v46 = vadd.f32 %v822_v47, %v751_v27  ;;  %v1053_v47 = vsel %vm592_vm1, %v5636_v29, %v5645_v36 }
 0x126   : > { %v1072_v25 = vadd.f32 %v1051_v41, %v964_v42  ;;  %v962_v41 = vmul.f32 0.0, %v5586_v52 }
 0x127   : > { %v1127_v53 = vpop.permute.xlu0 %1126  ;;  %v1125_v56 = vpop.permute.xlu1 %1124  ;;  %v935_v2 = vadd.f32 %v914_v40, %v839_v46 }
 0x128   : > { %v1147_v4 = vsel %vm701_vm0, %v1125_v56, %v1127_v53  ;;  %v1146_v23 = vsel %vm701_vm0, %v5658_v48, %v1125_v56  ;;  %v967_v53 = vmul.f32 %v5555_v35, %v5459_v22 }
 0x129   : > { %699 = vrot.lane.b32.xlu0 %v664_v3, %s5255_s23  ;;  %693 = vrot.lane.b32.xlu1 %v661_v39, %s5255_s23  ;;  %v938_v3 = vadd.f32 %v916_v34, %v842_v37  ;;  %v1168_v27 = vadd.f32 %v1147_v4, %v1072_v25  ;;  %v1378_v25 = vld [vmem:[%s8358_s2 + $0x10] sm:$0xff] }
 0x12a   : > { %v1075_v36 = vadd.f32 %v1053_v47, %v967_v53 }
 0x12b   : > { %v1131_v18 = vpop.permute.xlu0 %1130  ;;  %v5677_v19 = vpop.permute.xlu1 %1128 }
 0x12c   : > { %v1148_v43 = vsel %vm701_vm0, %v5677_v19, %v1131_v18 }
 0x12d   : > { %1224 = vrot.lane.b32.xlu0 %v936_v8, %s5258_s20  ;;  %697 = vrot.lane.b32.xlu1 %v663_v62, %s5255_s23  ;;  %v1050_v62 = vsel %vm592_vm1, %v5613_v14, %v5628_v24  ;;  %v1052_v24 = vsel %vm592_vm1, %v5638_v30, %v5636_v29 }
 0x12e   : > { %v1071_v26 = vadd.f32 %v1050_v62, %v963_v44  ;;  %v1074_v28 = vadd.f32 %v1052_v24, %v966_v31  ;;  %v1379_v44 = vld [vmem:[%s8358_s2 + $0x18] sm:$0xff]  ;;  %v758_v24 = vmul.f32 %v5578_v49, %v5501_v54 }
 0x12f   : > { %v5690_v20 = vpop.permute.xlu0 %814  ;;  %v1133_v38 = vpop.permute.xlu1 %1132 }
 0x130   : > { %v1149_v56 = vsel %vm701_vm0, %v1131_v18, %v1133_v38  ;;  %v1170_v38 = vadd.f32 %v1148_v43, %v1074_v28 }
 0x131   : > { %1230 = vrot.lane.b32.xlu0 %v939_v63, %s5258_s20  ;;  %1220 = vrot.lane.b32.xlu1 %v934_v33, %s5258_s20  ;;  %v1167_v33 = vadd.f32 %v1146_v23, %v1071_v26 }
 0x133   : > { %v5701_v0 = vpop.permute.xlu0 %818  ;;  %v5703_v39 = vpop.permute.xlu1 %816 }
 0x135   : > { %1226 = vrot.lane.b32.xlu0 %v937_v45, %s5258_s20  ;;  %1222 = vrot.lane.b32.xlu1 %v935_v2, %s5258_s20  ;;  %v1171_v2 = vadd.f32 %v1149_v56, %v1075_v36  ;;  %v761_v36 = vmul.f32 %v5581_v51, %v5511_v60 }
 0x137   : > { %v5708_v7 = vpop.permute.xlu0 %1038  ;;  %v5710_v1 = vpop.permute.xlu1 %820 }
 0x138   : > { %v825_v43 = vsel %vm592_vm1, %v5701_v0, %v5710_v1 }
 0x139   : > { %1228 = vrot.lane.b32.xlu1 %v938_v3, %s5258_s20  ;;  %v965_v3 = vmul.f32 0.0, %v5555_v35  ;;  %v1070_v35 = vadd.f32 %v5613_v14, %v962_v41  ;;  %v757_v14 = vmul.f32 %v5578_v49, %v5495_v50  ;;  %v759_v41 = vmul.f32 0.0, %v5581_v51 }
 0x13b   : > { %v5713_v32 = vpop.permute.xlu0 %1042  ;;  %v5715_v15 = vpop.permute.xlu1 %1040  ;;  %v1073_v4 = vadd.f32 %v5638_v30, %v965_v3  ;;  %v1166_v52 = vadd.f32 %v5658_v48, %v1070_v35  ;;  %v824_v30 = vsel %vm592_vm1, %v5690_v20, %v5703_v39  ;;  %v970_v3 = vmul.f32 %v5590_v6, %v5501_v54 }
 0x13c   : > { %v847_v35 = vadd.f32 %v5701_v0, %v759_v41 }
 0x13d   : > { %v1169_v23 = vadd.f32 %v5677_v19, %v1073_v4  ;;  %v756_v4 = vmul.f32 0.0, %v5578_v49 }
 0x13f   : > { %v5717_v58 = vpop.permute.xlu0 %1046  ;;  %v5719_v61 = vpop.permute.xlu1 %1044 }
 0x140   : > { %v1056_v0 = vsel %vm592_vm1, %v5719_v61, %v5717_v58 }
 0x143   : > { %v5732_v8 = vpop.permute.xlu0 %1286  ;;  %v5734_v21 = vpop.permute.xlu1 %1048 }
 0x144   : > { %v1298_v53 = vmul.f32 %v5732_v8, %v1169_v23  ;;  %v1295_v48 = vmul.f32 %v5732_v8, %v1166_v52 }
 0x147   : > { %v5749_v63 = vpop.permute.xlu0 %902  ;;  %v5751_v40 = vpop.permute.xlu1 %1288 }
 0x148   : > { %v1297_v29 = vmul.f32 %v5751_v40, %v1168_v27  ;;  %v5758_v46 = vsel %vm1290_vm2, %v5732_v8, %v5751_v40  ;;  %v1300_v18 = vmul.f32 %v5751_v40, %v1171_v2  ;;  %v846_v27 = vadd.f32 %v5703_v39, %v758_v24 }
 0x149   : > { %v1296_v59 = vmul.f32 %v5758_v46, %v1167_v33  ;;  %v1299_v37 = vmul.f32 %v5758_v46, %v1170_v38  ;;  %v845_v33 = vadd.f32 %v824_v30, %v757_v14  ;;  %v760_v39 = vmul.f32 %v5581_v51, %v5504_v55 }
 0x14a   : > { %1323 = vrot.lane.b32.xlu0 %v1297_v29, %s5259_s21  ;;  %v849_v38 = vadd.f32 %v5710_v1, %v761_v36  ;;  %v1054_v1 = vsel %vm592_vm1, %v5708_v7, %v5715_v15  ;;  %v844_v51 = vadd.f32 %v5690_v20, %v756_v4  ;;  %v973_v30 = vmul.f32 %v5596_v57, %v5511_v60 }
 0x14b   : > { %v907_v45 = vpop.permute.xlu0 %906  ;;  %v905_v34 = vpop.permute.xlu1 %904  ;;  %1321 = vrot.lane.b32.xlu1 %v1296_v59, %s5259_s21  ;;  %v972_v20 = vmul.f32 %v5596_v57, %v5504_v55  ;;  %v968_v36 = vmul.f32 0.0, %v5590_v6 }
 0x14c   : > { %v919_v19 = vsel %vm701_vm0, %v905_v34, %v907_v45  ;;  %v918_v31 = vsel %vm701_vm0, %v5749_v63, %v905_v34  ;;  %v848_v34 = vadd.f32 %v825_v43, %v760_v39 }
 0x14d   : > { %v942_v29 = vadd.f32 %v919_v19, %v846_v27  ;;  %v941_v28 = vadd.f32 %v918_v31, %v845_v33  ;;  %v940_v19 = vadd.f32 %v5749_v63, %v844_v51  ;;  %v1080_v33 = vadd.f32 %v1056_v0, %v972_v20 }
 0x14e   : > { %1329 = vrot.lane.b32.xlu0 %v1300_v18, %s5259_s21  ;;  %v1055_v18 = vsel %vm592_vm1, %v5715_v15, %v5713_v32  ;;  %v1076_v39 = vadd.f32 %v5708_v7, %v968_v36 }
 0x14f   : > { %v911_v42 = vpop.permute.xlu0 %910  ;;  %v909_v62 = vpop.permute.xlu1 %908  ;;  %1327 = vrot.lane.b32.xlu1 %v1299_v37, %s5259_s21  ;;  %v1078_v23 = vadd.f32 %v1055_v18, %v970_v3 }
 0x150   : > { %v920_v45 = vsel %vm701_vm0, %v909_v62, %v911_v42 }
 0x152   : > { %1397 = vperm.xlu0 %5123, %v1379_v44   ;;  %v969_v44 = vmul.f32 %v5590_v6, %v5495_v50 }
 0x153   : > { %v5779_v26 = vpop.permute.xlu0 %1134  ;;  %v913_v47 = vpop.permute.xlu1 %912  ;;  %1392 = vperm.xlu1 %5124, %v1378_v25   ;;  %v944_v25 = vadd.f32 %v920_v45, %v848_v34 }
 0x154   : > { %v921_v59 = vsel %vm701_vm0, %v911_v42, %v913_v47  ;;  %v1077_v15 = vadd.f32 %v1054_v1, %v969_v44  ;;  %v1057_v47 = vsel %vm592_vm1, %v5717_v58, %v5734_v21  ;;  %v971_v58 = vmul.f32 0.0, %v5596_v57 }
 0x155   : > { %v945_v42 = vadd.f32 %v921_v59, %v849_v38  ;;  %v1081_v27 = vadd.f32 %v1057_v47, %v973_v30  ;;  %v1172_v57 = vadd.f32 %v5779_v26, %v1076_v39 }
 0x156   : > { %1325 = vrot.lane.b32.xlu0 %v1298_v53, %s5259_s21  ;;  %v943_v53 = vadd.f32 %v909_v62, %v847_v35 }
 0x157   : > { %v1137_v56 = vpop.permute.xlu1 %1136  ;;  %1319 = vrot.lane.b32.xlu1 %v1295_v48, %s5259_s21  ;;  %v1139_v2 = vpop.permute.xlu0 %1138  ;;  %v1301_v38 = vmul.f32 %v5732_v8, %v1172_v57 }
 0x158   : > { %v1151_v32 = vsel %vm701_vm0, %v1137_v56, %v1139_v2  ;;  %v1150_v52 = vsel %vm701_vm0, %v5779_v26, %v1137_v56 }
 0x159   : > { %v1174_v14 = vadd.f32 %v1151_v32, %v1078_v23  ;;  %v1173_v48 = vadd.f32 %v1150_v52, %v1077_v15 }
 0x15a   : > { %1236 = vrot.lane.b32.xlu0 %v942_v29, %s5258_s20  ;;  %v1079_v29 = vadd.f32 %v5719_v61, %v971_v58 }
 0x15b   : > { %v1141_v37 = vpop.permute.xlu1 %1140  ;;  %1234 = vrot.lane.b32.xlu1 %v941_v28, %s5258_s20  ;;  %v1143_v24 = vpop.permute.xlu0 %1142  ;;  %v1303_v62 = vmul.f32 %v5751_v40, %v1174_v14  ;;  %v1302_v63 = vmul.f32 %v5758_v46, %v1173_v48 }
 0x15c   : > { %v1152_v31 = vsel %vm701_vm0, %v1141_v37, %v1143_v24  ;;  %v1175_v28 = vadd.f32 %v1141_v37, %v1079_v29 }
 0x15d   : > { %v1176_v43 = vadd.f32 %v1152_v31, %v1080_v33 }
 0x15e   : > { %1242 = vrot.lane.b32.xlu0 %v945_v42, %s5258_s20  ;;  %v1304_v6 = vmul.f32 %v5732_v8, %v1175_v28 }
 0x15f   : > { %v1145_v49 = vpop.permute.xlu1 %1144  ;;  %1240 = vrot.lane.b32.xlu1 %v944_v25, %s5258_s20  ;;  %v1305_v2 = vmul.f32 %v5758_v46, %v1176_v43 }
 0x160   : > { %v1153_v21 = vsel %vm701_vm0, %v1143_v24, %v1145_v49 }
 0x161   : > { %v1177_v56 = vadd.f32 %v1153_v21, %v1081_v27 }
 0x162   : > { %1238 = vrot.lane.b32.xlu0 %v943_v53, %s5258_s20 }
 0x163   : > { %1232 = vrot.lane.b32.xlu1 %v940_v19, %s5258_s20  ;;  %v1306_v59 = vmul.f32 %v5751_v40, %v1177_v56 }
 0x166   : > { %1335 = vrot.lane.b32.xlu0 %v1303_v62, %s5259_s21 }
 0x167   : > { %1333 = vrot.lane.b32.xlu1 %v1302_v63, %s5259_s21 }
 0x16a   : > { %1341 = vrot.lane.b32.xlu0 %v1306_v59, %s5259_s21 }
 0x16b   : > { %1339 = vrot.lane.b32.xlu1 %v1305_v2, %s5259_s21 }
 0x16c   : > { %v5856_v61 = vpop.permute.xlu0 %486 }
 0x16d   : > { %v506_v62 = vmul.f32 %v5856_v61, %v5450_v16  ;;  %v505_v36 = vmul.f32 %v5856_v61, %v5446_v13 }
 0x16e   : > { %1337 = vrot.lane.b32.xlu0 %v1304_v6, %s5259_s21 }
 0x16f   : > { %1331 = vrot.lane.b32.xlu1 %v1301_v38, %s5259_s21 }
 0x170   : > { %v5861_v7 = vpop.permute.xlu0 %501  ;;  %v5863_v45 = vpop.permute.xlu1 %491 }
 0x171   : > { %v509_v63 = vmul.f32 %v5863_v45, %v5459_v22  ;;  %v508_v39 = vmul.f32 %v5863_v45, %v5453_v17 }
 0x174   : > { %v573_v26 = vpop.permute.xlu0 %572  ;;  %v5865_v34 = vpop.permute.xlu1 %496 }
 0x175   : > { %v615_v28 = vadd.f32 %v573_v26, %v506_v62 }
 0x178   : > { %v579_v18 = vpop.permute.xlu0 %578  ;;  %v5867_v37 = vpop.permute.xlu1 %570 }
 0x179   : > { %v594_v43 = vsel %vm592_vm1, %v5867_v37, %v573_v26  ;;  %v618_v2 = vadd.f32 %v579_v18, %v509_v63 }
 0x17a   : > { %v614_v6 = vadd.f32 %v594_v43, %v505_v36 }
 0x17c   : > { %v5869_v3 = vpop.permute.xlu0 %574  ;;  %v5871_v41 = vpop.permute.xlu1 %576 }
 0x17d   : > { %v596_v16 = vsel %vm592_vm1, %v5871_v41, %v579_v18 }
 0x17e   : > { %v617_v26 = vadd.f32 %v596_v16, %v508_v39 }
 0x180   : > { %v680_v1 = vpop.permute.xlu0 %679  ;;  %v5873_v42 = vpop.permute.xlu1 %568 }
 0x184   : > { %v5875_v44 = vpop.permute.xlu0 %683  ;;  %v5877_v4 = vpop.permute.xlu1 %677 }
 0x185   : > { %v702_v59 = vsel %vm701_vm0, %v5877_v4, %v680_v1 }
 0x186   : > { %v723_v62 = vadd.f32 %v702_v59, %v614_v6 }
 0x188   : > { %v688_v25 = vpop.permute.xlu0 %687  ;;  %v682_v32 = vpop.permute.xlu1 %681 }
 0x189   : > { %v703_v29 = vsel %vm701_vm0, %v680_v1, %v682_v32 }
 0x18a   : > { %v724_v38 = vadd.f32 %v703_v29, %v615_v28 }
 0x18c   : > { %v5879_v35 = vpop.permute.xlu0 %584  ;;  %v686_v23 = vpop.permute.xlu1 %685 }
 0x18d   : > { %v705_v13 = vsel %vm701_vm0, %v686_v23, %v688_v25  ;;  %v704_v32 = vsel %vm701_vm0, %v5875_v44, %v686_v23 }
 0x18e   : > { %v727_v9 = vadd.f32 %v705_v13, %v618_v2  ;;  %v726_v36 = vadd.f32 %v704_v32, %v617_v26 }
 0x190   : > { %v5881_v52 = vpop.permute.xlu0 %590  ;;  %v5883_v51 = vpop.permute.xlu1 %582 }
 0x194   : > { %v5885_v15 = vpop.permute.xlu0 %1189  ;;  %v5887_v47 = vpop.permute.xlu1 %588 }
 0x195   : > { %8418 = vst [vmem:[#allocation4_spill] sm:$0xff] %v5885_v15  ;;  %v1198_v1 = vmul.f32 %v5885_v15, %v724_v38  ;;  %v1201_v43 = vmul.f32 %v5885_v15, %v727_v9 }
 0x198   : > { %v5889_v24 = vpop.permute.xlu0 %1387  ;;  %v5891_v49 = vpop.permute.xlu1 %1187 }
 0x199   : > { %8419 = vst [vmem:[#allocation5_spill] sm:$0xff] %v5891_v49  ;;  %v5935_v17 = vsel %vm1191_vm3, %v5891_v49, %v5885_v15 }
 0x19a   : > { %8420 = vst [vmem:[#allocation6_spill] sm:$0xff] %v5935_v17  ;;  %v1197_v23 = vmul.f32 %v5935_v17, %v723_v62  ;;  %v1200_v59 = vmul.f32 %v5935_v17, %v726_v36  ;;  %v507_v36 = vmul.f32 0.0, %v5863_v45 }
 0x19c   : > { %v5893_v0 = vpop.permute.xlu0 %586  ;;  %v5895_v30 = vpop.permute.xlu1 %1382 }
 0x1a0   : > { %v5897_v53 = vpop.permute.xlu0 %691  ;;  %v5899_v14 = vpop.permute.xlu1 %580 }
 0x1a4   : > { %v5901_v20 = vpop.permute.xlu0 %695  ;;  %v5903_v19 = vpop.permute.xlu1 %689 }
 0x1a8   : > { %v5905_v48 = vpop.permute.xlu0 %699  ;;  %v5907_v21 = vpop.permute.xlu1 %693 }
 0x1ac   : > { %v1225_v27 = vpop.permute.xlu0 %1224  ;;  %v5909_v31 = vpop.permute.xlu1 %697 }
 0x1ad   : > { %v1267_v63 = vadd.f32 %v1225_v27, %v1198_v1 }
 0x1b0   : > { %v5911_v33 = vpop.permute.xlu1 %1220  ;;  %v1231_v58 = vpop.permute.xlu0 %1230 }
 0x1b1   : > { %v1270_v39 = vadd.f32 %v1231_v58, %v1201_v43 }
 0x1b4   : > { %v5915_v56 = vpop.permute.xlu1 %1222  ;;  %v1227_v57 = vpop.permute.xlu0 %1226 }
 0x1b5   : > { %v1246_v25 = vsel %vm1244_vm4, %v5915_v56, %v1225_v27  ;;  %v1245_v45 = vsel %vm1244_vm4, %v5911_v33, %v5915_v56  ;;  %v512_v56 = vmul.f32 %v5865_v34, %v5501_v54  ;;  %v600_v54 = vsel %vm592_vm1, %v5887_v47, %v5881_v52 }
 0x1b6   : > { %v1266_v16 = vadd.f32 %v1246_v25, %v1197_v23 }
 0x1b8   : > { %v1229_v22 = vpop.permute.xlu1 %1228 }
 0x1b9   : > { %v1248_v28 = vsel %vm1244_vm4, %v1229_v22, %v1231_v58 }
 0x1ba   : > { %v1269_v6 = vadd.f32 %v1248_v28, %v1200_v59 }
 0x1bc   : > { %v1324_v18 = vpop.permute.xlu0 %1323 }
 0x1bd   : > { %v1322_v29 = vpop.permute.xlu1 %1321  ;;  %v1366_v13 = vadd.f32 %v1324_v18, %v1267_v63  ;;  %v595_v63 = vsel %vm592_vm1, %v5869_v3, %v5871_v41 }
 0x1be   : > { %v1345_v11 = vsel %vm1343_vm5, %v1322_v29, %v1324_v18  ;;  %v616_v23 = vadd.f32 %v595_v63, %v507_v36 }
 0x1bf   : > { %v1365_v38 = vadd.f32 %v1345_v11, %v1266_v16  ;;  %v1402_v9 = vadd.f32 %v5895_v30, %v1366_v13  ;;  %v504_v11 = vmul.f32 0.0, %v5856_v61  ;;  %v1247_v61 = vsel %vm1244_vm4, %v1227_v57, %v1229_v22 }
 0x1c0   : > { %v1330_v2 = vpop.permute.xlu0 %1329  ;;  %v725_v28 = vadd.f32 %v5875_v44, %v616_v23 }
 0x1c1   : > { %v1369_v10 = vadd.f32 %v1330_v2, %v1270_v39  ;;  %v1328_v32 = vpop.permute.xlu1 %1327  ;;  %v1401_v1 = vadd.f32 %v5895_v30, %v1365_v38 }
 0x1c2   : > { %v1347_v27 = vsel %vm1343_vm5, %v1328_v32, %v1330_v2 }
 0x1c3   : > { %v1405_v26 = vadd.f32 %v5889_v24, %v1369_v10  ;;  %v1368_v62 = vadd.f32 %v1347_v27, %v1269_v6  ;;  %v593_v10 = vsel %vm592_vm1, %v5873_v42, %v5867_v37  ;;  %v1199_v37 = vmul.f32 %v5891_v49, %v725_v28 }
 0x1c4   : > { %v613_v43 = vadd.f32 %v593_v10, %v504_v11 }
 0x1c5   : > { %v1404_v58 = vadd.f32 %v5889_v24, %v1368_v62  ;;  %v1418_v25 = vpack.c.bf16 %v1405_v26, %v1402_v9  ;;  %v1268_v41 = vadd.f32 %v1247_v61, %v1199_v37  ;;  %v515_v26 = vmul.f32 %v5861_v7, %v5511_v60 }
 0x1c6   : > { %v722_v16 = vadd.f32 %v5877_v4, %v613_v43  ;;  %v621_v62 = vadd.f32 %v5879_v35, %v512_v56  ;;  %v513_v43 = vmul.f32 0.0, %v5861_v7 }
 0x1c7   : > { %1466 = vrot.lane.b32.xlu0 %v1418_v25, %s5260_s30  ;;  %v1417_v18 = vpack.c.bf16 %v1404_v58, %v1401_v1  ;;  %v514_v1 = vmul.f32 %v5861_v7, %v5504_v55  ;;  %v624_v58 = vadd.f32 %v5881_v52, %v515_v26  ;;  %v597_v25 = vsel %vm592_vm1, %v5899_v14, %v5883_v51 }
 0x1c8   : > { %v1196_v3 = vmul.f32 %v5891_v49, %v722_v16  ;;  %v708_v55 = vsel %vm701_vm0, %v5901_v20, %v5909_v31  ;;  %v510_v52 = vmul.f32 0.0, %v5865_v34 }
 0x1c9   : > { %1464 = vrot.lane.b32.xlu1 %v1417_v18, %s5260_s30  ;;  %v623_v11 = vadd.f32 %v600_v54, %v514_v1 }
 0x1ca   : > { %v1265_v13 = vadd.f32 %v1245_v45, %v1196_v3  ;;  %v619_v23 = vadd.f32 %v597_v25, %v510_v52  ;;  %v1424_v52 = vld [vmem:[%s8360_s4 + $0x10] sm:$0xff] }
 0x1cc   : > { %v728_v7 = vadd.f32 %v5903_v19, %v619_v23  ;;  %v6068_v23 = vld [vmem:[%s8357_s1 + $0x10] sm:$0xff] }
 0x1d1   : > { %v5961_v39 = vpop.permute.xlu0 %1397 }
 0x1d2   : > { %v5965_v59 = vpop.permute.xlu1 %1392 }
 0x1d5   : > { %v1326_v42 = vpop.permute.xlu0 %1325 }
 0x1d6   : > { %v1346_v44 = vsel %vm1343_vm5, %v1326_v42, %v1328_v32  ;;  %v1320_v2 = vpop.permute.xlu1 %1319  ;;  %v598_v32 = vsel %vm592_vm1, %v5883_v51, %v5879_v35  ;;  %v732_v51 = vadd.f32 %v708_v55, %v623_v11 }
 0x1d7   : > { %v1367_v6 = vadd.f32 %v1346_v44, %v1268_v41  ;;  %v1344_v4 = vsel %vm1343_vm5, %v1320_v2, %v1322_v29  ;;  %v707_v29 = vsel %vm701_vm0, %v5897_v53, %v5907_v21  ;;  %v706_v21 = vsel %vm701_vm0, %v5903_v19, %v5897_v53 }
 0x1d8   : > { %v1364_v57 = vadd.f32 %v1344_v4, %v1265_v13  ;;  %v730_v18 = vadd.f32 %v707_v29, %v621_v62  ;;  %v599_v53 = vsel %vm592_vm1, %v5893_v0, %v5887_v47  ;;  %v1206_v3 = vmul.f32 %v5935_v17, %v732_v51  ;;  %v6078_v51 = vld [vmem:[%s8357_s1 + $0x18] sm:$0xff] }
 0x1d9   : > { %v1403_v22 = vadd.f32 %v5889_v24, %v1367_v6  ;;  %v1237_v38 = vpop.permute.xlu0 %1236  ;;  %v622_v28 = vadd.f32 %v599_v53, %v513_v43  ;;  %v1202_v19 = vmul.f32 %v5891_v49, %v728_v7  ;;  %v5261_v53 = vmov 13  }
 0x1da   : > { %v1400_v27 = vadd.f32 %v5895_v30, %v1364_v57  ;;  %v1235_v33 = vpop.permute.xlu1 %1234  ;;  %v511_v30 = vmul.f32 %v5865_v34, %v5495_v50  ;;  %v709_v50 = vsel %vm701_vm0, %v5909_v31, %v5905_v48  ;;  %v1204_v14 = vmul.f32 %v5885_v15, %v730_v18  ;;  %v1422_v18 = vld [vmem:[%s8360_s4] sm:$0xff] }
 0x1db   : > { %v733_v48 = vadd.f32 %v709_v50, %v624_v58  ;;  %v1250_v31 = vsel %vm1244_vm4, %v1235_v33, %v1237_v38  ;;  %v731_v37 = vadd.f32 %v5901_v20, %v622_v28  ;;  %v5264_v43 = vmov 16  }
 0x1dc   : > { %v1416_v9 = vpack.c.bf16 %v1403_v22, %v1400_v27  ;;  %v620_v35 = vadd.f32 %v598_v32, %v511_v30  ;;  %v1273_v61 = vadd.f32 %v1237_v38, %v1204_v14  ;;  %v5265_v14 = vmov 15  }
 0x1dd   : > { %v1243_v24 = vpop.permute.xlu0 %1242  ;;  %v1207_v45 = vmul.f32 %v5885_v15, %v733_v48  ;;  %v1205_v20 = vmul.f32 %v5891_v49, %v731_v37  ;;  %v6060_v48 = vld [vmem:[%s8357_s1 + $0x8] sm:$0xff]  ;;  %v5266_v28 = vmov 12  }
 0x1de   : > { %1462 = vrot.lane.b32.xlu1 %v1416_v9, %s5260_s30  ;;  %v1241_v60 = vpop.permute.xlu1 %1240  ;;  %v729_v10 = vadd.f32 %v706_v21, %v620_v35 }
 0x1df   : > { %v1252_v47 = vsel %vm1244_vm4, %v1241_v60, %v1243_v24  ;;  %v1276_v13 = vadd.f32 %v1243_v24, %v1207_v45 }
 0x1e0   : > { %v1203_v34 = vmul.f32 %v5935_v17, %v729_v10  ;;  %v1275_v2 = vadd.f32 %v1252_v47, %v1206_v3  ;;  %v5262_v10 = vmov 14  }
 0x1e1   : > { %v1239_v36 = vpop.permute.xlu0 %1238 }
 0x1e2   : > { %v1233_v63 = vpop.permute.xlu1 %1232  ;;  %v1272_v42 = vadd.f32 %v1250_v31, %v1203_v34  ;;  %v1251_v4 = vsel %vm1244_vm4, %v1239_v36, %v1241_v60  ;;  %v1425_v36 = vld [vmem:[%s8360_s4 + $0x18] sm:$0xff]  ;;  %v5267_v31 = vmov 10  }
 0x1e3   : > { %v1249_v57 = vsel %vm1244_vm4, %v1233_v63, %v1235_v33  ;;  %v1274_v29 = vadd.f32 %v1251_v4, %v1205_v20  ;;  %v5263_v63 = vmov 17  }
 0x1e4   : > { %v1271_v24 = vadd.f32 %v1249_v57, %v1202_v19 }
 0x1e5   : > { %v1336_v16 = vpop.permute.xlu0 %1335 }
 0x1e6   : > { %v1334_v0 = vpop.permute.xlu1 %1333  ;;  %v1372_v44 = vadd.f32 %v1336_v16, %v1273_v61  ;;  %v5269_v61 = vmov 9  }
 0x1e7   : > { %v1349_v41 = vsel %vm1343_vm5, %v1334_v0, %v1336_v16  ;;  %v5268_v16 = vmov 11  }
 0x1e8   : > { %v1371_v22 = vadd.f32 %v1349_v41, %v1272_v42  ;;  %v1408_v9 = vadd.f32 %v5965_v59, %v1372_v44  ;;  %v5211_v44 = vld [vmem:[%s8359_s3] sm:$0xff]  }
 0x1e9   : > { %v1342_v6 = vpop.permute.xlu0 %1341 }
 0x1ea   : > { %v1375_v38 = vadd.f32 %v1342_v6, %v1276_v13  ;;  %v1340_v27 = vpop.permute.xlu1 %1339  ;;  %v1407_v62 = vadd.f32 %v5965_v59, %v1371_v22 }
 0x1eb   : > { %v1351_v56 = vsel %vm1343_vm5, %v1340_v27, %v1342_v6 }
 0x1ec   : > { %v1411_v26 = vadd.f32 %v5961_v39, %v1375_v38  ;;  %v1374_v32 = vadd.f32 %v1351_v56, %v1275_v2  ;;  %v5212_v2 = vld [vmem:[%s8359_s3 + $0x8] sm:$0xff]  }
 0x1ed   : > { %v1338_v30 = vpop.permute.xlu0 %1337 }
 0x1ee   : > { %v1410_v33 = vadd.f32 %v5961_v39, %v1374_v32  ;;  %v1350_v54 = vsel %vm1343_vm5, %v1338_v30, %v1340_v27  ;;  %v1332_v60 = vpop.permute.xlu1 %1331  ;;  %v1421_v1 = vpack.c.bf16 %v1411_v26, %v1408_v9 }
 0x1ef   : > { %v1373_v58 = vadd.f32 %v1350_v54, %v1274_v29  ;;  %v1348_v21 = vsel %vm1343_vm5, %v1332_v60, %v1334_v0 }
 0x1f0   : > { %v1370_v50 = vadd.f32 %v1348_v21, %v1271_v24  ;;  %1472 = vrot.lane.b32.xlu1 %v1421_v1, %s5260_s30  ;;  %v1420_v35 = vpack.c.bf16 %v1410_v33, %v1407_v62 }
 0x1f1   : > { %v1409_v25 = vadd.f32 %v5961_v39, %v1373_v58  ;;  %v1423_v39 = vld [vmem:[%s8360_s4 + $0x8] sm:$0xff] }
 0x1f2   : > { %v1406_v55 = vadd.f32 %v5965_v59, %v1370_v50  ;;  %1470 = vrot.lane.b32.xlu0 %v1420_v35, %s5260_s30  ;;  %v6050_v59 = vld [vmem:[%s8357_s1] sm:$0xff] }
 0x1f4   : > { %v1419_v11 = vpack.c.bf16 %v1409_v25, %v1406_v55  ;;  %1428 = vperm.xlu1 %5124, %v1422_v18  }
 0x1f6   : > { %1468 = vrot.lane.b32.xlu0 %v1419_v11, %s5260_s30 }
 0x1f8   : > { %1438 = vperm.xlu1 %5124, %v1424_v52  }
 0x1fa   : > { %1433 = vperm.xlu0 %5123, %v1423_v39  }
 0x1fc   : > { %5125 = vset.pattern.permute.xlu1 %v5261_v53 }
 0x1fd   : > { %1868 = vperm.xlu1 %5125, %v6050_v59  }
 0x1fe   : > { %1443 = vperm.xlu0 %5123, %v1425_v36  }
 0x201   : > { %5127 = vset.pattern.permute.xlu1 %v5262_v10 }
 0x202   : > { %2080 = vperm.xlu1 %5127, %v6050_v59   ;;  %5126 = vset.pattern.permute.xlu0 %v5261_v53 }
 0x203   : > { %1872 = vperm.xlu0 %5126, %v6060_v48  }
 0x206   : > { %2084 = vperm.xlu1 %5127, %v6060_v48  }
 0x207   : > { %5130 = vset.pattern.permute.xlu0 %v5263_v63 }
 0x208   : > { %2180 = vperm.xlu0 %5130, %v6060_v48  }
 0x20a   : > { %5128 = vset.pattern.permute.xlu1 %v5264_v43 }
 0x20b   : > { %1948 = vperm.xlu1 %5128, %v6060_v48  }
 0x20c   : > { %5132 = vset.pattern.permute.xlu0 %v5262_v10 }
 0x20d   : > { %2088 = vperm.xlu0 %5132, %v6068_v23  }
 0x20f   : > { %5129 = vset.pattern.permute.xlu1 %v5263_v63 }
 0x210   : > { %2176 = vperm.xlu1 %5129, %v6050_v59  }
 0x211   : > { %5133 = vset.pattern.permute.xlu0 %v5264_v43 }
 0x212   : > { %1944 = vperm.xlu0 %5133, %v6050_v59  }
 0x214   : > { %5131 = vset.pattern.permute.xlu1 %v5261_v53 }
 0x215   : > { %1876 = vperm.xlu1 %5131, %v6068_v23  }
 0x216   : > { %1956 = vperm.xlu0 %5133, %v6078_v51  }
 0x219   : > { %1880 = vperm.xlu1 %5131, %v6078_v51  }
 0x21a   : > { %5139 = vset.pattern.permute.xlu0 %v5265_v14 }
 0x21b   : > { %1736 = vperm.xlu0 %5139, %v6060_v48  }
 0x21d   : > { %5134 = vset.pattern.permute.xlu1 %v5262_v10 }
 0x21e   : > { %2092 = vperm.xlu1 %5134, %v6078_v51  }
 0x21f   : > { %5140 = vset.pattern.permute.xlu0 %v5266_v28 }
 0x220   : > { %1624 = vperm.xlu0 %5140, %v6050_v59  }
 0x222   : > { %5135 = vset.pattern.permute.xlu1 %v5264_v43 }
 0x223   : > { %1952 = vperm.xlu1 %5135, %v6068_v23  }
 0x224   : > { %1636 = vperm.xlu0 %5140, %v6078_v51  }
 0x227   : > { %5136 = vset.pattern.permute.xlu1 %v5263_v63 }
 0x228   : > { %2184 = vperm.xlu1 %5136, %v6068_v23   ;;  %5145 = vset.pattern.permute.xlu0 %v5267_v31 }
 0x229   : > { %1836 = vperm.xlu0 %5145, %v6068_v23  }
 0x22c   : > { %2188 = vperm.xlu1 %5136, %v6078_v51  }
 0x22d   : > { %5146 = vset.pattern.permute.xlu0 %v5268_v16 }
 0x22e   : > { %2040 = vperm.xlu0 %5146, %v6050_v59  }
 0x230   : > { %5137 = vset.pattern.permute.xlu1 %v5266_v28 }
 0x231   : > { %1628 = vperm.xlu1 %5137, %v6060_v48  }
 0x232   : > { %2052 = vperm.xlu0 %5146, %v6078_v51  }
 0x235   : > { %5138 = vset.pattern.permute.xlu1 %v5265_v14 }
 0x236   : > { %1732 = vperm.xlu1 %5138, %v6050_v59   ;;  %5149 = vset.pattern.permute.xlu0 %v5269_v61 }
 0x239   : > { %v1467_v34 = vpop.permute.xlu0 %1466 }
 0x23a   : > { %5141 = vset.pattern.permute.xlu1 %v5267_v31 }
 0x23b   : > { %v1465_v45 = vpop.permute.xlu1 %1464  ;;  %1828 = vperm.xlu1 %5141, %v6050_v59  }
 0x23c   : > { %v1476_v47 = vsel %vm1474_vm6, %v1465_v45, %v1467_v34 }
 0x23d   : > { %1490 = vmatprep.subr.bf16.mxu1 %v1476_v47 }
 0x23f   : > { %1832 = vperm.xlu1 %5141, %v6060_v48  }
 0x243   : > { %5142 = vset.pattern.permute.xlu1 %v5268_v16 }
 0x244   : > { %2044 = vperm.xlu1 %5142, %v6060_v48  }
 0x248   : > { %5143 = vset.pattern.permute.xlu1 %v5266_v28 }
 0x249   : > { %1632 = vperm.xlu1 %5143, %v6068_v23  }
 0x24d   : > { %5144 = vset.pattern.permute.xlu1 %v5265_v14 }
 0x24e   : > { %1740 = vperm.xlu1 %5144, %v6068_v23  }
 0x250   : > { %v1463_v0 = vpop.permute.xlu1 %1462 }
 0x251   : > { %v1475_v37 = vsel %vm1474_vm6, %v1463_v0, %v1465_v45 }
 0x252   : > { %1491 = vmatpush1.bf16.msra.mxu1 %v1475_v37  ;;  %1744 = vperm.xlu1 %5144, %v6078_v51  }
 0x256   : > { %5147 = vset.pattern.permute.xlu1 %v5267_v31 }
 0x257   : > { %1840 = vperm.xlu1 %5147, %v6078_v51  }
 0x25b   : > { %5148 = vset.pattern.permute.xlu1 %v5268_v16 }
 0x25c   : > { %2048 = vperm.xlu1 %5148, %v6068_v23  }
 0x260   : > { %5150 = vset.pattern.permute.xlu1 %v5269_v61 }
 0x262   : > { %v1473_v7 = vpop.permute.xlu1 %1472 }
 0x264   : > { %v1471_v3 = vpop.permute.xlu0 %1470 }
 0x265   : > { %v1478_v41 = vsel %vm1474_vm6, %v1471_v3, %v1473_v7 }
 0x266   : > { %1492 = vmatprep.subr.bf16.mxu1 %v1478_v41 }
 0x268   : > { %v1469_v42 = vpop.permute.xlu0 %1468 }
 0x269   : > { %v1477_v13 = vsel %vm1474_vm6, %v1469_v42, %v1471_v3 }
 0x26a   : > { %1493 = vmatpush1.bf16.msra.mxu1 %v1477_v13 }
 0x26d   : > { %5017 = vmatmul.mubr.msk.bf16.vlgmr.msra.gmra.mrb[0].mxu1 %vm1483_vm7, %v5211_v44 }
 0x26e   : > { %1532 = vmatprep.mubr.bf16.mxu1 %v8376_v12 }
 0x273   : > { %v6114_v6 = vpop.permute.xlu1 %1428 }
 0x275   : > { %5018 = vmatmul.mubr.msk.bf16.gmra.mrb[4].mxu1 %vm1483_vm7, %v5212_v2 }
 0x276   : > { %2576 = vmatprep.mubr.bf16.mxu1 %v8376_v12 }
 0x277   : > { %v6118_v4 = vpop.permute.xlu1 %1438 }
 0x279   : > { %v6120_v57 = vpop.permute.xlu0 %1433 }
 0x27c   : > { %v6122_v22 = vpop.permute.xlu1 %1868 }
 0x27d   : > { %v6124_v38 = vpop.permute.xlu0 %1443 }
 0x281   : > { %v6126_v27 = vpop.permute.xlu1 %2080 }
 0x282   : > { %v2097_v20 = vmul.f32 0.0, %v6126_v27  ;;  %v6129_v19 = vpop.permute.xlu0 %1872 }
 0x284   : > { %2123 = vrot.lane.b32.xlu0 %v2097_v20, %s5254_s22 }
 0x285   : > { %v6132_v56 = vpop.permute.xlu1 %2084 }
 0x286   : > { %v2100_v9 = vmul.f32 0.0, %v6132_v56 }
 0x287   : > { %v6135_v26 = vpop.permute.xlu0 %2180 }
 0x288   : > { %2129 = vrot.lane.b32.xlu1 %v2100_v9, %s5254_s22  ;;  %v2196_v30 = vmul.f32 0.0, %v6135_v26 }
 0x28a   : > { %v6138_v32 = vpop.permute.xlu1 %1948 }
 0x28b   : > { %v1964_v29 = vmul.f32 0.0, %v6138_v32 }
 0x28c   : > { %v6141_v24 = vpop.permute.xlu0 %2088 }
 0x28d   : > { %1993 = vrot.lane.b32.xlu1 %v1964_v29, %s5255_s23  ;;  %v2103_v58 = vmul.f32 0.0, %v6141_v24 }
 0x28f   : > { %v6145_v62 = vpop.permute.xlu1 %2176 }
 0x290   : > { %v2193_v60 = vmul.f32 0.0, %v6145_v62 }
 0x291   : > { %v6147_v33 = vpop.permute.xlu0 %1944  ;;  %2225 = vrot.lane.b32.xlu1 %v2196_v30, %s5255_s23 }
 0x292   : > { %v1961_v54 = vmul.f32 0.0, %v6147_v33 }
 0x294   : > { %v6152_v1 = vpop.permute.xlu1 %1876  ;;  %1987 = vrot.lane.b32.xlu0 %v1961_v54, %s5255_s23 }
 0x295   : > { %v6162_v35 = vpop.permute.xlu0 %1956 }
 0x296   : > { %v1970_v18 = vmul.f32 0.0, %v6162_v35 }
 0x298   : > { %v6156_v21 = vpop.permute.xlu1 %1880  ;;  %2219 = vrot.lane.b32.xlu0 %v2193_v60, %s5255_s23 }
 0x29a   : > { %v6181_v10 = vpop.permute.xlu0 %1736 }
 0x29b   : > { %v1752_v31 = vmul.f32 0.0, %v6181_v10 }
 0x29c   : > { %2135 = vrot.lane.b32.xlu0 %v2103_v58, %s5254_s22 }
 0x29d   : > { %v6160_v50 = vpop.permute.xlu1 %2092 }
 0x29e   : > { %v2106_v25 = vmul.f32 0.0, %v6160_v50 }
 0x29f   : > { %v1625_v28 = vpop.permute.xlu0 %1624 }
 0x2a0   : > { %2141 = vrot.lane.b32.xlu1 %v2106_v25, %s5254_s22  ;;  %v1639_v16 = vmul.f32 0.0, %v1625_v28 }
 0x2a2   : > { %v6167_v55 = vpop.permute.xlu1 %1952 }
 0x2a3   : > { %v1967_v11 = vmul.f32 0.0, %v6167_v55 }
 0x2a4   : > { %2005 = vrot.lane.b32.xlu1 %v1970_v18, %s5255_s23 }
 0x2a5   : > { %1999 = vrot.lane.b32.xlu0 %v1967_v11, %s5255_s23 }
 0x2a7   : > { %v6172_v52 = vpop.permute.xlu1 %2184 }
 0x2a8   : > { %v2199_v39 = vmul.f32 0.0, %v6172_v52 }
 0x2aa   : > { %2231 = vrot.lane.b32.xlu0 %v2199_v39, %s5255_s23 }
 0x2ab   : > { %v6176_v36 = vpop.permute.xlu1 %2188 }
 0x2ac   : > { %v2202_v53 = vmul.f32 0.0, %v6176_v36 }
 0x2ae   : > { %2237 = vrot.lane.b32.xlu1 %v2202_v53, %s5255_s23  ;;  %1581 = vperm.xlu0 %5149, %v6050_v59   ;;  %v8421_v59 = vmov 1  }
 0x2b0   : > { %v6183_v63 = vpop.permute.xlu1 %1628 }
 0x2b1   : > { %v1642_v43 = vmul.f32 0.0, %v6183_v63 }
 0x2b2   : > { %1586 = vperm.xlu1 %5150, %v6060_v48   ;;  %1596 = vperm.xlu0 %5149, %v6078_v51   ;;  %v2432_v48 = vld [vmem:[%s8358_s2 + $0x8] sm:$0xff]  ;;  %v2431_v51 = vld [vmem:[%s8358_s2] sm:$0xff] }
 0x2b5   : > { %v1733_v14 = vpop.permute.xlu1 %1732 }
 0x2b6   : > { %1591 = vperm.xlu1 %5150, %v6068_v23   ;;  %1669 = vrot.lane.b32.xlu0 %v1642_v43, %s5254_s22  ;;  %v1749_v61 = vmul.f32 0.0, %v1733_v14 }
 0x2b7   : > { %5152 = vset.pattern.permute.xlu0 %v8421_v59 }
 0x2ba   : > { %v6192_v34 = vpop.permute.xlu1 %1828  ;;  %1781 = vrot.lane.b32.xlu0 %v1752_v31, %s5255_s23  ;;  %1663 = vrot.lane.b32.xlu1 %v1639_v16, %s5254_s22 }
 0x2bb   : > { %5151 = vset.pattern.permute.xlu1 %v8421_v59 }
 0x2be   : > { %v6200_v23 = vpop.permute.xlu1 %1832  ;;  %1775 = vrot.lane.b32.xlu1 %v1749_v61, %s5255_s23  ;;  %2442 = vperm.xlu0 %5152, %v2432_v48  }
 0x2c2   : > { %2437 = vperm.xlu1 %5151, %v2431_v51  }
 0x2c3   : > { %v6206_v45 = vpop.permute.xlu1 %2044 }
 0x2c8   : > { %v6208_v47 = vpop.permute.xlu1 %1632 }
 0x2c9   : > { %v1645_v0 = vmul.f32 0.0, %v6208_v47 }
 0x2cb   : > { %1675 = vrot.lane.b32.xlu1 %v1645_v0, %s5254_s22 }
 0x340   : > { %v1524_v37 = vpop.f32.mrb[0].mxu1 }
 0x341   : > { %v1525_v7 = vadd.f32 %v1524_v37, %v6114_v6  ;;  %v1526_v3 = vpop.f32.mrb[1].mxu1 }
 0x342   : > { %v1528_v41 = vpop.f32.mrb[2].mxu1  ;;  %v1527_v9 = vadd.f32 %v1526_v3, %v6114_v6 }
 0x343   : > { %v6213_v42 = vmax.f32 %v1525_v7, 0.0  ;;  %v1530_v13 = vpop.f32.mrb[3].mxu1  ;;  %v1529_v6 = vadd.f32 %v1528_v41, %v6120_v57 }
 0x344   : > { %v6227_v25 = vmax.f32 %v1527_v9, 0.0  ;;  %v1531_v43 = vadd.f32 %v1530_v13, %v6120_v57  ;;  %v6290_v9 = vpop.permute.xlu0 %1636 }
 0x345   : > { %8422 = vst [vmem:[#allocation7_spill] sm:$0xff] %v6213_v42  ;;  %v2095_v44 = vmul.f32 %v6126_v27, %v6213_v42  ;;  %v1883_v2 = vmul.f32 %v6122_v22, %v6213_v42  ;;  %v1959_v30 = vmul.f32 %v6147_v33, %v6213_v42  ;;  %v1640_v54 = vmul.f32 %v1625_v28, %v6213_v42 }
 0x346   : > { %8423 = vst [vmem:[#allocation8_spill] sm:$0xff] %v6227_v25  ;;  %v2191_v18 = vmul.f32 %v6145_v62, %v6213_v42  ;;  %v1747_v11 = vmul.f32 %v1733_v14, %v6213_v42  ;;  %v1641_v39 = vmul.f32 %v1625_v28, %v6227_v25  ;;  %v1884_v53 = vmul.f32 %v6122_v22, %v6227_v25 }
 0x347   : > { %2119 = vrot.lane.b32.xlu0 %v2095_v44, %s5254_s22  ;;  %1899 = vrot.lane.b32.xlu1 %v1883_v2, %s5254_s22  ;;  %v6243_v59 = vmax.f32 %v1529_v6, 0.0  ;;  %v1748_v28 = vmul.f32 %v1733_v14, %v6227_v25  ;;  %v2096_v22 = vmul.f32 %v6126_v27, %v6227_v25  ;;  %v6250_v57 = vmax.f32 %v1531_v43, 0.0  ;;  %v6280_v44 = vpop.permute.xlu1 %1740 }
 0x348   : > { %v1534_v20 = vpop.f32.mrb[4].mxu1  ;;  %v1960_v27 = vmul.f32 %v6147_v33, %v6227_v25  ;;  %v2192_v33 = vmul.f32 %v6145_v62, %v6227_v25 }
 0x349   : > { %v1536_v29 = vpop.f32.mrb[5].mxu1  ;;  %8424 = vst [vmem:[#allocation9_spill] sm:$0xff] %v6243_v59  ;;  %v1535_v61 = vadd.f32 %v1534_v20, %v6118_v4  ;;  %8425 = vst [vmem:[#allocation10_spill] sm:$0xff] %v6250_v57  ;;  %v1750_v13 = vmul.f32 %v6181_v10, %v6243_v59  ;;  %v2099_v2 = vmul.f32 %v6132_v56, %v6250_v57 }
 0x34a   : > { %v1538_v60 = vpop.f32.mrb[6].mxu1  ;;  %v1537_v48 = vadd.f32 %v1536_v29, %v6118_v4  ;;  %v1885_v4 = vmul.f32 %v6129_v19, %v6243_v59  ;;  %v2098_v20 = vmul.f32 %v6132_v56, %v6243_v59  ;;  %v1963_v62 = vmul.f32 %v6138_v32, %v6250_v57 }
 0x34b   : > { %v1540_v58 = vpop.f32.mrb[7].mxu1  ;;  %1983 = vrot.lane.b32.xlu0 %v1959_v30, %s5255_s23  ;;  %1665 = vrot.lane.b32.xlu1 %v1640_v54, %s5254_s22  ;;  %v1539_v31 = vadd.f32 %v1538_v60, %v6124_v38  ;;  %v6258_v0 = vmax.f32 %v1535_v61, 0.0  ;;  %v6292_v29 = vpop.permute.xlu1 %1744  ;;  %v1962_v30 = vmul.f32 %v6138_v32, %v6243_v59  ;;  %v2195_v56 = vmul.f32 %v6135_v26, %v6250_v57 }
 0x34c   : > { %v1541_v16 = vadd.f32 %v1540_v58, %v6124_v38  ;;  %v6260_v37 = vmax.f32 %v1537_v48, 0.0  ;;  %v2194_v54 = vmul.f32 %v6135_v26, %v6243_v59  ;;  %v6304_v60 = vpop.permute.xlu0 %1836  ;;  %v1644_v32 = vmul.f32 %v6183_v63, %v6250_v57 }
 0x34d   : > { %v6252_v51 = vmax.f32 %v1539_v31, 0.0  ;;  %8428 = vst [vmem:[#allocation13_spill] sm:$0xff] %v6258_v0  ;;  %v1887_v6 = vmul.f32 %v6152_v1, %v6258_v0  ;;  %v2197_v48 = vmul.f32 %v6172_v52, %v6258_v0 }
 0x34e   : > { %v6254_v38 = vmax.f32 %v1541_v16, 0.0  ;;  %8429 = vst [vmem:[#allocation14_spill] sm:$0xff] %v6260_v37  ;;  %v1646_v16 = vmul.f32 %v6208_v47, %v6258_v0 }
 0x34f   : > { %2215 = vrot.lane.b32.xlu0 %v2191_v18, %s5255_s23  ;;  %1771 = vrot.lane.b32.xlu1 %v1747_v11, %s5255_s23  ;;  %8426 = vst [vmem:[#allocation11_spill] sm:$0xff] %v6252_v51  ;;  %v6306_v58 = vpop.permute.xlu1 %1840  ;;  %v1643_v18 = vmul.f32 %v6183_v63, %v6243_v59  ;;  %v2101_v63 = vmul.f32 %v6141_v24, %v6258_v0 }
 0x350   : > { %8427 = vst [vmem:[#allocation12_spill] sm:$0xff] %v6254_v38  ;;  %v6316_v11 = vpop.permute.xlu0 %2040 }
 0x351   : > { %v2055_v3 = vmul.f32 0.0, %v6316_v11 }
 0x353   : > { %1667 = vrot.lane.b32.xlu0 %v1641_v39, %s5254_s22  ;;  %1901 = vrot.lane.b32.xlu1 %v1884_v53, %s5254_s22  ;;  %v6318_v26 = vpop.permute.xlu1 %2048  ;;  %v1886_v39 = vmul.f32 %v6129_v19, %v6250_v57  ;;  %v1751_v53 = vmul.f32 %v6181_v10, %v6250_v57  ;;  %v1965_v19 = vmul.f32 %v6167_v55, %v6258_v0 }
 0x354   : > { %v6330_v43 = vpop.permute.xlu0 %2052 }
 0x357   : > { %1773 = vrot.lane.b32.xlu0 %v1748_v28, %s5255_s23  ;;  %2121 = vrot.lane.b32.xlu1 %v2096_v22, %s5254_s22  ;;  %v6332_v31 = vpop.permute.xlu1 %2129  ;;  %v1888_v28 = vmul.f32 %v6152_v1, %v6260_v37  ;;  %v1647_v22 = vmul.f32 %v6208_v47, %v6260_v37  ;;  %v1889_v1 = vmul.f32 %v6156_v21, %v6252_v51 }
 0x358   : > { %v6342_v61 = vpop.permute.xlu0 %2123 }
 0x35b   : > { %1903 = vrot.lane.b32.xlu0 %v1885_v4, %s5254_s22  ;;  %1985 = vrot.lane.b32.xlu1 %v1960_v27, %s5255_s23  ;;  %v6344_v10 = vpop.permute.xlu1 %1993  ;;  %v2102_v4 = vmul.f32 %v6141_v24, %v6260_v37 }
 0x35c   : > { %v6356_v27 = vpop.permute.xlu0 %1987 }
 0x35f   : > { %1777 = vrot.lane.b32.xlu0 %v1750_v13, %s5255_s23  ;;  %2217 = vrot.lane.b32.xlu1 %v2192_v33, %s5255_s23  ;;  %v6358_v13 = vpop.permute.xlu1 %2225  ;;  %v1966_v33 = vmul.f32 %v6167_v55, %v6260_v37  ;;  %v2104_v55 = vmul.f32 %v6160_v50, %v6252_v51 }
 0x360   : > { %v6368_v47 = vpop.permute.xlu0 %2219 }
 0x363   : > { %2127 = vrot.lane.b32.xlu0 %v2099_v2, %s5254_s22  ;;  %2125 = vrot.lane.b32.xlu1 %v2098_v20, %s5254_s22  ;;  %v6370_v24 = vpop.permute.xlu1 %2141  ;;  %v2198_v2 = vmul.f32 %v6172_v52, %v6260_v37  ;;  %v1753_v20 = vmul.f32 %v6280_v44, %v6258_v0  ;;  %v1968_v52 = vmul.f32 %v6162_v35, %v6252_v51 }
 0x367   : > { %1991 = vrot.lane.b32.xlu0 %v1963_v62, %s5255_s23  ;;  %1989 = vrot.lane.b32.xlu1 %v1962_v30, %s5255_s23  ;;  %v2105_v62 = vmul.f32 %v6160_v50, %v6254_v38  ;;  %v6382_v30 = vpop.permute.xlu0 %2135 }
 0x36b   : > { %2223 = vrot.lane.b32.xlu0 %v2195_v56, %s5255_s23  ;;  %2221 = vrot.lane.b32.xlu1 %v2194_v54, %s5255_s23  ;;  %v6384_v56 = vpop.permute.xlu1 %2005  ;;  %v1969_v54 = vmul.f32 %v6162_v35, %v6254_v38  ;;  %v1755_v35 = vmul.f32 0.0, %v6280_v44 }
 0x36f   : > { %1673 = vrot.lane.b32.xlu0 %v1644_v32, %s5254_s22  ;;  %1671 = vrot.lane.b32.xlu1 %v1643_v18, %s5254_s22  ;;  %v6394_v32 = vpop.permute.xlu0 %1999  ;;  %v6396_v50 = vpop.permute.xlu1 %2237  ;;  %v2200_v18 = vmul.f32 %v6176_v36, %v6252_v51 }
 0x373   : > { %1907 = vrot.lane.b32.xlu0 %v1887_v6, %s5254_s22  ;;  %1905 = vrot.lane.b32.xlu1 %v1886_v39, %s5254_s22  ;;  %v2201_v6 = vmul.f32 %v6176_v36, %v6254_v38  ;;  %v1649_v39 = vmul.f32 %v6290_v9, %v6252_v51  ;;  %v2433_v36 = vld [vmem:[%s8358_s2 + $0x10] sm:$0xff] }
 0x377   : > { %2131 = vrot.lane.b32.xlu0 %v2101_v63, %s5254_s22  ;;  %1779 = vrot.lane.b32.xlu1 %v1751_v53, %s5255_s23  ;;  %v6407_v63 = vpop.permute.xlu0 %2231  ;;  %v6409_v53 = vpop.permute.xlu1 %1586 }
 0x37b   : > { %1995 = vrot.lane.b32.xlu0 %v1965_v19, %s5255_s23  ;;  %1677 = vrot.lane.b32.xlu1 %v1646_v16, %s5254_s22  ;;  %v1890_v19 = vmul.f32 %v6156_v21, %v6254_v38  ;;  %v6418_v16 = vpop.permute.xlu1 %1591  ;;  %v1754_v21 = vmul.f32 %v6280_v44, %v6260_v37 }
 0x37c   : > { %8430 = vst [vmem:[#allocation15_spill] sm:$0xff] %v6418_v16 }
 0x37f   : > { %2227 = vrot.lane.b32.xlu0 %v2197_v48, %s5255_s23  ;;  %1909 = vrot.lane.b32.xlu1 %v1888_v28, %s5254_s22  ;;  %v1648_v48 = vmul.f32 0.0, %v6290_v9  ;;  %v6422_v28 = vpop.permute.xlu0 %1581 }
 0x383   : > { %1679 = vrot.lane.b32.xlu0 %v1647_v22, %s5254_s22  ;;  %2133 = vrot.lane.b32.xlu1 %v2102_v4, %s5254_s22  ;;  %v1650_v22 = vmul.f32 %v6290_v9, %v6254_v38  ;;  %v6426_v4 = vpop.permute.xlu1 %1663 }
 0x387   : > { %1911 = vrot.lane.b32.xlu0 %v1889_v1, %s5254_s22  ;;  %1997 = vrot.lane.b32.xlu1 %v1966_v33, %s5255_s23  ;;  %v6430_v1 = vpop.permute.xlu0 %1596  ;;  %v1757_v33 = vmul.f32 %v6292_v29, %v6254_v38  ;;  %v6440_v9 = vpop.permute.xlu1 %1775 }
 0x388   : > { %8431 = vst [vmem:[#allocation16_spill] sm:$0xff] %v6430_v1 }
 0x38b   : > { %2229 = vrot.lane.b32.xlu1 %v2198_v2, %s5255_s23  ;;  %1783 = vrot.lane.b32.xlu0 %v1753_v20, %s5255_s23  ;;  %v6438_v2 = vpop.permute.xlu0 %1669  ;;  %v1756_v20 = vmul.f32 %v6292_v29, %v6252_v51 }
 0x38f   : > { %2137 = vrot.lane.b32.xlu1 %v2104_v55, %s5254_s22  ;;  %2139 = vrot.lane.b32.xlu0 %v2105_v62, %s5254_s22  ;;  %v1758_v55 = vmul.f32 0.0, %v6292_v29  ;;  %v6446_v62 = vpop.permute.xlu1 %2437  ;;  %v6448_v44 = vpop.permute.xlu0 %1781 }
 0x390   : > { %8432 = vst [vmem:[#allocation17_spill] sm:$0xff] %v6446_v62  ;;  %8433 = vst [vmem:[#allocation18_spill] sm:$0xff] %v6448_v44 }
 0x393   : > { %2001 = vrot.lane.b32.xlu1 %v1968_v52, %s5255_s23  ;;  %2003 = vrot.lane.b32.xlu0 %v1969_v54, %s5255_s23  ;;  %v2434_v52 = vld [vmem:[%s8358_s2 + $0x18] sm:$0xff]  ;;  %v6454_v54 = vpop.permute.xlu0 %2442 }
 0x394   : > { %8434 = vst [vmem:[#allocation19_spill] sm:$0xff] %v6454_v54 }
 0x397   : > { %2233 = vrot.lane.b32.xlu1 %v2200_v18, %s5255_s23  ;;  %2235 = vrot.lane.b32.xlu0 %v2201_v6, %s5255_s23  ;;  %v6456_v18 = vpop.permute.xlu1 %1675 }
 0x398   : > { %8435 = vst [vmem:[#allocation20_spill] sm:$0xff] %v6456_v18 }
 0x39b   : > { %1683 = vrot.lane.b32.xlu1 %v1649_v39, %s5254_s22  ;;  %1787 = vrot.lane.b32.xlu0 %v1755_v35, %s5255_s23  ;;  %v1843_v39 = vmul.f32 0.0, %v6192_v34 }
 0x39f   : > { %1913 = vrot.lane.b32.xlu1 %v1890_v19, %s5254_s22  ;;  %2447 = vperm.xlu0 %5152, %v2433_v36  }
 0x3a3   : > { %1681 = vrot.lane.b32.xlu1 %v1648_v48, %s5254_s22  ;;  %1685 = vrot.lane.b32.xlu0 %v1650_v22, %s5254_s22 }
 0x3a7   : > { %1785 = vrot.lane.b32.xlu1 %v1754_v21, %s5255_s23  ;;  %1791 = vrot.lane.b32.xlu0 %v1757_v33, %s5255_s23 }
 0x3ab   : > { %1789 = vrot.lane.b32.xlu1 %v1756_v20, %s5255_s23 }
 0x3af   : > { %1793 = vrot.lane.b32.xlu1 %v1758_v55, %s5255_s23 }
 0x3b3   : > { %2452 = vperm.xlu1 %5151, %v2434_v52  }
 0x3b9   : > { %v2120_v6 = vpop.permute.xlu0 %2119  ;;  %v1900_v35 = vpop.permute.xlu1 %1899 }
 0x3ba   : > { %v1931_v29 = vadd.f32 %v1900_v35, %v1843_v39  ;;  %v1844_v39 = vmul.f32 %v6192_v34, %v6213_v42 }
 0x3bd   : > { %v1984_v36 = vpop.permute.xlu0 %1983  ;;  %v6459_v19 = vpop.permute.xlu1 %1665 }
 0x3be   : > { %v2027_v48 = vadd.f32 %v1984_v36, %v1931_v29  ;;  %v1845_v29 = vmul.f32 %v6192_v34, %v6227_v25 }
 0x3c0   : > { %2295 = vrot.lane.b32.xlu0 %v2027_v48, %s5258_s20  ;;  %v2163_v48 = vadd.f32 %v2120_v6, %v2055_v3 }
 0x3c1   : > { %v2216_v22 = vpop.permute.xlu0 %2215  ;;  %v6462_v21 = vpop.permute.xlu1 %1771 }
 0x3c2   : > { %8436 = vst [vmem:[#allocation21_spill] sm:$0xff] %v6462_v21  ;;  %v2259_v16 = vadd.f32 %v2216_v22, %v2163_v48 }
 0x3c4   : > { %v2351_v3 = vmul.f32 %v2259_v16, %v5732_v8 }
 0x3c5   : > { %v6464_v33 = vpop.permute.xlu0 %1667  ;;  %v1902_v20 = vpop.permute.xlu1 %1901 }
 0x3c6   : > { %v1915_v41 = vsel %vm592_vm1, %v1900_v35, %v1902_v20  ;;  %v1933_v14 = vadd.f32 %v1902_v20, %v1845_v29  ;;  %v2057_v29 = vmul.f32 %v6316_v11, %v6227_v25 }
 0x3c7   : > { %v1932_v7 = vadd.f32 %v1915_v41, %v1844_v39 }
 0x3c9   : > { %v6466_v55 = vpop.permute.xlu0 %1773  ;;  %v2122_v52 = vpop.permute.xlu1 %2121 }
 0x3ca   : > { %8437 = vst [vmem:[#allocation22_spill] sm:$0xff] %v6466_v55  ;;  %v2144_v16 = vsel %vm592_vm1, %v2122_v52, %v6342_v61  ;;  %v2143_v48 = vsel %vm592_vm1, %v2120_v6, %v2122_v52 }
 0x3cb   : > { %v2165_v61 = vadd.f32 %v2144_v16, %v2057_v29 }
 0x3cd   : > { %v1904_v12 = vpop.permute.xlu0 %1903  ;;  %v1986_v5 = vpop.permute.xlu1 %1985 }
 0x3ce   : > { %v2007_v18 = vsel %vm701_vm0, %v1984_v36, %v1986_v5  ;;  %v2008_v1 = vsel %vm701_vm0, %v1986_v5, %v6356_v27  ;;  %v1846_v36 = vmul.f32 0.0, %v6200_v23 }
 0x3cf   : > { %v2028_v35 = vadd.f32 %v2007_v18, %v1932_v7  ;;  %v2029_v54 = vadd.f32 %v2008_v1, %v1933_v14 }
 0x3d0   : > { %v1934_v39 = vadd.f32 %v1904_v12, %v1846_v36 }
 0x3d1   : > { %v6477_v62 = vpop.permute.xlu0 %1777  ;;  %2299 = vrot.lane.b32.xlu1 %v2029_v54, %s5258_s20  ;;  %2297 = vrot.lane.b32.xlu0 %v2028_v35, %s5258_s20  ;;  %v2218_v34 = vpop.permute.xlu1 %2217  ;;  %v1848_v35 = vmul.f32 %v6200_v23, %v6250_v57 }
 0x3d2   : > { %8438 = vst [vmem:[#allocation23_spill] sm:$0xff] %v6477_v62  ;;  %v2240_v36 = vsel %vm701_vm0, %v2218_v34, %v6368_v47  ;;  %v2239_v17 = vsel %vm701_vm0, %v2216_v22, %v2218_v34  ;;  %v2058_v62 = vmul.f32 0.0, %v6206_v45  ;;  %v2059_v22 = vmul.f32 %v6206_v45, %v6243_v59 }
 0x3d5   : > { %v2128_v41 = vpop.permute.xlu0 %2127  ;;  %2375 = vrot.lane.b32.xlu0 %v2351_v3, %s5259_s21  ;;  %v2126_v20 = vpop.permute.xlu1 %2125  ;;  %v2056_v3 = vmul.f32 %v6316_v11, %v6213_v42 }
 0x3d6   : > { %v2145_v47 = vsel %vm592_vm1, %v2126_v20, %v2128_v41  ;;  %v2166_v16 = vadd.f32 %v2126_v20, %v2058_v62 }
 0x3d7   : > { %v2164_v52 = vadd.f32 %v2143_v48, %v2056_v3 }
 0x3d9   : > { %v1992_v5 = vpop.permute.xlu0 %1991  ;;  %v1990_v27 = vpop.permute.xlu1 %1989  ;;  %v2260_v55 = vadd.f32 %v2239_v17, %v2164_v52  ;;  %v1851_v52 = vmul.f32 %v6304_v60, %v6260_v37 }
 0x3da   : > { %v2030_v7 = vadd.f32 %v1990_v27, %v1934_v39  ;;  %v2010_v11 = vsel %vm701_vm0, %v1992_v5, %v6344_v10  ;;  %v2009_v21 = vsel %vm701_vm0, %v1990_v27, %v1992_v5  ;;  %v2167_v10 = vadd.f32 %v2145_v47, %v2059_v22 }
 0x3db   : > { %v2352_v5 = vmul.f32 %v2260_v55, %v5758_v46 }
 0x3dc   : > { %2301 = vrot.lane.b32.xlu1 %v2030_v7, %s5258_s20  ;;  %v1847_v7 = vmul.f32 %v6200_v23, %v6243_v59 }
 0x3dd   : > { %v2224_v14 = vpop.permute.xlu0 %2223  ;;  %v2222_v1 = vpop.permute.xlu1 %2221 }
 0x3de   : > { %v2241_v29 = vsel %vm701_vm0, %v2222_v1, %v2224_v14  ;;  %v2242_v62 = vsel %vm701_vm0, %v2224_v14, %v6358_v13 }
 0x3df   : > { %v2263_v20 = vadd.f32 %v2241_v29, %v2167_v10 }
 0x3e1   : > { %v6485_v54 = vpop.permute.xlu0 %1673  ;;  %v6487_v18 = vpop.permute.xlu1 %1671 }
 0x3e2   : > { %8439 = vst [vmem:[#allocation24_spill] sm:$0xff] %v6485_v54  ;;  %v2261_v54 = vadd.f32 %v2240_v36, %v2165_v61 }
 0x3e4   : > { %v2353_v17 = vmul.f32 %v2261_v54, %v5751_v40 }
 0x3e5   : > { %v1908_v39 = vpop.permute.xlu0 %1907  ;;  %v1906_v49 = vpop.permute.xlu1 %1905 }
 0x3e6   : > { %v1916_v15 = vsel %vm592_vm1, %v1904_v12, %v1906_v49  ;;  %v1936_v6 = vadd.f32 %v1906_v49, %v1848_v35 }
 0x3e7   : > { %v1935_v44 = vadd.f32 %v1916_v15, %v1847_v7  ;;  %v2146_v15 = vsel %vm592_vm1, %v2128_v41, %v6332_v31 }
 0x3e8   : > { %v2032_v23 = vadd.f32 %v2010_v11, %v1936_v6  ;;  %v1850_v6 = vmul.f32 %v6304_v60, %v6258_v0 }
 0x3e9   : > { %v2031_v34 = vadd.f32 %v2009_v21, %v1935_v44  ;;  %v6511_v12 = vpop.permute.xlu0 %2131  ;;  %v6513_v49 = vpop.permute.xlu1 %1779  ;;  %v2060_v44 = vmul.f32 %v6206_v45, %v6250_v57  ;;  %v2262_v21 = vadd.f32 %v2222_v1, %v2166_v16  ;;  %v2355_v45 = vmul.f32 %v2263_v20, %v5758_v46 }
 0x3ea   : > { %2305 = vrot.lane.b32.xlu1 %v2032_v23, %s5258_s20  ;;  %v1849_v1 = vmul.f32 0.0, %v6304_v60 }
 0x3eb   : > { %2303 = vrot.lane.b32.xlu0 %v2031_v34, %s5258_s20  ;;  %v2168_v35 = vadd.f32 %v2146_v15, %v2060_v44  ;;  %v2354_v41 = vmul.f32 %v2262_v21, %v5732_v8 }
 0x3ec   : > { %v1937_v13 = vadd.f32 %v1908_v39, %v1849_v1  ;;  %v2062_v1 = vmul.f32 %v6318_v26, %v6258_v0 }
 0x3ed   : > { %v1996_v27 = vpop.permute.xlu0 %1995  ;;  %v6526_v48 = vpop.permute.xlu1 %1677  ;;  %v2264_v31 = vadd.f32 %v2242_v62, %v2168_v35 }
 0x3ee   : > { %2379 = vrot.lane.b32.xlu1 %v2353_v17, %s5259_s21  ;;  %v2033_v3 = vadd.f32 %v1996_v27, %v1937_v13  ;;  %v1852_v17 = vmul.f32 0.0, %v6306_v58  ;;  %v2066_v13 = vmul.f32 %v6330_v43, %v6254_v38 }
 0x3ef   : > { %2377 = vrot.lane.b32.xlu0 %v2352_v5, %s5259_s21  ;;  %v2356_v14 = vmul.f32 %v2264_v31, %v5751_v40  ;;  %v2063_v31 = vmul.f32 %v6318_v26, %v6260_v37 }
 0x3f1   : > { %v6533_v55 = vpop.permute.xlu0 %2227  ;;  %v1910_v54 = vpop.permute.xlu1 %1909 }
 0x3f2   : > { %2381 = vrot.lane.b32.xlu1 %v2354_v41, %s5259_s21  ;;  %v1917_v61 = vsel %vm592_vm1, %v1908_v39, %v1910_v54  ;;  %v1939_v47 = vadd.f32 %v1910_v54, %v1851_v52 }
 0x3f3   : > { %2383 = vrot.lane.b32.xlu0 %v2355_v45, %s5259_s21  ;;  %v1938_v11 = vadd.f32 %v1917_v61, %v1850_v6  ;;  %v1854_v45 = vmul.f32 %v6306_v58, %v6254_v38 }
 0x3f5   : > { %v6538_v36 = vpop.permute.xlu0 %1679  ;;  %v2134_v7 = vpop.permute.xlu1 %2133 }
 0x3f6   : > { %2385 = vrot.lane.b32.xlu1 %v2356_v14, %s5259_s21  ;;  %v2148_v35 = vsel %vm592_vm1, %v2134_v7, %v6382_v30  ;;  %v2147_v41 = vsel %vm592_vm1, %v6511_v12, %v2134_v7  ;;  %v1853_v30 = vmul.f32 %v6306_v58, %v6252_v51 }
 0x3f7   : > { %2307 = vrot.lane.b32.xlu0 %v2033_v3, %s5258_s20  ;;  %v2171_v3 = vadd.f32 %v2148_v35, %v2063_v31 }
 0x3f9   : > { %v1998_v23 = vpop.permute.xlu1 %1997  ;;  %v1912_v22 = vpop.permute.xlu0 %1911 }
 0x3fa   : > { %v2011_v34 = vsel %vm701_vm0, %v1996_v27, %v1998_v23  ;;  %v2012_v16 = vsel %vm701_vm0, %v1998_v23, %v6394_v32  ;;  %v1940_v44 = vadd.f32 %v1912_v22, %v1852_v17 }
 0x3fb   : > { %v2034_v39 = vadd.f32 %v2011_v34, %v1938_v11  ;;  %v2035_v29 = vadd.f32 %v2012_v16, %v1939_v47  ;;  %v2170_v11 = vadd.f32 %v2147_v41, %v2062_v1 }
 0x3fd   : > { %2311 = vrot.lane.b32.xlu1 %v2035_v29, %s5258_s20  ;;  %2309 = vrot.lane.b32.xlu0 %v2034_v39, %s5258_s20  ;;  %v2230_v15 = vpop.permute.xlu1 %2229  ;;  %v6552_v10 = vpop.permute.xlu0 %1783 }
 0x3fe   : > { %v2244_v54 = vsel %vm701_vm0, %v2230_v15, %v6407_v63  ;;  %v2243_v7 = vsel %vm701_vm0, %v6533_v55, %v2230_v15  ;;  %v2065_v15 = vmul.f32 %v6330_v43, %v6252_v51 }
 0x3ff   : > { %v2267_v34 = vadd.f32 %v2244_v54, %v2171_v3  ;;  %v2266_v29 = vadd.f32 %v2243_v7, %v2170_v11 }
 0x401   : > { %v2138_v60 = vpop.permute.xlu1 %2137  ;;  %v2140_v5 = vpop.permute.xlu0 %2139  ;;  %v2358_v35 = vmul.f32 %v2266_v29, %v5758_v46  ;;  %v1600_v29 = vmul.f32 %v6422_v28, %v6213_v42 }
 0x402   : > { %v2150_v47 = vsel %vm592_vm1, %v2140_v5, %v6370_v24  ;;  %v2149_v58 = vsel %vm592_vm1, %v2138_v60, %v2140_v5  ;;  %v2359_v5 = vmul.f32 %v2267_v34, %v5751_v40  ;;  %v1602_v34 = vmul.f32 0.0, %v6409_v53 }
 0x405   : > { %v2002_v21 = vpop.permute.xlu1 %2001  ;;  %v2004_v32 = vpop.permute.xlu0 %2003 }
 0x406   : > { %v2036_v62 = vadd.f32 %v2002_v21, %v1940_v44  ;;  %v2014_v63 = vsel %vm701_vm0, %v2004_v32, %v6384_v56  ;;  %v2013_v16 = vsel %vm701_vm0, %v2002_v21, %v2004_v32  ;;  %v2174_v44 = vadd.f32 %v2150_v47, %v2066_v13 }
 0x407   : > { %v2173_v56 = vadd.f32 %v2149_v58, %v2065_v15  ;;  %v2064_v21 = vmul.f32 0.0, %v6330_v43  ;;  %v2061_v32 = vmul.f32 0.0, %v6318_v26  ;;  %v1601_v58 = vmul.f32 %v6422_v28, %v6227_v25 }
 0x408   : > { %2313 = vrot.lane.b32.xlu1 %v2036_v62, %s5258_s20  ;;  %v1687_v15 = vsel %vm592_vm1, %v6426_v4, %v6459_v19 }
 0x409   : > { %v2234_v20 = vpop.permute.xlu1 %2233  ;;  %v2236_v61 = vpop.permute.xlu0 %2235  ;;  %v2169_v41 = vadd.f32 %v6511_v12, %v2061_v32 }
 0x40a   : > { %v2245_v24 = vsel %vm701_vm0, %v2234_v20, %v2236_v61 }
 0x40b   : > { %v2269_v31 = vadd.f32 %v2245_v24, %v2173_v56  ;;  %v2265_v54 = vadd.f32 %v6533_v55, %v2169_v41  ;;  %v1709_v56 = vadd.f32 %v6464_v33, %v1601_v58 }
 0x40d   : > { %v6556_v27 = vpop.permute.xlu1 %1683  ;;  %v2361_v43 = vmul.f32 %v2269_v31, %v5758_v46  ;;  %v6608_v13 = vpop.permute.xlu0 %1787 }
 0x411   : > { %v1914_v14 = vpop.permute.xlu1 %1913 }
 0x412   : > { %v1918_v6 = vsel %vm592_vm1, %v1912_v22, %v1914_v14  ;;  %v1942_v52 = vadd.f32 %v1914_v14, %v1854_v45  ;;  %v2246_v22 = vsel %vm701_vm0, %v2236_v61, %v6396_v50  ;;  %v2172_v50 = vadd.f32 %v2138_v60, %v2064_v21  ;;  %v8442_v21 = vld [vmem:[#allocation24_spill] sm:$0xff] }
 0x413   : > { %v1941_v23 = vadd.f32 %v1918_v6, %v1853_v30  ;;  %v2270_v62 = vadd.f32 %v2246_v22, %v2174_v44  ;;  %v2357_v60 = vmul.f32 %v2265_v54, %v5732_v8  ;;  %v8440_v22 = vld [vmem:[#allocation22_spill] sm:$0xff]  ;;  %v1604_v44 = vmul.f32 %v6409_v53, %v6250_v57 }
 0x414   : > { %v2038_v39 = vadd.f32 %v2014_v63, %v1942_v52  ;;  %v2268_v1 = vadd.f32 %v2234_v20, %v2172_v50  ;;  %v8444_v50 = vld [vmem:[#allocation23_spill] sm:$0xff] }
 0x415   : > { %v2037_v17 = vadd.f32 %v2013_v16, %v1941_v23  ;;  %v2362_v45 = vmul.f32 %v2270_v62, %v5751_v40  ;;  %v6606_v12 = vpop.permute.xlu1 %1681  ;;  %v1599_v23 = vmul.f32 0.0, %v6422_v28  ;;  %v1688_v16 = vsel %vm592_vm1, %v6459_v19, %v6464_v33  ;;  %v8443_v62 = vld [vmem:[#allocation18_spill] sm:$0xff] }
 0x416   : > { %2317 = vrot.lane.b32.xlu1 %v2038_v39, %s5258_s20  ;;  %v2360_v26 = vmul.f32 %v2268_v1, %v5732_v8  ;;  %v1689_v39 = vsel %vm592_vm1, %v6438_v2, %v6487_v18  ;;  %v1690_v28 = vsel %vm592_vm1, %v6487_v18, %v8442_v21  ;;  %v1798_v4 = vsel %vm701_vm0, %v6513_v49, %v8443_v62 }
 0x417   : > { %2315 = vrot.lane.b32.xlu0 %v2037_v17, %s5258_s20  ;;  %v1796_v17 = vsel %vm701_vm0, %v8440_v22, %v6440_v9  ;;  %v1603_v9 = vmul.f32 %v6409_v53, %v6243_v59  ;;  %v1708_v32 = vadd.f32 %v1688_v16, %v1600_v29  ;;  %v1710_v33 = vadd.f32 %v1689_v39, %v1602_v34  ;;  %v8446_v39 = vld [vmem:[#allocation6_spill] sm:$0xff] }
 0x418   : > { %v1817_v31 = vadd.f32 %v1796_v17, %v1709_v56  ;;  %v1797_v41 = vsel %vm701_vm0, %v8444_v50, %v6513_v49 }
 0x419   : > { %v6612_v55 = vpop.permute.xlu1 %1785  ;;  %v1711_v18 = vadd.f32 %v1690_v28, %v1603_v9  ;;  %v8447_v28 = vld [vmem:[#allocation5_spill] sm:$0xff] }
 0x41a   : > { %2391 = vrot.lane.b32.xlu1 %v2359_v5, %s5259_s21  ;;  %v8441_v5 = vld [vmem:[#allocation21_spill] sm:$0xff] }
 0x41b   : > { %2389 = vrot.lane.b32.xlu0 %v2358_v35, %s5259_s21  ;;  %v1795_v2 = vsel %vm701_vm0, %v8441_v5, %v8440_v22  ;;  %v1712_v35 = vadd.f32 %v8442_v21, %v1604_v44  ;;  %v1819_v58 = vadd.f32 %v1797_v41, %v1711_v18  ;;  %v8445_v22 = vld [vmem:[#allocation4_spill] sm:$0xff] }
 0x41c   : > { %v1816_v1 = vadd.f32 %v1795_v2, %v1708_v32  ;;  %v2273_v53 = vmul.f32 %v1817_v31, %v8445_v22 }
 0x41d   : > { %v6616_v14 = vpop.permute.xlu1 %1789  ;;  %v1820_v54 = vadd.f32 %v1798_v4, %v1712_v35  ;;  %v2275_v4 = vmul.f32 %v1819_v58, %v8446_v39 }
 0x41e   : > { %2397 = vrot.lane.b32.xlu1 %v2362_v45, %s5259_s21  ;;  %v6610_v20 = vpop.permute.xlu0 %2447  ;;  %v1707_v45 = vadd.f32 %v1687_v15, %v1599_v23  ;;  %v2272_v29 = vmul.f32 %v1816_v1, %v8446_v39 }
 0x41f   : > { %2395 = vrot.lane.b32.xlu0 %v2361_v43, %s5259_s21  ;;  %v2276_v17 = vmul.f32 %v1820_v54, %v8445_v22 }
 0x420   : > { %v1815_v34 = vadd.f32 %v8441_v5, %v1707_v45 }
 0x421   : > { %v6620_v7 = vpop.permute.xlu1 %1793 }
 0x422   : > { %2393 = vrot.lane.b32.xlu1 %v2360_v26, %s5259_s21  ;;  %v6614_v30 = vpop.permute.xlu0 %1685 }
 0x423   : > { %2387 = vrot.lane.b32.xlu0 %v2357_v60, %s5259_s21  ;;  %v1818_v60 = vadd.f32 %v8444_v50, %v1710_v33 }
 0x425   : > { %v2274_v62 = vmul.f32 %v1818_v60, %v8447_v28  ;;  %v8448_v60 = vld [vmem:[#allocation17_spill] sm:$0xff] }
 0x426   : > { %v6618_v3 = vpop.permute.xlu0 %1791 }
 0x432   : > { %v2296_v61 = vpop.permute.xlu0 %2295  ;;  %v6622_v6 = vpop.permute.xlu1 %2452 }
 0x443   : > { %v2298_v52 = vpop.permute.xlu0 %2297  ;;  %v2300_v11 = vpop.permute.xlu1 %2299 }
 0x444   : > { %v2320_v16 = vsel %vm1244_vm4, %v2298_v52, %v2300_v11  ;;  %v2341_v23 = vadd.f32 %v2300_v11, %v2273_v53  ;;  %v2319_v5 = vsel %vm1244_vm4, %v2296_v61, %v2298_v52  ;;  %v2271_v11 = vmul.f32 %v1815_v34, %v8447_v28  ;;  %v8449_v52 = vld [vmem:[#allocation19_spill] sm:$0xff] }
 0x445   : > { %v2340_v21 = vadd.f32 %v2320_v16, %v2272_v29 }
 0x446   : > { %v2339_v1 = vadd.f32 %v2319_v5, %v2271_v11 }
 0x447   : > { %v2376_v63 = vpop.permute.xlu0 %2375 }
 0x44e   : > { %v2302_v47 = vpop.permute.xlu1 %2301 }
 0x45c   : > { %v2306_v24 = vpop.permute.xlu1 %2305 }
 0x45d   : > { %v2304_v19 = vpop.permute.xlu0 %2303  ;;  %v2344_v9 = vadd.f32 %v2306_v24, %v2276_v17 }
 0x45e   : > { %v2321_v15 = vsel %vm1244_vm4, %v2302_v47, %v2304_v19  ;;  %v2322_v44 = vsel %vm1244_vm4, %v2304_v19, %v2306_v24 }
 0x45f   : > { %v2342_v33 = vadd.f32 %v2321_v15, %v2274_v62  ;;  %v2343_v47 = vadd.f32 %v2322_v44, %v2275_v4  ;;  %v1692_v44 = vsel %vm592_vm1, %v6526_v48, %v6538_v36  ;;  %v8451_v4 = vld [vmem:[#allocation16_spill] sm:$0xff] }
 0x460   : > { %v2380_v43 = vpop.permute.xlu1 %2379  ;;  %v1610_v5 = vmul.f32 %v8451_v4, %v6254_v38  ;;  %v1609_v11 = vmul.f32 %v8451_v4, %v6252_v51 }
 0x461   : > { %v2378_v26 = vpop.permute.xlu0 %2377  ;;  %v2421_v32 = vadd.f32 %v2380_v43, %v2341_v23  ;;  %v8450_v23 = vld [vmem:[#allocation15_spill] sm:$0xff] }
 0x462   : > { %v2400_v56 = vsel %vm1343_vm5, %v2378_v26, %v2380_v43  ;;  %v2399_v50 = vsel %vm1343_vm5, %v2376_v63, %v2378_v26  ;;  %v1607_v15 = vmul.f32 %v8450_v23, %v6260_v37 }
 0x463   : > { %v2420_v31 = vadd.f32 %v2400_v56, %v2340_v21  ;;  %v2457_v61 = vadd.f32 %v8448_v60, %v2421_v32  ;;  %v2419_v43 = vadd.f32 %v2399_v50, %v2339_v1  ;;  %v1800_v56 = vsel %vm701_vm0, %v6612_v55, %v6608_v13 }
 0x464   : > { %v2382_v49 = vpop.permute.xlu1 %2381  ;;  %v1606_v21 = vmul.f32 %v8450_v23, %v6258_v0  ;;  %v1715_v62 = vadd.f32 %v6538_v36, %v1607_v15  ;;  %v1799_v32 = vsel %vm701_vm0, %v6552_v10, %v6612_v55  ;;  %v1802_v13 = vsel %vm701_vm0, %v6618_v3, %v6620_v7 }
 0x465   : > { %v2384_v2 = vpop.permute.xlu0 %2383  ;;  %v2456_v58 = vadd.f32 %v8448_v60, %v2420_v31  ;;  %v2455_v63 = vadd.f32 %v8448_v60, %v2419_v43  ;;  %v8452_v31 = vld [vmem:[#allocation20_spill] sm:$0xff]  ;;  %v1801_v55 = vsel %vm701_vm0, %v6616_v14, %v6618_v3  ;;  %v1693_v7 = vsel %vm592_vm1, %v6606_v12, %v6556_v27 }
 0x466   : > { %v2401_v35 = vsel %vm1343_vm5, %v2382_v49, %v2384_v2  ;;  %v1714_v36 = vadd.f32 %v1692_v44, %v1606_v21 }
 0x467   : > { %v2422_v18 = vadd.f32 %v2401_v35, %v2342_v33  ;;  %v1694_v35 = vsel %vm592_vm1, %v6556_v27, %v6614_v30  ;;  %v1823_v33 = vadd.f32 %v1800_v56, %v1715_v62 }
 0x468   : > { %v2386_v19 = vpop.permute.xlu1 %2385 }
 0x469   : > { %v2402_v41 = vsel %vm1343_vm5, %v2384_v2, %v2386_v19  ;;  %v2424_v45 = vadd.f32 %v2386_v19, %v2344_v9  ;;  %v2458_v34 = vadd.f32 %v8449_v52, %v2422_v18  ;;  %v2308_v49 = vpop.permute.xlu0 %2307  ;;  %v1691_v19 = vsel %vm592_vm1, %v8452_v31, %v6526_v48 }
 0x46a   : > { %v2423_v54 = vadd.f32 %v2402_v41, %v2343_v47  ;;  %v1718_v47 = vadd.f32 %v6614_v30, %v1610_v5  ;;  %v1822_v41 = vadd.f32 %v1799_v32, %v1714_v36  ;;  %v1608_v30 = vmul.f32 0.0, %v8451_v4 }
 0x46b   : > { %v2460_v24 = vadd.f32 %v8449_v52, %v2424_v45  ;;  %v2472_v26 = vpack.c.bf16 %v2458_v34, %v2455_v63  ;;  %v1717_v45 = vadd.f32 %v1694_v35, %v1609_v11  ;;  %v2279_v48 = vmul.f32 %v1823_v33, %v8445_v22 }
 0x46c   : > { %v2459_v53 = vadd.f32 %v8449_v52, %v2423_v54  ;;  %v1826_v1 = vadd.f32 %v1802_v13, %v1718_v47  ;;  %v1605_v54 = vmul.f32 0.0, %v8450_v23  ;;  %v1716_v52 = vadd.f32 %v1693_v7, %v1608_v30  ;;  %v2480_v30 = vld [vmem:[%s8360_s4 + $0x10] sm:$0xff] }
 0x46d   : > { %v2474_v16 = vpack.c.bf16 %v2460_v24, %v2457_v61  ;;  %v1825_v60 = vadd.f32 %v1801_v55, %v1717_v45  ;;  %v2278_v43 = vmul.f32 %v1822_v41, %v8446_v39 }
 0x46e   : > { %v2473_v29 = vpack.c.bf16 %v2459_v53, %v2456_v58  ;;  %v1713_v61 = vadd.f32 %v1691_v19, %v1605_v54  ;;  %v2282_v27 = vmul.f32 %v1826_v1, %v8445_v22  ;;  %v2478_v1 = vld [vmem:[%s8360_s4] sm:$0xff] }
 0x46f   : > { %2522 = vrot.lane.b32.xlu1 %v2474_v16, %s5260_s30  ;;  %v2312_v17 = vpop.permute.xlu1 %2311  ;;  %v2310_v9 = vpop.permute.xlu0 %2309  ;;  %v1824_v16 = vadd.f32 %v6616_v14, %v1716_v52  ;;  %v2281_v23 = vmul.f32 %v1825_v60, %v8446_v39  ;;  %v6761_v60 = vld [vmem:[%s8357_s1 + $0x8] sm:$0xff]  ;;  %v5271_v52 = vmov 22  }
 0x470   : > { %2520 = vrot.lane.b32.xlu0 %v2473_v29, %s5260_s30  ;;  %v2324_v3 = vsel %vm1244_vm4, %v2310_v9, %v2312_v17  ;;  %v2347_v58 = vadd.f32 %v2312_v17, %v2279_v48  ;;  %v1821_v53 = vadd.f32 %v6552_v10, %v1713_v61  ;;  %v2323_v44 = vsel %vm1244_vm4, %v2308_v49, %v2310_v9  ;;  %v6767_v61 = vld [vmem:[%s8357_s1] sm:$0xff] }
 0x471   : > { %v2346_v63 = vadd.f32 %v2324_v3, %v2278_v43  ;;  %v2280_v5 = vmul.f32 %v1824_v16, %v8447_v28  ;;  %v5270_v48 = vmov 23   ;;  %v6774_v3 = vld [vmem:[%s8357_s1 + $0x18] sm:$0xff]  ;;  %v5272_v43 = vmov 25  }
 0x472   : > { %v2277_v14 = vmul.f32 %v1821_v53, %v8447_v28  ;;  %v5276_v53 = vmov 24   ;;  %v5277_v16 = vmov 20  }
 0x474   : > { %2518 = vrot.lane.b32.xlu0 %v2472_v26, %s5260_s30  ;;  %v2345_v36 = vadd.f32 %v2323_v44, %v2277_v14  ;;  %v5214_v14 = vld [vmem:[%s8359_s3 + $0x18] sm:$0xff]  }
 0x47a   : > { %v2314_v2 = vpop.permute.xlu1 %2313 }
 0x488   : > { %v2318_v50 = vpop.permute.xlu1 %2317 }
 0x489   : > { %v2316_v18 = vpop.permute.xlu0 %2315  ;;  %v2350_v26 = vadd.f32 %v2318_v50, %v2282_v27  ;;  %v5274_v27 = vmov 19  }
 0x48a   : > { %v2326_v34 = vsel %vm1244_vm4, %v2316_v18, %v2318_v50  ;;  %v2325_v17 = vsel %vm1244_vm4, %v2314_v2, %v2316_v18 }
 0x48b   : > { %v2349_v21 = vadd.f32 %v2326_v34, %v2281_v23  ;;  %v2348_v49 = vadd.f32 %v2325_v17, %v2280_v5  ;;  %v5278_v34 = vmov 18  }
 0x48c   : > { %v2392_v24 = vpop.permute.xlu1 %2391 }
 0x48d   : > { %v2390_v12 = vpop.permute.xlu0 %2389  ;;  %v2427_v15 = vadd.f32 %v2392_v24, %v2347_v58  ;;  %v5273_v58 = vmov 26  }
 0x48e   : > { %v2404_v29 = vsel %vm1343_vm5, %v2390_v12, %v2392_v24  ;;  %v6781_v24 = vld [vmem:[%s8357_s1 + $0x10] sm:$0xff] }
 0x48f   : > { %v2426_v62 = vadd.f32 %v2404_v29, %v2346_v63  ;;  %v2463_v35 = vadd.f32 %v6610_v20, %v2427_v15 }
 0x490   : > { %v2398_v56 = vpop.permute.xlu1 %2397 }
 0x491   : > { %v2430_v4 = vadd.f32 %v2398_v56, %v2350_v26  ;;  %v2396_v10 = vpop.permute.xlu0 %2395  ;;  %v2462_v2 = vadd.f32 %v6610_v20, %v2426_v62 }
 0x492   : > { %v2406_v32 = vsel %vm1343_vm5, %v2396_v10, %v2398_v56 }
 0x493   : > { %v2466_v13 = vadd.f32 %v6622_v6, %v2430_v4  ;;  %v2429_v11 = vadd.f32 %v2406_v32, %v2349_v21  ;;  %v5213_v4 = vld [vmem:[%s8359_s3 + $0x10] sm:$0xff]  }
 0x494   : > { %v2394_v9 = vpop.permute.xlu1 %2393 }
 0x495   : > { %v2465_v33 = vadd.f32 %v6622_v6, %v2429_v11  ;;  %v2405_v47 = vsel %vm1343_vm5, %v2394_v9, %v2396_v10  ;;  %v2388_v31 = vpop.permute.xlu0 %2387  ;;  %v2477_v19 = vpack.c.bf16 %v2466_v13, %v2463_v35  ;;  %v8453_v10 = vmov 0  }
 0x496   : > { %v2428_v55 = vadd.f32 %v2405_v47, %v2348_v49  ;;  %v2403_v50 = vsel %vm1343_vm5, %v2388_v31, %v2390_v12  ;;  %v5275_v12 = vmov 21  }
 0x497   : > { %v2425_v7 = vadd.f32 %v2403_v50, %v2345_v36  ;;  %2528 = vrot.lane.b32.xlu0 %v2477_v19, %s5260_s30  ;;  %v2476_v41 = vpack.c.bf16 %v2465_v33, %v2462_v2 }
 0x498   : > { %v2464_v45 = vadd.f32 %v6622_v6, %v2428_v55  ;;  %v2479_v6 = vld [vmem:[%s8360_s4 + $0x8] sm:$0xff] }
 0x499   : > { %v2461_v18 = vadd.f32 %v6610_v20, %v2425_v7  ;;  %2526 = vrot.lane.b32.xlu1 %v2476_v41, %s5260_s30  ;;  %v2481_v20 = vld [vmem:[%s8360_s4 + $0x18] sm:$0xff] }
 0x49b   : > { %v2475_v54 = vpack.c.bf16 %v2464_v45, %v2461_v18  ;;  %2484 = vperm.xlu0 %5152, %v2478_v1  }
 0x49d   : > { %2524 = vrot.lane.b32.xlu1 %v2475_v54, %s5260_s30 }
 0x49f   : > { %2494 = vperm.xlu0 %5152, %v2480_v30  }
 0x4a1   : > { %2489 = vperm.xlu1 %5151, %v2479_v6  }
 0x4a3   : > { %5155 = vset.pattern.permute.xlu0 %v5270_v48 }
 0x4a4   : > { %3138 = vperm.xlu0 %5155, %v6761_v60  }
 0x4a5   : > { %2499 = vperm.xlu1 %5151, %v2481_v20  }
 0x4a8   : > { %5156 = vset.pattern.permute.xlu0 %v5271_v52 }
 0x4a9   : > { %5153 = vset.pattern.permute.xlu1 %v5271_v52  ;;  %2922 = vperm.xlu0 %5156, %v6767_v61  }
 0x4aa   : > { %2926 = vperm.xlu1 %5153, %v6761_v60  }
 0x4ad   : > { %2934 = vperm.xlu0 %5156, %v6774_v3  }
 0x4ae   : > { %5154 = vset.pattern.permute.xlu1 %v5270_v48 }
 0x4af   : > { %3134 = vperm.xlu1 %5154, %v6767_v61  }
 0x4b1   : > { %5161 = vset.pattern.permute.xlu0 %v5272_v43 }
 0x4b2   : > { %3006 = vperm.xlu0 %5161, %v6781_v24  }
 0x4b3   : > { %5157 = vset.pattern.permute.xlu1 %v5272_v43 }
 0x4b4   : > { %2998 = vperm.xlu1 %5157, %v6767_v61  }
 0x4b6   : > { %5162 = vset.pattern.permute.xlu0 %v5273_v58 }
 0x4b7   : > { %3230 = vperm.xlu0 %5162, %v6767_v61  }
 0x4b8   : > { %3002 = vperm.xlu1 %5157, %v6761_v60  }
 0x4bb   : > { %3242 = vperm.xlu0 %5162, %v6774_v3  }
 0x4bc   : > { %5158 = vset.pattern.permute.xlu1 %v5273_v58 }
 0x4bd   : > { %3234 = vperm.xlu1 %5158, %v6761_v60  }
 0x4bf   : > { %5168 = vset.pattern.permute.xlu0 %v5274_v27 }
 0x4c0   : > { %2886 = vperm.xlu0 %5168, %v6761_v60  }
 0x4c1   : > { %5159 = vset.pattern.permute.xlu1 %v5271_v52 }
 0x4c2   : > { %2930 = vperm.xlu1 %5159, %v6781_v24  }
 0x4c4   : > { %5170 = vset.pattern.permute.xlu0 %v5275_v12 }
 0x4c5   : > { %2686 = vperm.xlu0 %5170, %v6781_v24  }
 0x4c6   : > { %5160 = vset.pattern.permute.xlu1 %v5270_v48 }
 0x4c7   : > { %3142 = vperm.xlu1 %5160, %v6781_v24  }
 0x4c9   : > { %5171 = vset.pattern.permute.xlu0 %v5276_v53 }
 0x4ca   : > { %2786 = vperm.xlu0 %5171, %v6767_v61  }
 0x4cb   : > { %3146 = vperm.xlu1 %5160, %v6774_v3  }
 0x4ce   : > { %2798 = vperm.xlu0 %5171, %v6774_v3  }
 0x4cf   : > { %5163 = vset.pattern.permute.xlu1 %v5272_v43 }
 0x4d0   : > { %3010 = vperm.xlu1 %5163, %v6774_v3  }
 0x4d2   : > { %5175 = vset.pattern.permute.xlu0 %v5277_v16 }
 0x4d3   : > { %3102 = vperm.xlu0 %5175, %v6781_v24  }
 0x4d4   : > { %5164 = vset.pattern.permute.xlu1 %v5273_v58 }
 0x4d5   : > { %3238 = vperm.xlu1 %5164, %v6781_v24  }
 0x4d7   : > { %5178 = vset.pattern.permute.xlu0 %v5278_v34 }
 0x4d9   : > { %5165 = vset.pattern.permute.xlu1 %v5275_v12 }
 0x4da   : > { %2678 = vperm.xlu1 %5165, %v6767_v61  }
 0x4de   : > { %2682 = vperm.xlu1 %5165, %v6761_v60  }
 0x4e1   : > { %v2523_v29 = vpop.permute.xlu1 %2522 }
 0x4e2   : > { %v2521_v63 = vpop.permute.xlu0 %2520  ;;  %5166 = vset.pattern.permute.xlu1 %v5276_v53 }
 0x4e3   : > { %v2531_v26 = vsel %vm1474_vm6, %v2521_v63, %v2523_v29  ;;  %2790 = vperm.xlu1 %5166, %v6761_v60  }
 0x4e4   : > { %2544 = vmatprep.subr.bf16.mxu1 %v2531_v26 }
 0x4e6   : > { %v2519_v23 = vpop.permute.xlu0 %2518 }
 0x4e7   : > { %v2530_v15 = vsel %vm1474_vm6, %v2519_v23, %v2521_v63  ;;  %5167 = vset.pattern.permute.xlu1 %v5274_v27 }
 0x4e8   : > { %2545 = vmatpush1.bf16.msra.mxu1 %v2530_v15  ;;  %2882 = vperm.xlu1 %5167, %v6767_v61  }
 0x4ec   : > { %5169 = vset.pattern.permute.xlu1 %v5277_v16 }
 0x4ed   : > { %3094 = vperm.xlu1 %5169, %v6767_v61  }
 0x4f1   : > { %3098 = vperm.xlu1 %5169, %v6761_v60  }
 0x4f5   : > { %5172 = vset.pattern.permute.xlu1 %v5275_v12 }
 0x4f6   : > { %2690 = vperm.xlu1 %5172, %v6774_v3  }
 0x4fa   : > { %5173 = vset.pattern.permute.xlu1 %v5276_v53 }
 0x4fb   : > { %2794 = vperm.xlu1 %5173, %v6781_v24  }
 0x4ff   : > { %5174 = vset.pattern.permute.xlu1 %v5274_v27 }
 0x500   : > { %2890 = vperm.xlu1 %5174, %v6781_v24  }
 0x504   : > { %2894 = vperm.xlu1 %5174, %v6774_v3  }
 0x508   : > { %5176 = vset.pattern.permute.xlu1 %v5277_v16 }
 0x509   : > { %3106 = vperm.xlu1 %5176, %v6774_v3   ;;  %v2529_v44 = vpop.permute.xlu0 %2528 }
 0x50b   : > { %v2527_v56 = vpop.permute.xlu1 %2526 }
 0x50c   : > { %v2533_v17 = vsel %vm1474_vm6, %v2527_v56, %v2529_v44  ;;  %v8454_v44 = vmov 2  }
 0x50d   : > { %2546 = vmatprep.subr.bf16.mxu1 %v2533_v17  ;;  %5177 = vset.pattern.permute.xlu1 %v5278_v34 }
 0x50f   : > { %v2525_v21 = vpop.permute.xlu1 %2524 }
 0x510   : > { %v2532_v62 = vsel %vm1474_vm6, %v2525_v21, %v2527_v56 }
 0x511   : > { %2547 = vmatpush1.bf16.msra.mxu1 %v2532_v62 }
 0x514   : > { %5025 = vmatmul.mubr.msk.bf16.vlgmr.msra.gmra.mrb[8].mxu1 %vm1483_vm7, %v5213_v4 }
 0x515   : > { %2586 = vmatprep.mubr.bf16.mxu1 %v8453_v10 }
 0x51a   : > { %v6822_v5 = vpop.permute.xlu0 %2484 }
 0x51c   : > { %5026 = vmatmul.mubr.msk.bf16.gmra.mrb[12].mxu1 %vm1483_vm7, %v5214_v14 }
 0x51d   : > { %4684 = vmatprep.mubr.bf16.mxu1 %v8453_v10 }
 0x51e   : > { %v6826_v32 = vpop.permute.xlu0 %2494 }
 0x520   : > { %v6828_v35 = vpop.permute.xlu1 %2489 }
 0x523   : > { %v6830_v13 = vpop.permute.xlu0 %3138 }
 0x524   : > { %v3154_v11 = vmul.f32 0.0, %v6830_v13  ;;  %v6833_v36 = vpop.permute.xlu1 %2499 }
 0x526   : > { %3183 = vrot.lane.b32.xlu0 %v3154_v11, %s5254_s22 }
 0x528   : > { %v6836_v49 = vpop.permute.xlu0 %2922 }
 0x529   : > { %v6838_v9 = vpop.permute.xlu1 %2926 }
 0x52c   : > { %v6840_v2 = vpop.permute.xlu0 %2934 }
 0x52e   : > { %v6842_v33 = vpop.permute.xlu1 %3134 }
 0x52f   : > { %v3151_v47 = vmul.f32 0.0, %v6842_v33 }
 0x531   : > { %3177 = vrot.lane.b32.xlu1 %v3151_v47, %s5254_s22  ;;  %v6846_v31 = vpop.permute.xlu0 %3006 }
 0x532   : > { %v3021_v20 = vmul.f32 0.0, %v6846_v31 }
 0x533   : > { %v6848_v19 = vpop.permute.xlu1 %2998 }
 0x534   : > { %v3015_v55 = vmul.f32 0.0, %v6848_v19 }
 0x536   : > { %3041 = vrot.lane.b32.xlu1 %v3015_v55, %s5255_s23  ;;  %v6852_v50 = vpop.permute.xlu0 %3230 }
 0x537   : > { %v6854_v7 = vpop.permute.xlu1 %3002  ;;  %v3247_v41 = vmul.f32 0.0, %v6852_v50 }
 0x538   : > { %v3018_v45 = vmul.f32 0.0, %v6854_v7 }
 0x53a   : > { %3047 = vrot.lane.b32.xlu0 %v3018_v45, %s5255_s23  ;;  %3273 = vrot.lane.b32.xlu1 %v3247_v41, %s5255_s23  ;;  %v6876_v43 = vpop.permute.xlu0 %3242 }
 0x53b   : > { %v3256_v53 = vmul.f32 0.0, %v6876_v43 }
 0x53c   : > { %v6860_v1 = vpop.permute.xlu1 %3234 }
 0x53d   : > { %v3250_v18 = vmul.f32 0.0, %v6860_v1 }
 0x53f   : > { %3279 = vrot.lane.b32.xlu0 %v3250_v18, %s5255_s23  ;;  %v6881_v12 = vpop.permute.xlu0 %2886 }
 0x541   : > { %v6864_v54 = vpop.permute.xlu1 %2930 }
 0x544   : > { %v6890_v29 = vpop.permute.xlu0 %2686 }
 0x546   : > { %v6866_v30 = vpop.permute.xlu1 %3142 }
 0x547   : > { %v3157_v6 = vmul.f32 0.0, %v6866_v30 }
 0x549   : > { %3189 = vrot.lane.b32.xlu1 %v3157_v6, %s5254_s22  ;;  %v6897_v23 = vpop.permute.xlu0 %2786 }
 0x54a   : > { %v6871_v48 = vpop.permute.xlu1 %3146  ;;  %v2803_v15 = vmul.f32 0.0, %v6897_v23 }
 0x54b   : > { %v3160_v52 = vmul.f32 0.0, %v6871_v48 }
 0x54d   : > { %3195 = vrot.lane.b32.xlu0 %v3160_v52, %s5254_s22  ;;  %3053 = vrot.lane.b32.xlu1 %v3021_v20, %s5255_s23 }
 0x54f   : > { %v6878_v58 = vpop.permute.xlu1 %3010 }
 0x550   : > { %v3024_v27 = vmul.f32 0.0, %v6878_v58 }
 0x552   : > { %3059 = vrot.lane.b32.xlu0 %v3024_v27, %s5255_s23 }
 0x554   : > { %v6885_v16 = vpop.permute.xlu1 %3238 }
 0x555   : > { %v3253_v34 = vmul.f32 0.0, %v6885_v16 }
 0x556   : > { %3291 = vrot.lane.b32.xlu0 %v3256_v53, %s5255_s23 }
 0x557   : > { %3285 = vrot.lane.b32.xlu1 %v3253_v34, %s5255_s23 }
 0x559   : > { %v6892_v63 = vpop.permute.xlu1 %2678 }
 0x55a   : > { %2640 = vperm.xlu0 %5178, %v6761_v60   ;;  %v2693_v26 = vmul.f32 0.0, %v6892_v63 }
 0x55b   : > { %2635 = vperm.xlu1 %5177, %v6767_v61   ;;  %v3485_v61 = vld [vmem:[%s8358_s2] sm:$0xff] }
 0x55d   : > { %v6903_v56 = vpop.permute.xlu1 %2682 }
 0x55e   : > { %2717 = vrot.lane.b32.xlu0 %v2693_v26, %s5254_s22  ;;  %v2696_v60 = vmul.f32 0.0, %v6903_v56 }
 0x55f   : > { %2645 = vperm.xlu1 %5177, %v6781_v24   ;;  %5179 = vset.pattern.permute.xlu0 %v8454_v44  ;;  %v2699_v24 = vmul.f32 0.0, %v6890_v29 }
 0x562   : > { %2829 = vrot.lane.b32.xlu0 %v2803_v15, %s5255_s23  ;;  %v6911_v17 = vpop.permute.xlu1 %2790 }
 0x563   : > { %2650 = vperm.xlu1 %5177, %v6774_v3   ;;  %v2806_v21 = vmul.f32 0.0, %v6911_v17  ;;  %v3486_v3 = vld [vmem:[%s8358_s2 + $0x8] sm:$0xff] }
 0x566   : > { %3491 = vperm.xlu0 %5179, %v3485_v61  }
 0x567   : > { %2723 = vrot.lane.b32.xlu1 %v2696_v60, %s5254_s22  ;;  %v6922_v4 = vpop.permute.xlu1 %2882 }
 0x568   : > { %5180 = vset.pattern.permute.xlu1 %v8454_v44 }
 0x56b   : > { %2835 = vrot.lane.b32.xlu1 %v2806_v21, %s5255_s23 }
 0x56c   : > { %v6932_v20 = vpop.permute.xlu1 %3094 }
 0x56d   : > { %v3109_v37 = vmul.f32 0.0, %v6932_v20 }
 0x56f   : > { %3496 = vperm.xlu1 %5180, %v3486_v3  }
 0x570   : > { %v6944_v44 = vpop.permute.xlu1 %3098 }
 0x571   : > { %v3112_v39 = vmul.f32 0.0, %v6944_v44 }
 0x573   : > { %2729 = vrot.lane.b32.xlu1 %v2699_v24, %s5254_s22 }
 0x5e7   : > { %v2578_v62 = vpop.f32.mrb[8].mxu1 }
 0x5e8   : > { %v2579_v14 = vadd.f32 %v2578_v62, %v6822_v5  ;;  %v2580_v11 = vpop.f32.mrb[9].mxu1 }
 0x5e9   : > { %v2582_v47 = vpop.f32.mrb[10].mxu1  ;;  %v2581_v45 = vadd.f32 %v2580_v11, %v6822_v5 }
 0x5ea   : > { %v6925_v55 = vmax.f32 %v2579_v14, 0.0  ;;  %v2584_v41 = vpop.f32.mrb[11].mxu1  ;;  %v2583_v24 = vadd.f32 %v2582_v47, %v6828_v35  ;;  %v6958_v14 = vpop.permute.xlu1 %2690 }
 0x5eb   : > { %v6936_v27 = vmax.f32 %v2581_v45, 0.0  ;;  %v2585_v62 = vadd.f32 %v2584_v41, %v6828_v35 }
 0x5ec   : > { %v2694_v18 = vmul.f32 %v6892_v63, %v6925_v55  ;;  %v2937_v6 = vmul.f32 %v6836_v49, %v6925_v55  ;;  %v2801_v34 = vmul.f32 %v6897_v23, %v6925_v55  ;;  %v3149_v5 = vmul.f32 %v6842_v33, %v6925_v55 }
 0x5ed   : > { %v2938_v60 = vmul.f32 %v6836_v49, %v6936_v27  ;;  %v3013_v61 = vmul.f32 %v6848_v19, %v6925_v55  ;;  %v3150_v21 = vmul.f32 %v6842_v33, %v6936_v27  ;;  %v3245_v3 = vmul.f32 %v6852_v50, %v6925_v55 }
 0x5ee   : > { %2719 = vrot.lane.b32.xlu0 %v2694_v18, %s5254_s22  ;;  %2953 = vrot.lane.b32.xlu1 %v2937_v6, %s5254_s22  ;;  %v3014_v18 = vmul.f32 %v6848_v19, %v6936_v27  ;;  %v2695_v35 = vmul.f32 %v6892_v63, %v6936_v27  ;;  %v6970_v47 = vmax.f32 %v2583_v24, 0.0  ;;  %v6972_v41 = vmax.f32 %v2585_v62, 0.0 }
 0x5ef   : > { %v2588_v52 = vpop.f32.mrb[12].mxu1  ;;  %v3246_v63 = vmul.f32 %v6852_v50, %v6936_v27  ;;  %v2898_v38 = vmul.f32 %v6922_v4, %v6925_v55  ;;  %v2899_v10 = vmul.f32 %v6922_v4, %v6936_v27 }
 0x5f0   : > { %v2590_v53 = vpop.f32.mrb[13].mxu1  ;;  %v2589_v45 = vadd.f32 %v2588_v52, %v6826_v32  ;;  %v6980_v52 = vpop.permute.xlu1 %2794  ;;  %v3152_v50 = vmul.f32 %v6830_v13, %v6970_v47  ;;  %v3248_v24 = vmul.f32 %v6860_v1, %v6970_v47  ;;  %v3153_v62 = vmul.f32 %v6830_v13, %v6972_v41 }
 0x5f1   : > { %v2592_v26 = vpop.f32.mrb[14].mxu1  ;;  %v2591_v33 = vadd.f32 %v2590_v53, %v6826_v32  ;;  %v2802_v53 = vmul.f32 %v6897_v23, %v6936_v27  ;;  %v2939_v23 = vmul.f32 %v6838_v9, %v6970_v47  ;;  %v3249_v13 = vmul.f32 %v6860_v1, %v6972_v41 }
 0x5f2   : > { %v2594_v15 = vpop.f32.mrb[15].mxu1  ;;  %2825 = vrot.lane.b32.xlu0 %v2801_v34, %s5255_s23  ;;  %3173 = vrot.lane.b32.xlu1 %v3149_v5, %s5254_s22  ;;  %v2593_v49 = vadd.f32 %v2592_v26, %v6833_v36  ;;  %v6982_v32 = vmax.f32 %v2589_v45, 0.0 }
 0x5f3   : > { %v2595_v11 = vadd.f32 %v2594_v15, %v6833_v36  ;;  %v6984_v19 = vmax.f32 %v2591_v33, 0.0  ;;  %v2940_v33 = vmul.f32 %v6838_v9, %v6972_v41 }
 0x5f4   : > { %v6974_v6 = vmax.f32 %v2593_v49, 0.0  ;;  %v2697_v49 = vmul.f32 %v6903_v56, %v6970_v47  ;;  %v2700_v9 = vmul.f32 %v6890_v29, %v6982_v32  ;;  %v2941_v1 = vmul.f32 %v6864_v54, %v6982_v32 }
 0x5f5   : > { %v6976_v36 = vmax.f32 %v2595_v11, 0.0  ;;  %v3017_v11 = vmul.f32 %v6854_v7, %v6972_v41 }
 0x5f6   : > { %2955 = vrot.lane.b32.xlu0 %v2938_v60, %s5254_s22  ;;  %3037 = vrot.lane.b32.xlu1 %v3013_v61, %s5255_s23  ;;  %v7004_v60 = vpop.permute.xlu1 %2890  ;;  %v3016_v61 = vmul.f32 %v6854_v7, %v6970_v47  ;;  %v2805_v7 = vmul.f32 %v6911_v17, %v6972_v41 }
 0x5fa   : > { %3175 = vrot.lane.b32.xlu0 %v3150_v21, %s5254_s22  ;;  %3269 = vrot.lane.b32.xlu1 %v3245_v3, %s5255_s23  ;;  %v2804_v21 = vmul.f32 %v6911_v17, %v6970_v47  ;;  %v7014_v3 = vpop.permute.xlu1 %2894  ;;  %v3155_v17 = vmul.f32 %v6866_v30, %v6982_v32 }
 0x5fe   : > { %3039 = vrot.lane.b32.xlu0 %v3014_v18, %s5255_s23  ;;  %2721 = vrot.lane.b32.xlu1 %v2695_v35, %s5254_s22  ;;  %v7026_v45 = vpop.permute.xlu1 %3106  ;;  %v2698_v35 = vmul.f32 %v6903_v56, %v6972_v41  ;;  %v2942_v56 = vmul.f32 %v6864_v54, %v6984_v19  ;;  %v3020_v54 = vmul.f32 %v6846_v31, %v6984_v19 }
 0x602   : > { %3271 = vrot.lane.b32.xlu0 %v3246_v63, %s5255_s23  ;;  %2827 = vrot.lane.b32.xlu1 %v2802_v53, %s5255_s23  ;;  %v7036_v18 = vpop.permute.xlu1 %3177  ;;  %v7048_v63 = vpop.permute.xlu0 %2798 }
 0x606   : > { %3179 = vrot.lane.b32.xlu0 %v3152_v50, %s5254_s22  ;;  %2957 = vrot.lane.b32.xlu1 %v2939_v23, %s5254_s22  ;;  %v7050_v53 = vpop.permute.xlu1 %3041  ;;  %v7060_v50 = vpop.permute.xlu0 %3102 }
 0x60a   : > { %3043 = vrot.lane.b32.xlu0 %v3016_v61, %s5255_s23  ;;  %2831 = vrot.lane.b32.xlu1 %v2804_v21, %s5255_s23  ;;  %v7062_v23 = vpop.permute.xlu1 %3273  ;;  %v3156_v61 = vmul.f32 %v6866_v30, %v6984_v19  ;;  %v3019_v21 = vmul.f32 %v6846_v31, %v6982_v32  ;;  %v3252_v30 = vmul.f32 %v6885_v16, %v6984_v19 }
 0x60e   : > { %3275 = vrot.lane.b32.xlu0 %v3248_v24, %s5255_s23  ;;  %3181 = vrot.lane.b32.xlu1 %v3153_v62, %s5254_s22  ;;  %v3251_v24 = vmul.f32 %v6885_v16, %v6982_v32  ;;  %v7074_v62 = vpop.permute.xlu0 %3183  ;;  %v3022_v16 = vmul.f32 %v6878_v58, %v6974_v6 }
 0x612   : > { %2725 = vrot.lane.b32.xlu0 %v2697_v49, %s5254_s22  ;;  %3045 = vrot.lane.b32.xlu1 %v3017_v11, %s5255_s23  ;;  %v7076_v49 = vpop.permute.xlu1 %3189  ;;  %v2701_v11 = vmul.f32 %v6890_v29, %v6984_v19  ;;  %v7086_v31 = vpop.permute.xlu0 %3047  ;;  %v2807_v29 = vmul.f32 %v6980_v52, %v6982_v32 }
 0x616   : > { %2959 = vrot.lane.b32.xlu0 %v2940_v33, %s5254_s22  ;;  %3277 = vrot.lane.b32.xlu1 %v3249_v13, %s5255_s23  ;;  %v7088_v33 = vpop.permute.xlu1 %3053  ;;  %v3158_v13 = vmul.f32 %v6871_v48, %v6974_v6 }
 0x61a   : > { %2833 = vrot.lane.b32.xlu0 %v2805_v7, %s5255_s23  ;;  %2727 = vrot.lane.b32.xlu1 %v2698_v35, %s5254_s22  ;;  %v2943_v7 = vmul.f32 %v6840_v2, %v6974_v6  ;;  %v7100_v35 = vpop.permute.xlu0 %3279 }
 0x61e   : > { %2731 = vrot.lane.b32.xlu0 %v2700_v9, %s5254_s22  ;;  %2961 = vrot.lane.b32.xlu1 %v2941_v1, %s5254_s22  ;;  %v7102_v9 = vpop.permute.xlu1 %3285  ;;  %v3254_v1 = vmul.f32 %v6876_v43, %v6974_v6 }
 0x622   : > { %2963 = vrot.lane.b32.xlu0 %v2942_v56, %s5254_s22  ;;  %3185 = vrot.lane.b32.xlu1 %v3155_v17, %s5254_s22  ;;  %v3159_v56 = vmul.f32 %v6871_v48, %v6976_v36  ;;  %v7112_v17 = vpop.permute.xlu0 %3195  ;;  %v2944_v48 = vmul.f32 %v6840_v2, %v6976_v36  ;;  %v3487_v2 = vld [vmem:[%s8358_s2 + $0x10] sm:$0xff] }
 0x626   : > { %3187 = vrot.lane.b32.xlu0 %v3156_v61, %s5254_s22  ;;  %3049 = vrot.lane.b32.xlu1 %v3019_v21, %s5255_s23  ;;  %v7114_v61 = vpop.permute.xlu1 %2635  ;;  %v2703_v21 = vmul.f32 %v6958_v14, %v6974_v6 }
 0x62a   : > { %3051 = vrot.lane.b32.xlu0 %v3020_v54, %s5255_s23  ;;  %3281 = vrot.lane.b32.xlu1 %v3251_v24, %s5255_s23  ;;  %v3023_v54 = vmul.f32 %v6878_v58, %v6976_v36  ;;  %v7122_v24 = vpop.permute.xlu1 %2645  ;;  %v2702_v58 = vmul.f32 0.0, %v6958_v14 }
 0x62b   : > { %8455 = vst [vmem:[#allocation22_spill] sm:$0xff] %v7122_v24 }
 0x62e   : > { %3283 = vrot.lane.b32.xlu0 %v3252_v30, %s5255_s23  ;;  %2733 = vrot.lane.b32.xlu1 %v2701_v11, %s5254_s22  ;;  %v3255_v30 = vmul.f32 %v6876_v43, %v6976_v36  ;;  %v7128_v11 = vpop.permute.xlu0 %3059 }
 0x632   : > { %3191 = vrot.lane.b32.xlu0 %v3158_v13, %s5254_s22  ;;  %2965 = vrot.lane.b32.xlu1 %v2943_v7, %s5254_s22  ;;  %v2809_v13 = vmul.f32 0.0, %v6980_v52  ;;  %v7134_v7 = vpop.permute.xlu1 %2650  ;;  %v7141_v43 = vpop.permute.xlu0 %3291 }
 0x633   : > { %8456 = vst [vmem:[#allocation21_spill] sm:$0xff] %v7134_v7 }
 0x636   : > { %3055 = vrot.lane.b32.xlu0 %v3022_v16, %s5255_s23  ;;  %2837 = vrot.lane.b32.xlu1 %v2807_v29, %s5255_s23  ;;  %v2808_v16 = vmul.f32 %v6980_v52, %v6984_v19  ;;  %v7145_v29 = vpop.permute.xlu1 %2723 }
 0x63a   : > { %3287 = vrot.lane.b32.xlu0 %v3254_v1, %s5255_s23  ;;  %3193 = vrot.lane.b32.xlu1 %v3159_v56, %s5254_s22  ;;  %v2810_v1 = vmul.f32 %v7048_v63, %v6974_v6  ;;  %v2704_v56 = vmul.f32 %v6958_v14, %v6976_v36  ;;  %v7157_v52 = vpop.permute.xlu1 %2835  ;;  %v3488_v14 = vld [vmem:[%s8358_s2 + $0x18] sm:$0xff] }
 0x63b   : > { %8457 = vst [vmem:[#allocation24_spill] sm:$0xff] %v7157_v52 }
 0x63e   : > { %2737 = vrot.lane.b32.xlu0 %v2703_v21, %s5254_s22  ;;  %3057 = vrot.lane.b32.xlu1 %v3023_v54, %s5255_s23  ;;  %v7152_v21 = vpop.permute.xlu0 %2640  ;;  %v2812_v54 = vmul.f32 0.0, %v7048_v63 }
 0x642   : > { %2967 = vrot.lane.b32.xlu0 %v2944_v48, %s5254_s22  ;;  %3289 = vrot.lane.b32.xlu1 %v3255_v30, %s5255_s23  ;;  %v2811_v48 = vmul.f32 %v7048_v63, %v6976_v36  ;;  %v7161_v30 = vpop.permute.xlu0 %2717 }
 0x646   : > { %2735 = vrot.lane.b32.xlu0 %v2702_v58, %s5254_s22  ;;  %2841 = vrot.lane.b32.xlu1 %v2809_v13, %s5255_s23  ;;  %v7168_v58 = vpop.permute.xlu1 %3496  ;;  %v7170_v13 = vpop.permute.xlu0 %2829 }
 0x647   : > { %8458 = vst [vmem:[#allocation18_spill] sm:$0xff] %v7168_v58 }
 0x64a   : > { %2839 = vrot.lane.b32.xlu0 %v2808_v16, %s5255_s23  ;;  %3501 = vperm.xlu1 %5180, %v3487_v2   ;;  %v7172_v2 = vpop.permute.xlu0 %3491  ;;  %v7174_v16 = vpop.permute.xlu1 %2729 }
 0x64b   : > { %8459 = vst [vmem:[#allocation23_spill] sm:$0xff] %v7172_v2  ;;  %8460 = vst [vmem:[#allocation17_spill] sm:$0xff] %v7174_v16 }
 0x64e   : > { %2843 = vrot.lane.b32.xlu0 %v2810_v1, %s5255_s23  ;;  %2739 = vrot.lane.b32.xlu1 %v2704_v56, %s5254_s22 }
 0x652   : > { %2847 = vrot.lane.b32.xlu0 %v2812_v54, %s5255_s23  ;;  %2845 = vrot.lane.b32.xlu1 %v2811_v48, %s5255_s23  ;;  %v2897_v48 = vmul.f32 0.0, %v6922_v4 }
 0x656   : > { %3506 = vperm.xlu0 %5179, %v3488_v14  }
 0x660   : > { %v7176_v63 = vpop.permute.xlu0 %2719  ;;  %v2954_v1 = vpop.permute.xlu1 %2953 }
 0x661   : > { %v2985_v15 = vadd.f32 %v2954_v1, %v2897_v48 }
 0x664   : > { %v7178_v56 = vpop.permute.xlu0 %2825  ;;  %v3174_v54 = vpop.permute.xlu1 %3173 }
 0x665   : > { %8461 = vst [vmem:[#allocation19_spill] sm:$0xff] %v7178_v56  ;;  %v3217_v42 = vadd.f32 %v3174_v54, %v3109_v37 }
 0x668   : > { %v2956_v26 = vpop.permute.xlu0 %2955  ;;  %v3038_v5 = vpop.permute.xlu1 %3037 }
 0x669   : > { %v3081_v34 = vadd.f32 %v3038_v5, %v2985_v15  ;;  %v2969_v51 = vsel %vm592_vm1, %v2954_v1, %v2956_v26  ;;  %v2987_v48 = vadd.f32 %v2956_v26, %v2899_v10  ;;  %v2900_v10 = vmul.f32 0.0, %v6881_v12 }
 0x66a   : > { %v2986_v59 = vadd.f32 %v2969_v51, %v2898_v38 }
 0x66b   : > { %3349 = vrot.lane.b32.xlu1 %v3081_v34, %s5258_s20 }
 0x66c   : > { %v3176_v0 = vpop.permute.xlu0 %3175  ;;  %v3270_v14 = vpop.permute.xlu1 %3269 }
 0x66d   : > { %v3313_v1 = vadd.f32 %v3270_v14, %v3217_v42 }
 0x66f   : > { %v3405_v51 = vmul.f32 %v3313_v1, %v5732_v8  ;;  %v2902_v1 = vmul.f32 %v6881_v12, %v6972_v41 }
 0x670   : > { %v3040_v25 = vpop.permute.xlu0 %3039  ;;  %v7188_v57 = vpop.permute.xlu1 %2721 }
 0x671   : > { %v3061_v34 = vsel %vm701_vm0, %v3038_v5, %v3040_v25  ;;  %v3062_v15 = vsel %vm701_vm0, %v3040_v25, %v7050_v53 }
 0x672   : > { %v3082_v16 = vadd.f32 %v3061_v34, %v2986_v59  ;;  %v3083_v7 = vadd.f32 %v3062_v15, %v2987_v48  ;;  %v3198_v48 = vsel %vm592_vm1, %v3176_v0, %v7036_v18  ;;  %v3111_v34 = vmul.f32 %v6932_v20, %v6936_v27 }
 0x673   : > { %v3197_v15 = vsel %vm592_vm1, %v3174_v54, %v3176_v0 }
 0x674   : > { %v3272_v24 = vpop.permute.xlu0 %3271  ;;  %3353 = vrot.lane.b32.xlu0 %v3083_v7, %s5258_s20  ;;  %3351 = vrot.lane.b32.xlu1 %v3082_v16, %s5258_s20  ;;  %v7195_v4 = vpop.permute.xlu1 %2827  ;;  %v3219_v18 = vadd.f32 %v3198_v48, %v3111_v34 }
 0x675   : > { %v3293_v2 = vsel %vm701_vm0, %v3270_v14, %v3272_v24 }
 0x678   : > { %v3180_v38 = vpop.permute.xlu0 %3179  ;;  %3429 = vrot.lane.b32.xlu1 %v3405_v51, %s5259_s21  ;;  %v2958_v37 = vpop.permute.xlu1 %2957  ;;  %v3110_v51 = vmul.f32 %v6932_v20, %v6925_v55 }
 0x679   : > { %v2988_v5 = vadd.f32 %v2958_v37, %v2900_v10  ;;  %v3294_v10 = vsel %vm701_vm0, %v3272_v24, %v7062_v23  ;;  %v3113_v24 = vmul.f32 %v6944_v44, %v6970_v47  ;;  %v3220_v34 = vadd.f32 %v3180_v38, %v3112_v39 }
 0x67a   : > { %v3218_v54 = vadd.f32 %v3197_v15, %v3110_v51 }
 0x67c   : > { %v3044_v25 = vpop.permute.xlu0 %3043  ;;  %v7200_v42 = vpop.permute.xlu1 %2831  ;;  %v3314_v56 = vadd.f32 %v3293_v2, %v3218_v54  ;;  %v2905_v54 = vmul.f32 %v7004_v60, %v6984_v19 }
 0x67d   : > { %8462 = vst [vmem:[#allocation15_spill] sm:$0xff] %v7200_v42  ;;  %v3084_v59 = vadd.f32 %v3044_v25, %v2988_v5  ;;  %v2901_v5 = vmul.f32 %v6881_v12, %v6970_v47  ;;  %v3315_v42 = vadd.f32 %v3294_v10, %v3219_v18 }
 0x67f   : > { %3355 = vrot.lane.b32.xlu0 %v3084_v59, %s5258_s20  ;;  %v3407_v2 = vmul.f32 %v3315_v42, %v5751_v40 }
 0x680   : > { %v3276_v26 = vpop.permute.xlu0 %3275  ;;  %v3182_v53 = vpop.permute.xlu1 %3181 }
 0x681   : > { %v3199_v23 = vsel %vm592_vm1, %v3180_v38, %v3182_v53 }
 0x684   : > { %v7203_v7 = vpop.permute.xlu0 %2725  ;;  %v3046_v16 = vpop.permute.xlu1 %3045 }
 0x685   : > { %v3064_v20 = vsel %vm701_vm0, %v3046_v16, %v7086_v31  ;;  %v3063_v12 = vsel %vm701_vm0, %v3044_v25, %v3046_v16  ;;  %v3221_v31 = vadd.f32 %v3199_v23, %v3113_v24  ;;  %v3316_v25 = vadd.f32 %v3276_v26, %v3220_v34 }
 0x686   : > { %v3406_v16 = vmul.f32 %v3314_v56, %v5758_v46  ;;  %v2903_v56 = vmul.f32 0.0, %v7004_v60 }
 0x688   : > { %v2960_v59 = vpop.permute.xlu0 %2959  ;;  %v3278_v58 = vpop.permute.xlu1 %3277 }
 0x689   : > { %v2970_v28 = vsel %vm592_vm1, %v2958_v37, %v2960_v59  ;;  %v2990_v0 = vadd.f32 %v2960_v59, %v2902_v1  ;;  %v3295_v15 = vsel %vm701_vm0, %v3276_v26, %v3278_v58  ;;  %v3296_v39 = vsel %vm701_vm0, %v3278_v58, %v7100_v35 }
 0x68a   : > { %v2989_v22 = vadd.f32 %v2970_v28, %v2901_v5  ;;  %v3200_v28 = vsel %vm592_vm1, %v3182_v53, %v7074_v62  ;;  %v3317_v38 = vadd.f32 %v3295_v15, %v3221_v31  ;;  %v3408_v62 = vmul.f32 %v3316_v25, %v5732_v8 }
 0x68b   : > { %v3086_v52 = vadd.f32 %v3064_v20, %v2990_v0  ;;  %v2904_v0 = vmul.f32 %v7004_v60, %v6982_v32 }
 0x68c   : > { %v3085_v14 = vadd.f32 %v3063_v12, %v2989_v22  ;;  %v7227_v37 = vpop.permute.xlu0 %2833  ;;  %v7229_v48 = vpop.permute.xlu1 %2727  ;;  %v3114_v22 = vmul.f32 %v6944_v44, %v6972_v41  ;;  %v3409_v26 = vmul.f32 %v3317_v38, %v5758_v46 }
 0x68d   : > { %3359 = vrot.lane.b32.xlu0 %v3086_v52, %s5258_s20 }
 0x68e   : > { %3357 = vrot.lane.b32.xlu1 %v3085_v14, %s5258_s20  ;;  %v3222_v51 = vadd.f32 %v3200_v28, %v3114_v22  ;;  %v2906_v22 = vmul.f32 0.0, %v7014_v3 }
 0x690   : > { %v7242_v1 = vpop.permute.xlu0 %2731  ;;  %v2962_v52 = vpop.permute.xlu1 %2961  ;;  %v3318_v42 = vadd.f32 %v3296_v39, %v3222_v51 }
 0x691   : > { %3433 = vrot.lane.b32.xlu0 %v3407_v2, %s5259_s21  ;;  %v2991_v58 = vadd.f32 %v2962_v52, %v2903_v56 }
 0x692   : > { %3431 = vrot.lane.b32.xlu1 %v3406_v16, %s5259_s21  ;;  %v3410_v35 = vmul.f32 %v3318_v42, %v5751_v40 }
 0x694   : > { %v2964_v44 = vpop.permute.xlu0 %2963  ;;  %v7248_v53 = vpop.permute.xlu1 %3185 }
 0x695   : > { %3435 = vrot.lane.b32.xlu0 %v3408_v62, %s5259_s21  ;;  %v2971_v59 = vsel %vm592_vm1, %v2962_v52, %v2964_v44  ;;  %v2993_v23 = vadd.f32 %v2964_v44, %v2905_v54  ;;  %v3117_v44 = vmul.f32 %v7060_v50, %v6984_v19 }
 0x696   : > { %3437 = vrot.lane.b32.xlu1 %v3409_v26, %s5259_s21  ;;  %v2992_v20 = vadd.f32 %v2971_v59, %v2904_v0  ;;  %v3120_v59 = vmul.f32 %v7026_v45, %v6976_v36 }
 0x698   : > { %v3188_v10 = vpop.permute.xlu0 %3187  ;;  %v3050_v5 = vpop.permute.xlu1 %3049 }
 0x699   : > { %v3087_v18 = vadd.f32 %v3050_v5, %v2991_v58  ;;  %3439 = vrot.lane.b32.xlu0 %v3410_v35, %s5259_s21  ;;  %v3202_v26 = vsel %vm592_vm1, %v3188_v10, %v7076_v49  ;;  %v3201_v56 = vsel %vm592_vm1, %v7248_v53, %v3188_v10  ;;  %v2908_v35 = vmul.f32 %v7014_v3, %v6976_v36 }
 0x69a   : > { %v3116_v58 = vmul.f32 %v7060_v50, %v6982_v32  ;;  %v2907_v49 = vmul.f32 %v7014_v3, %v6974_v6  ;;  %v3225_v0 = vadd.f32 %v3202_v26, %v3117_v44  ;;  %v3115_v44 = vmul.f32 0.0, %v7060_v50 }
 0x69b   : > { %3361 = vrot.lane.b32.xlu1 %v3087_v18, %s5258_s20 }
 0x69c   : > { %v3052_v12 = vpop.permute.xlu0 %3051  ;;  %v7261_v24 = vpop.permute.xlu1 %3281 }
 0x69d   : > { %v3065_v14 = vsel %vm701_vm0, %v3050_v5, %v3052_v12  ;;  %v3066_v34 = vsel %vm701_vm0, %v3052_v12, %v7088_v33  ;;  %v3224_v12 = vadd.f32 %v3201_v56, %v3116_v58 }
 0x69e   : > { %v3088_v15 = vadd.f32 %v3065_v14, %v2992_v20  ;;  %v3089_v28 = vadd.f32 %v3066_v34, %v2993_v23 }
 0x6a0   : > { %v3284_v31 = vpop.permute.xlu0 %3283  ;;  %3365 = vrot.lane.b32.xlu0 %v3089_v28, %s5258_s20  ;;  %3363 = vrot.lane.b32.xlu1 %v3088_v15, %s5258_s20  ;;  %v7268_v60 = vpop.permute.xlu1 %2733 }
 0x6a1   : > { %v3298_v5 = vsel %vm701_vm0, %v3284_v31, %v7102_v9  ;;  %v3297_v10 = vsel %vm701_vm0, %v7261_v24, %v3284_v31  ;;  %v3119_v31 = vmul.f32 %v7026_v45, %v6974_v6 }
 0x6a2   : > { %v3321_v15 = vadd.f32 %v3298_v5, %v3225_v0 }
 0x6a4   : > { %v3192_v2 = vpop.permute.xlu0 %3191  ;;  %v2966_v25 = vpop.permute.xlu1 %2965 }
 0x6a5   : > { %v2994_v16 = vadd.f32 %v2966_v25, %v2906_v22 }
 0x6a8   : > { %v3056_v39 = vpop.permute.xlu0 %3055  ;;  %v7271_v38 = vpop.permute.xlu1 %2837 }
 0x6a9   : > { %v3090_v52 = vadd.f32 %v3056_v39, %v2994_v16  ;;  %v3320_v16 = vadd.f32 %v3297_v10, %v3224_v12 }
 0x6ab   : > { %3367 = vrot.lane.b32.xlu0 %v3090_v52, %s5258_s20  ;;  %v3412_v56 = vmul.f32 %v3320_v16, %v5758_v46  ;;  %v2742_v16 = vsel %vm592_vm1, %v7176_v63, %v7188_v57 }
 0x6ac   : > { %v3288_v33 = vpop.permute.xlu0 %3287  ;;  %v3194_v51 = vpop.permute.xlu1 %3193 }
 0x6ad   : > { %v3204_v14 = vsel %vm592_vm1, %v3194_v51, %v7112_v17  ;;  %v3203_v28 = vsel %vm592_vm1, %v3192_v2, %v3194_v51  ;;  %v3413_v51 = vmul.f32 %v3321_v15, %v5751_v40 }
 0x6ae   : > { %v3228_v26 = vadd.f32 %v3204_v14, %v3120_v59 }
 0x6b0   : > { %v7274_v62 = vpop.permute.xlu0 %2737  ;;  %v3058_v42 = vpop.permute.xlu1 %3057 }
 0x6b1   : > { %v3068_v9 = vsel %vm701_vm0, %v3058_v42, %v7128_v11  ;;  %v3067_v3 = vsel %vm701_vm0, %v3056_v39, %v3058_v42  ;;  %v3227_v11 = vadd.f32 %v3203_v28, %v3119_v31  ;;  %v3118_v39 = vmul.f32 0.0, %v7026_v45 }
 0x6b2   : > { %v2656_v28 = vmul.f32 0.0, %v7152_v21  ;;  %v2743_v31 = vsel %vm592_vm1, %v7145_v29, %v7203_v7  ;;  %v2741_v29 = vsel %vm592_vm1, %v7161_v30, %v7176_v63 }
 0x6b3   : > { %v3226_v58 = vadd.f32 %v3192_v2, %v3118_v39 }
 0x6b4   : > { %v2968_v18 = vpop.permute.xlu0 %2967  ;;  %v3290_v23 = vpop.permute.xlu1 %3289 }
 0x6b5   : > { %v2972_v54 = vsel %vm592_vm1, %v2966_v25, %v2968_v18  ;;  %v2996_v20 = vadd.f32 %v2968_v18, %v2908_v35  ;;  %v3300_v52 = vsel %vm701_vm0, %v3290_v23, %v7141_v43  ;;  %v3299_v17 = vsel %vm701_vm0, %v3288_v33, %v3290_v23 }
 0x6b6   : > { %v2995_v34 = vadd.f32 %v2972_v54, %v2907_v49  ;;  %v3324_v42 = vadd.f32 %v3300_v52, %v3228_v26  ;;  %v3323_v35 = vadd.f32 %v3299_v17, %v3227_v11  ;;  %v3223_v43 = vadd.f32 %v7248_v53, %v3115_v44  ;;  %v8464_v44 = vld [vmem:[#allocation24_spill] sm:$0xff] }
 0x6b7   : > { %v3092_v22 = vadd.f32 %v3068_v9, %v2996_v20  ;;  %v3322_v5 = vadd.f32 %v3288_v33, %v3226_v58  ;;  %v2654_v52 = vmul.f32 %v7114_v61, %v6925_v55  ;;  %v2657_v26 = vmul.f32 %v7152_v21, %v6970_v47 }
 0x6b8   : > { %v3091_v25 = vadd.f32 %v3067_v3, %v2995_v34  ;;  %v3416_v59 = vmul.f32 %v3324_v42, %v5751_v40  ;;  %v3319_v18 = vadd.f32 %v7261_v24, %v3223_v43  ;;  %v3415_v45 = vmul.f32 %v3323_v35, %v5758_v46  ;;  %v7324_v53 = vpop.permute.xlu0 %2735  ;;  %v7326_v33 = vpop.permute.xlu1 %2841 }
 0x6b9   : > { %3371 = vrot.lane.b32.xlu0 %v3092_v22, %s5258_s20  ;;  %v3414_v50 = vmul.f32 %v3322_v5, %v5732_v8  ;;  %v2658_v3 = vmul.f32 %v7152_v21, %v6972_v41  ;;  %v2655_v22 = vmul.f32 %v7114_v61, %v6936_v27  ;;  %v2850_v17 = vsel %vm701_vm0, %v7195_v4, %v7170_v13 }
 0x6ba   : > { %3369 = vrot.lane.b32.xlu1 %v3091_v25, %s5258_s20  ;;  %v3411_v2 = vmul.f32 %v3319_v18, %v5732_v8  ;;  %v2744_v25 = vsel %vm592_vm1, %v7203_v7, %v7229_v48  ;;  %v8463_v7 = vld [vmem:[#allocation19_spill] sm:$0xff]  ;;  %v2852_v21 = vsel %vm701_vm0, %v7227_v37, %v8464_v44  ;;  %v2653_v13 = vmul.f32 0.0, %v7114_v61 }
 0x6bb   : > { %v2766_v11 = vadd.f32 %v7229_v48, %v2658_v3  ;;  %v2763_v39 = vadd.f32 %v7188_v57, %v2655_v22  ;;  %v2849_v42 = vsel %vm701_vm0, %v8463_v7, %v7195_v4  ;;  %v2762_v35 = vadd.f32 %v2742_v16, %v2654_v52  ;;  %v8465_v57 = vld [vmem:[#allocation15_spill] sm:$0xff]  ;;  %v8467_v22 = vld [vmem:[#allocation6_spill] sm:$0xff] }
 0x6bc   : > { %v7330_v24 = vpop.permute.xlu0 %2839  ;;  %v2764_v48 = vadd.f32 %v2743_v31, %v2656_v28  ;;  %v2765_v58 = vadd.f32 %v2744_v25, %v2657_v26  ;;  %v2761_v5 = vadd.f32 %v2741_v29, %v2653_v13  ;;  %v2851_v18 = vsel %vm701_vm0, %v8465_v57, %v7227_v37 }
 0x6bd   : > { %3445 = vrot.lane.b32.xlu0 %v3413_v51, %s5259_s21  ;;  %v2871_v43 = vadd.f32 %v2850_v17, %v2763_v39  ;;  %v2874_v30 = vadd.f32 %v2852_v21, %v2766_v11  ;;  %v8468_v39 = vld [vmem:[#allocation5_spill] sm:$0xff] }
 0x6be   : > { %3443 = vrot.lane.b32.xlu1 %v3412_v56, %s5259_s21  ;;  %v2869_v28 = vadd.f32 %v8463_v7, %v2761_v5 }
 0x6c0   : > { %v7334_v10 = vpop.permute.xlu0 %2843 }
 0x6c1   : > { %3451 = vrot.lane.b32.xlu0 %v3416_v59, %s5259_s21  ;;  %v2870_v59 = vadd.f32 %v2849_v42, %v2762_v35 }
 0x6c2   : > { %3449 = vrot.lane.b32.xlu1 %v3415_v45, %s5259_s21  ;;  %v2872_v45 = vadd.f32 %v8465_v57, %v2764_v48 }
 0x6c3   : > { %v3326_v16 = vmul.f32 %v2870_v59, %v8467_v22 }
 0x6c4   : > { %v7338_v20 = vpop.permute.xlu0 %2847  ;;  %v3328_v42 = vmul.f32 %v2872_v45, %v8468_v39  ;;  %v8469_v45 = vld [vmem:[#allocation23_spill] sm:$0xff] }
 0x6c5   : > { %3447 = vrot.lane.b32.xlu0 %v3414_v50, %s5259_s21  ;;  %v2873_v50 = vadd.f32 %v2851_v18, %v2765_v58 }
 0x6c6   : > { %3441 = vrot.lane.b32.xlu1 %v3411_v2, %s5259_s21  ;;  %v8466_v2 = vld [vmem:[#allocation4_spill] sm:$0xff] }
 0x6c7   : > { %v3327_v3 = vmul.f32 %v2871_v43, %v8466_v2  ;;  %v3330_v31 = vmul.f32 %v2874_v30, %v8466_v2  ;;  %v3329_v44 = vmul.f32 %v2873_v50, %v8467_v22 }
 0x6c9   : > { %v7328_v49 = vpop.permute.xlu1 %3501 }
 0x6cd   : > { %v7332_v0 = vpop.permute.xlu1 %2739 }
 0x6d1   : > { %v7336_v54 = vpop.permute.xlu1 %2845 }
 0x6d5   : > { %v7340_v12 = vpop.permute.xlu0 %3506 }
 0x6dd   : > { %v3350_v23 = vpop.permute.xlu1 %3349 }
 0x6e6   : > { %v3352_v14 = vpop.permute.xlu1 %3351  ;;  %v3354_v9 = vpop.permute.xlu0 %3353 }
 0x6e7   : > { %v3374_v61 = vsel %vm1244_vm4, %v3352_v14, %v3354_v9  ;;  %v3395_v52 = vadd.f32 %v3354_v9, %v3327_v3  ;;  %v3373_v7 = vsel %vm1244_vm4, %v3350_v23, %v3352_v14  ;;  %v3325_v9 = vmul.f32 %v2869_v28, %v8468_v39  ;;  %v8470_v14 = vld [vmem:[#allocation18_spill] sm:$0xff] }
 0x6e8   : > { %v3394_v29 = vadd.f32 %v3374_v61, %v3326_v16 }
 0x6e9   : > { %v3393_v30 = vadd.f32 %v3373_v7, %v3325_v9 }
 0x6ea   : > { %v3430_v15 = vpop.permute.xlu1 %3429 }
 0x6f1   : > { %v3356_v34 = vpop.permute.xlu0 %3355 }
 0x6ff   : > { %v3360_v51 = vpop.permute.xlu0 %3359 }
 0x700   : > { %v3358_v56 = vpop.permute.xlu1 %3357  ;;  %v3398_v21 = vadd.f32 %v3360_v51, %v3330_v31 }
 0x701   : > { %v3375_v26 = vsel %vm1244_vm4, %v3356_v34, %v3358_v56  ;;  %v3376_v37 = vsel %vm1244_vm4, %v3358_v56, %v3360_v51 }
 0x702   : > { %v3396_v48 = vadd.f32 %v3375_v26, %v3328_v42  ;;  %v3397_v34 = vadd.f32 %v3376_v37, %v3329_v44  ;;  %v2746_v37 = vsel %vm592_vm1, %v7242_v1, %v7268_v60  ;;  %v8472_v44 = vld [vmem:[#allocation21_spill] sm:$0xff] }
 0x703   : > { %v3434_v63 = vpop.permute.xlu0 %3433  ;;  %v2664_v7 = vmul.f32 %v8472_v44, %v6976_v36  ;;  %v2663_v9 = vmul.f32 %v8472_v44, %v6974_v6 }
 0x704   : > { %v3432_v4 = vpop.permute.xlu1 %3431  ;;  %v3475_v13 = vadd.f32 %v3434_v63, %v3395_v52  ;;  %v8471_v52 = vld [vmem:[#allocation22_spill] sm:$0xff] }
 0x705   : > { %v3454_v17 = vsel %vm1343_vm5, %v3432_v4, %v3434_v63  ;;  %v3453_v43 = vsel %vm1343_vm5, %v3430_v15, %v3432_v4  ;;  %v2661_v26 = vmul.f32 %v8471_v52, %v6984_v19 }
 0x706   : > { %v3474_v58 = vadd.f32 %v3454_v17, %v3394_v29  ;;  %v3511_v23 = vadd.f32 %v8469_v45, %v3475_v13  ;;  %v3473_v63 = vadd.f32 %v3453_v43, %v3393_v30  ;;  %v2854_v17 = vsel %vm701_vm0, %v7330_v24, %v7326_v33 }
 0x707   : > { %v3436_v25 = vpop.permute.xlu0 %3435  ;;  %v2660_v29 = vmul.f32 %v8471_v52, %v6982_v32  ;;  %v2769_v42 = vadd.f32 %v7268_v60, %v2661_v26  ;;  %v2853_v13 = vsel %vm701_vm0, %v7271_v38, %v7330_v24  ;;  %v2856_v33 = vsel %vm701_vm0, %v7336_v54, %v7338_v20 }
 0x708   : > { %v3438_v11 = vpop.permute.xlu1 %3437  ;;  %v3510_v50 = vadd.f32 %v8469_v45, %v3474_v58  ;;  %v3509_v15 = vadd.f32 %v8469_v45, %v3473_v63  ;;  %v8473_v58 = vld [vmem:[#allocation17_spill] sm:$0xff]  ;;  %v2855_v24 = vsel %vm701_vm0, %v7334_v10, %v7336_v54  ;;  %v2747_v20 = vsel %vm592_vm1, %v7324_v53, %v7274_v62 }
 0x709   : > { %v3455_v35 = vsel %vm1343_vm5, %v3436_v25, %v3438_v11  ;;  %v2768_v60 = vadd.f32 %v2746_v37, %v2660_v29 }
 0x70a   : > { %v3476_v57 = vadd.f32 %v3455_v35, %v3396_v48  ;;  %v2748_v35 = vsel %vm592_vm1, %v7274_v62, %v7332_v0  ;;  %v2877_v48 = vadd.f32 %v2854_v17, %v2769_v42 }
 0x70b   : > { %v3440_v56 = vpop.permute.xlu0 %3439 }
 0x70c   : > { %v3456_v5 = vsel %vm1343_vm5, %v3438_v11, %v3440_v56  ;;  %v3478_v59 = vadd.f32 %v3440_v56, %v3398_v21  ;;  %v3512_v28 = vadd.f32 %v8470_v14, %v3476_v57  ;;  %v2745_v56 = vsel %vm592_vm1, %v8473_v58, %v7242_v1 }
 0x70d   : > { %v3477_v18 = vadd.f32 %v3456_v5, %v3397_v34  ;;  %v3362_v31 = vpop.permute.xlu1 %3361  ;;  %v2772_v34 = vadd.f32 %v7332_v0, %v2664_v7  ;;  %v2876_v5 = vadd.f32 %v2853_v13, %v2768_v60  ;;  %v2662_v0 = vmul.f32 0.0, %v8472_v44 }
 0x70e   : > { %v3514_v51 = vadd.f32 %v8470_v14, %v3478_v59  ;;  %v3526_v4 = vpack.c.bf16 %v3512_v28, %v3509_v15  ;;  %v2771_v59 = vadd.f32 %v2748_v35, %v2663_v9  ;;  %v3333_v1 = vmul.f32 %v2877_v48, %v8466_v2 }
 0x70f   : > { %v3513_v3 = vadd.f32 %v8470_v14, %v3477_v18  ;;  %v2880_v30 = vadd.f32 %v2856_v33, %v2772_v34  ;;  %v2659_v18 = vmul.f32 0.0, %v8471_v52  ;;  %v2770_v14 = vadd.f32 %v2747_v20, %v2662_v0  ;;  %v3534_v0 = vld [vmem:[%s8360_s4 + $0x10] sm:$0xff] }
 0x710   : > { %v3528_v61 = vpack.c.bf16 %v3514_v51, %v3511_v23  ;;  %v2879_v45 = vadd.f32 %v2855_v24, %v2771_v59 }
 0x711   : > { %v3527_v16 = vpack.c.bf16 %v3513_v3, %v3510_v50  ;;  %v2767_v23 = vadd.f32 %v2745_v56, %v2659_v18  ;;  %v3332_v50 = vmul.f32 %v2876_v5, %v8467_v22  ;;  %v3336_v62 = vmul.f32 %v2880_v30, %v8466_v2  ;;  %v3532_v30 = vld [vmem:[%s8360_s4] sm:$0xff] }
 0x712   : > { %3576 = vrot.lane.b32.xlu0 %v3528_v61, %s5260_s30  ;;  %v3366_v25 = vpop.permute.xlu0 %3365  ;;  %v3364_v21 = vpop.permute.xlu1 %3363  ;;  %v2878_v61 = vadd.f32 %v7334_v10, %v2770_v14  ;;  %v3335_v52 = vmul.f32 %v2879_v45, %v8467_v22  ;;  %v3535_v45 = vld [vmem:[%s8360_s4 + $0x18] sm:$0xff]  ;;  %v7486_v14 = vld [vmem:[%s8357_s1 + $0x8] sm:$0xff] }
 0x713   : > { %3574 = vrot.lane.b32.xlu1 %v3527_v16, %s5260_s30  ;;  %v3378_v54 = vsel %vm1244_vm4, %v3364_v21, %v3366_v25  ;;  %v3401_v63 = vadd.f32 %v3366_v25, %v3333_v1  ;;  %v2875_v3 = vadd.f32 %v7271_v38, %v2767_v23  ;;  %v3377_v25 = vsel %vm1244_vm4, %v3362_v31, %v3364_v21 }
 0x714   : > { %v3400_v15 = vadd.f32 %v3378_v54, %v3332_v50  ;;  %v3334_v7 = vmul.f32 %v2878_v61, %v8468_v39  ;;  %v5279_v1 = vmov 31   ;;  %v5280_v23 = vmov 32   ;;  %v7504_v50 = vld [vmem:[%s8357_s1 + $0x18] sm:$0xff] }
 0x715   : > { %v3331_v10 = vmul.f32 %v2875_v3, %v8468_v39  ;;  %v5281_v54 = vmov 35   ;;  %v5285_v3 = vmov 28   ;;  %v5286_v61 = vmov 29  }
 0x717   : > { %3572 = vrot.lane.b32.xlu1 %v3526_v4, %s5260_s30  ;;  %v3399_v60 = vadd.f32 %v3377_v25, %v3331_v10  ;;  %v8475_v10 = vld [vmem:[#allocation8_spill] sm:$0xff] }
 0x71d   : > { %v3368_v11 = vpop.permute.xlu0 %3367 }
 0x72b   : > { %v3372_v43 = vpop.permute.xlu0 %3371 }
 0x72c   : > { %v3370_v57 = vpop.permute.xlu1 %3369  ;;  %v3404_v4 = vadd.f32 %v3372_v43, %v3336_v62  ;;  %v5283_v62 = vmov 33  }
 0x72d   : > { %v3380_v28 = vsel %vm1244_vm4, %v3370_v57, %v3372_v43  ;;  %v3379_v17 = vsel %vm1244_vm4, %v3368_v11, %v3370_v57 }
 0x72e   : > { %v3403_v29 = vadd.f32 %v3380_v28, %v3335_v52  ;;  %v3402_v31 = vadd.f32 %v3379_v17, %v3334_v7  ;;  %v5287_v28 = vmov 27  }
 0x72f   : > { %v3446_v51 = vpop.permute.xlu0 %3445 }
 0x730   : > { %v3444_v53 = vpop.permute.xlu1 %3443  ;;  %v3481_v26 = vadd.f32 %v3446_v51, %v3401_v63  ;;  %v7494_v63 = vld [vmem:[%s8357_s1 + $0x10] sm:$0xff] }
 0x731   : > { %v3458_v16 = vsel %vm1343_vm5, %v3444_v53, %v3446_v51  ;;  %v5282_v51 = vmov 34  }
 0x732   : > { %v3480_v42 = vadd.f32 %v3458_v16, %v3400_v15  ;;  %v3517_v35 = vadd.f32 %v7328_v49, %v3481_v26 }
 0x733   : > { %v3452_v37 = vpop.permute.xlu0 %3451 }
 0x734   : > { %v3484_v44 = vadd.f32 %v3452_v37, %v3404_v4  ;;  %v3450_v38 = vpop.permute.xlu1 %3449  ;;  %v3516_v11 = vadd.f32 %v7328_v49, %v3480_v42 }
 0x735   : > { %v3460_v13 = vsel %vm1343_vm5, %v3450_v38, %v3452_v37 }
 0x736   : > { %v3520_v33 = vadd.f32 %v7340_v12, %v3484_v44  ;;  %v3483_v9 = vadd.f32 %v3460_v13, %v3403_v29  ;;  %v5215_v44 = vld [vmem:[%s8359_s3 + $0x20] sm:$0xff]   ;;  %v8477_v13 = vld [vmem:[#allocation9_spill] sm:$0xff] }
 0x737   : > { %v3448_v21 = vpop.permute.xlu0 %3447 }
 0x738   : > { %v3519_v48 = vadd.f32 %v7340_v12, %v3483_v9  ;;  %v3459_v34 = vsel %vm1343_vm5, %v3448_v21, %v3450_v38  ;;  %v3442_v58 = vpop.permute.xlu1 %3441  ;;  %v3531_v56 = vpack.c.bf16 %v3520_v33, %v3517_v35  ;;  %v8474_v38 = vld [vmem:[#allocation10_spill] sm:$0xff]  ;;  %v8478_v35 = vld [vmem:[#allocation7_spill] sm:$0xff]  ;;  %v8480_v9 = vmov 0  }
 0x739   : > { %v3482_v24 = vadd.f32 %v3459_v34, %v3402_v31  ;;  %v3457_v43 = vsel %vm1343_vm5, %v3442_v58, %v3444_v53  ;;  %v5284_v53 = vmov 30   ;;  %v8476_v7 = vpack.c.bf16 %v8474_v38, %v8475_v10  ;;  %v8482_v31 = vld [vmem:[#allocation14_spill] sm:$0xff]  ;;  %v8485_v34 = vld [vmem:[#allocation13_spill] sm:$0xff] }
 0x73a   : > { %v3479_v20 = vadd.f32 %v3457_v43, %v3399_v60  ;;  %3582 = vrot.lane.b32.xlu1 %v3531_v56, %s5260_s30  ;;  %v3530_v5 = vpack.c.bf16 %v3519_v48, %v3516_v11  ;;  %v8479_v33 = vpack.c.bf16 %v8477_v13, %v8478_v35  ;;  %v8481_v60 = vld [vmem:[#allocation12_spill] sm:$0xff]  ;;  %v8484_v48 = vld [vmem:[#allocation11_spill] sm:$0xff]  ;;  %v8487_v56 = vpack.c.bf16 %v6972_v41, %v6936_v27 }
 0x73b   : > { %v3518_v59 = vadd.f32 %v7340_v12, %v3482_v24  ;;  %v3533_v12 = vld [vmem:[%s8360_s4 + $0x8] sm:$0xff]  ;;  %v8483_v21 = vpack.c.bf16 %v8481_v60, %v8482_v31  ;;  %v8486_v58 = vpack.c.bf16 %v8484_v48, %v8485_v34  ;;  %v8488_v43 = vpack.c.bf16 %v6970_v47, %v6925_v55  ;;  %v4539_v35 = vld [vmem:[%s8358_s2] sm:$0xff] }
 0x73c   : > { %v3515_v57 = vadd.f32 %v7328_v49, %v3479_v20  ;;  %3580 = vrot.lane.b32.xlu0 %v3530_v5, %s5260_s30  ;;  %v7476_v49 = vld [vmem:[%s8357_s1] sm:$0xff]  ;;  %v5216_v11 = vld [vmem:[%s8359_s3 + $0x28] sm:$0xff]   ;;  %v8489_v20 = vpack.c.bf16 %v6976_v36, %v6984_v19  ;;  %v8490_v27 = vpack.c.bf16 %v6974_v6, %v6982_v32 }
 0x73e   : > { %v3529_v18 = vpack.c.bf16 %v3518_v59, %v3515_v57  ;;  %3538 = vperm.xlu1 %5180, %v3532_v30  }
 0x740   : > { %3578 = vrot.lane.b32.xlu0 %v3529_v18, %s5260_s30 }
 0x742   : > { %3548 = vperm.xlu1 %5180, %v3534_v0  }
 0x744   : > { %3543 = vperm.xlu0 %5179, %v3533_v12  }
 0x746   : > { %5181 = vset.pattern.permute.xlu1 %v5279_v1 }
 0x747   : > { %3976 = vperm.xlu1 %5181, %v7476_v49  }
 0x748   : > { %3553 = vperm.xlu0 %5179, %v3535_v45  }
 0x74b   : > { %5183 = vset.pattern.permute.xlu1 %v5280_v23 }
 0x74c   : > { %4188 = vperm.xlu1 %5183, %v7476_v49   ;;  %5182 = vset.pattern.permute.xlu0 %v5279_v1 }
 0x74d   : > { %3980 = vperm.xlu0 %5182, %v7486_v14  }
 0x750   : > { %4192 = vperm.xlu1 %5183, %v7486_v14  }
 0x751   : > { %5186 = vset.pattern.permute.xlu0 %v5281_v54 }
 0x752   : > { %4288 = vperm.xlu0 %5186, %v7486_v14  }
 0x754   : > { %5184 = vset.pattern.permute.xlu1 %v5282_v51 }
 0x755   : > { %4056 = vperm.xlu1 %5184, %v7486_v14  }
 0x756   : > { %5188 = vset.pattern.permute.xlu0 %v5280_v23 }
 0x757   : > { %4196 = vperm.xlu0 %5188, %v7494_v63  }
 0x759   : > { %5185 = vset.pattern.permute.xlu1 %v5281_v54 }
 0x75a   : > { %4284 = vperm.xlu1 %5185, %v7476_v49  }
 0x75b   : > { %5189 = vset.pattern.permute.xlu0 %v5282_v51 }
 0x75c   : > { %4052 = vperm.xlu0 %5189, %v7476_v49  }
 0x75e   : > { %5187 = vset.pattern.permute.xlu1 %v5279_v1 }
 0x75f   : > { %3984 = vperm.xlu1 %5187, %v7494_v63  }
 0x760   : > { %4064 = vperm.xlu0 %5189, %v7504_v50  }
 0x763   : > { %3988 = vperm.xlu1 %5187, %v7504_v50  }
 0x764   : > { %5195 = vset.pattern.permute.xlu0 %v5283_v62 }
 0x765   : > { %3844 = vperm.xlu0 %5195, %v7486_v14  }
 0x767   : > { %5190 = vset.pattern.permute.xlu1 %v5280_v23 }
 0x768   : > { %4200 = vperm.xlu1 %5190, %v7504_v50  }
 0x769   : > { %5196 = vset.pattern.permute.xlu0 %v5284_v53 }
 0x76a   : > { %3732 = vperm.xlu0 %5196, %v7476_v49  }
 0x76c   : > { %5191 = vset.pattern.permute.xlu1 %v5282_v51 }
 0x76d   : > { %4060 = vperm.xlu1 %5191, %v7494_v63  }
 0x76e   : > { %3744 = vperm.xlu0 %5196, %v7504_v50  }
 0x771   : > { %5192 = vset.pattern.permute.xlu1 %v5281_v54 }
 0x772   : > { %4292 = vperm.xlu1 %5192, %v7494_v63   ;;  %5201 = vset.pattern.permute.xlu0 %v5285_v3 }
 0x773   : > { %3944 = vperm.xlu0 %5201, %v7494_v63  }
 0x776   : > { %4296 = vperm.xlu1 %5192, %v7504_v50  }
 0x777   : > { %5202 = vset.pattern.permute.xlu0 %v5286_v61 }
 0x778   : > { %4148 = vperm.xlu0 %5202, %v7476_v49  }
 0x77a   : > { %5193 = vset.pattern.permute.xlu1 %v5284_v53 }
 0x77b   : > { %3736 = vperm.xlu1 %5193, %v7486_v14  }
 0x77c   : > { %4160 = vperm.xlu0 %5202, %v7504_v50  }
 0x77f   : > { %5194 = vset.pattern.permute.xlu1 %v5283_v62 }
 0x780   : > { %3840 = vperm.xlu1 %5194, %v7476_v49   ;;  %5205 = vset.pattern.permute.xlu0 %v5287_v28 }
 0x784   : > { %v3577_v16 = vpop.permute.xlu0 %3576  ;;  %5197 = vset.pattern.permute.xlu1 %v5285_v3 }
 0x785   : > { %v3575_v15 = vpop.permute.xlu1 %3574  ;;  %3936 = vperm.xlu1 %5197, %v7476_v49  }
 0x786   : > { %v3585_v4 = vsel %vm1474_vm6, %v3575_v15, %v3577_v16 }
 0x787   : > { %3598 = vmatprep.subr.bf16.mxu0 %v3585_v4 }
 0x789   : > { %v3573_v52 = vpop.permute.xlu1 %3572  ;;  %3940 = vperm.xlu1 %5197, %v7486_v14  }
 0x78a   : > { %v3584_v26 = vsel %vm1474_vm6, %v3573_v52, %v3575_v15 }
 0x78b   : > { %3599 = vmatpush1.bf16.msra.mxu0 %v3584_v26 }
 0x78d   : > { %5198 = vset.pattern.permute.xlu1 %v5286_v61 }
 0x78e   : > { %4152 = vperm.xlu1 %5198, %v7486_v14  }
 0x792   : > { %5199 = vset.pattern.permute.xlu1 %v5284_v53 }
 0x793   : > { %3740 = vperm.xlu1 %5199, %v7494_v63  }
 0x797   : > { %5200 = vset.pattern.permute.xlu1 %v5283_v62 }
 0x798   : > { %3848 = vperm.xlu1 %5200, %v7494_v63  }
 0x79c   : > { %3852 = vperm.xlu1 %5200, %v7504_v50  }
 0x7a0   : > { %5203 = vset.pattern.permute.xlu1 %v5285_v3 }
 0x7a1   : > { %3948 = vperm.xlu1 %5203, %v7504_v50  }
 0x7a5   : > { %5204 = vset.pattern.permute.xlu1 %v5286_v61 }
 0x7a6   : > { %4156 = vperm.xlu1 %5204, %v7494_v63  }
 0x7aa   : > { %5206 = vset.pattern.permute.xlu1 %v5287_v28 }
 0x7ac   : > { %v3583_v25 = vpop.permute.xlu1 %3582 }
 0x7ae   : > { %v3581_v37 = vpop.permute.xlu0 %3580 }
 0x7af   : > { %v3587_v17 = vsel %vm1474_vm6, %v3581_v37, %v3583_v25 }
 0x7b0   : > { %3600 = vmatprep.subr.bf16.mxu0 %v3587_v17 }
 0x7b2   : > { %v3579_v29 = vpop.permute.xlu0 %3578 }
 0x7b3   : > { %v3586_v42 = vsel %vm1474_vm6, %v3579_v29, %v3581_v37 }
 0x7b4   : > { %3601 = vmatpush1.bf16.msra.mxu0 %v3586_v42 }
 0x7b5   : > { %4757 = vmatprep.subr.bf16.mxu0 %v8476_v7  ;;  %v8491_v7 = vmov 3  }
 0x7b7   : > { %5033 = vmatmul.mubr.msk.bf16.vlgmr.msra.gmra.mrb[0].mxu0 %vm1483_vm7, %v5215_v44 }
 0x7b8   : > { %4758 = vmatpush1.bf16.msra.mxu0 %v8479_v33  ;;  %3640 = vmatprep.mubr.bf16.mxu0 %v8480_v9 }
 0x7b9   : > { %4759 = vmatprep.subr.bf16.mxu0 %v8483_v21 }
 0x7bc   : > { %4760 = vmatpush1.bf16.msra.mxu0 %v8486_v58 }
 0x7bd   : > { %4761 = vmatprep.subr.bf16.mxu0 %v8487_v56  ;;  %v7555_v24 = vpop.permute.xlu1 %3538 }
 0x7bf   : > { %5034 = vmatmul.mubr.msk.bf16.gmra.mrb[4].mxu0 %vm1483_vm7, %v5216_v11 }
 0x7c0   : > { %4762 = vmatpush1.bf16.msra.mxu0 %v8488_v43  ;;  %4789 = vmatprep.mubr.bf16.mxu0 %v8480_v9 }
 0x7c1   : > { %4763 = vmatprep.subr.bf16.mxu0 %v8489_v20  ;;  %v7565_v5 = vpop.permute.xlu1 %3548 }
 0x7c3   : > { %v7567_v59 = vpop.permute.xlu0 %3543 }
 0x7c4   : > { %4764 = vmatpush1.bf16.msra.mxu0 %v8490_v27 }
 0x7c6   : > { %v7572_v41 = vpop.permute.xlu1 %3976 }
 0x7c7   : > { %v7574_v30 = vpop.permute.xlu0 %3553 }
 0x7cb   : > { %v7576_v55 = vpop.permute.xlu1 %4188 }
 0x7cc   : > { %v4205_v47 = vmul.f32 0.0, %v7576_v55  ;;  %v7579_v57 = vpop.permute.xlu0 %3980 }
 0x7ce   : > { %4231 = vrot.lane.b32.xlu0 %v4205_v47, %s5254_s22 }
 0x7cf   : > { %v7582_v36 = vpop.permute.xlu1 %4192 }
 0x7d0   : > { %v4208_v19 = vmul.f32 0.0, %v7582_v36 }
 0x7d1   : > { %v7585_v18 = vpop.permute.xlu0 %4288 }
 0x7d2   : > { %4237 = vrot.lane.b32.xlu1 %v4208_v19, %s5254_s22  ;;  %v4304_v12 = vmul.f32 0.0, %v7585_v18 }
 0x7d4   : > { %v7588_v6 = vpop.permute.xlu1 %4056 }
 0x7d5   : > { %v4072_v32 = vmul.f32 0.0, %v7588_v6 }
 0x7d6   : > { %v7591_v0 = vpop.permute.xlu0 %4196 }
 0x7d7   : > { %4101 = vrot.lane.b32.xlu1 %v4072_v32, %s5255_s23  ;;  %v4211_v62 = vmul.f32 0.0, %v7591_v0 }
 0x7d9   : > { %v7595_v45 = vpop.permute.xlu1 %4284 }
 0x7da   : > { %v4301_v54 = vmul.f32 0.0, %v7595_v45 }
 0x7db   : > { %v7597_v1 = vpop.permute.xlu0 %4052  ;;  %4333 = vrot.lane.b32.xlu1 %v4304_v12, %s5255_s23 }
 0x7dc   : > { %v4069_v23 = vmul.f32 0.0, %v7597_v1 }
 0x7de   : > { %v7602_v51 = vpop.permute.xlu1 %3984  ;;  %4095 = vrot.lane.b32.xlu0 %v4069_v23, %s5255_s23 }
 0x7df   : > { %v7612_v61 = vpop.permute.xlu0 %4064 }
 0x7e0   : > { %v4078_v16 = vmul.f32 0.0, %v7612_v61 }
 0x7e2   : > { %v7606_v53 = vpop.permute.xlu1 %3988  ;;  %4327 = vrot.lane.b32.xlu0 %v4301_v54, %s5255_s23 }
 0x7e4   : > { %v7631_v17 = vpop.permute.xlu0 %3844 }
 0x7e5   : > { %v3860_v10 = vmul.f32 0.0, %v7631_v17 }
 0x7e6   : > { %4243 = vrot.lane.b32.xlu0 %v4211_v62, %s5254_s22 }
 0x7e7   : > { %v7610_v3 = vpop.permute.xlu1 %4200 }
 0x7e8   : > { %v4214_v28 = vmul.f32 0.0, %v7610_v3 }
 0x7e9   : > { %v7640_v38 = vpop.permute.xlu0 %3732 }
 0x7ea   : > { %4249 = vrot.lane.b32.xlu1 %v4214_v28, %s5254_s22 }
 0x7ec   : > { %v7617_v15 = vpop.permute.xlu1 %4060 }
 0x7ed   : > { %v4075_v4 = vmul.f32 0.0, %v7617_v15 }
 0x7ee   : > { %4113 = vrot.lane.b32.xlu1 %v4078_v16, %s5255_s23 }
 0x7ef   : > { %4107 = vrot.lane.b32.xlu0 %v4075_v4, %s5255_s23 }
 0x7f1   : > { %v7622_v52 = vpop.permute.xlu1 %4292 }
 0x7f2   : > { %v4307_v26 = vmul.f32 0.0, %v7622_v52 }
 0x7f4   : > { %4339 = vrot.lane.b32.xlu0 %v4307_v26, %s5255_s23 }
 0x7f5   : > { %v7626_v25 = vpop.permute.xlu1 %4296 }
 0x7f6   : > { %v4310_v37 = vmul.f32 0.0, %v7626_v25 }
 0x7f8   : > { %4345 = vrot.lane.b32.xlu1 %v4310_v37, %s5255_s23  ;;  %3689 = vperm.xlu0 %5205, %v7476_v49   ;;  %v3747_v49 = vmul.f32 0.0, %v7640_v38 }
 0x7fa   : > { %v7633_v29 = vpop.permute.xlu1 %3736 }
 0x7fb   : > { %v3750_v42 = vmul.f32 0.0, %v7633_v29 }
 0x7fc   : > { %3694 = vperm.xlu1 %5206, %v7486_v14   ;;  %3704 = vperm.xlu0 %5205, %v7504_v50  }
 0x7ff   : > { %v7638_v44 = vpop.permute.xlu1 %3840 }
 0x800   : > { %3699 = vperm.xlu1 %5206, %v7494_v63   ;;  %3777 = vrot.lane.b32.xlu0 %v3750_v42, %s5254_s22  ;;  %v3857_v14 = vmul.f32 0.0, %v7638_v44  ;;  %v4540_v63 = vld [vmem:[%s8358_s2 + $0x8] sm:$0xff] }
 0x801   : > { %5208 = vset.pattern.permute.xlu0 %v8491_v7 }
 0x804   : > { %v7648_v13 = vpop.permute.xlu1 %3936  ;;  %3889 = vrot.lane.b32.xlu0 %v3860_v10, %s5255_s23  ;;  %3771 = vrot.lane.b32.xlu1 %v3747_v49, %s5254_s22 }
 0x805   : > { %5207 = vset.pattern.permute.xlu1 %v8491_v7 }
 0x808   : > { %v7656_v50 = vpop.permute.xlu1 %3940  ;;  %3883 = vrot.lane.b32.xlu1 %v3857_v14, %s5255_s23  ;;  %4550 = vperm.xlu0 %5208, %v4540_v63  }
 0x80c   : > { %4545 = vperm.xlu1 %5207, %v4539_v35  }
 0x80d   : > { %v7662_v33 = vpop.permute.xlu1 %4152 }
 0x812   : > { %v7664_v60 = vpop.permute.xlu1 %3740 }
 0x813   : > { %v3753_v31 = vmul.f32 0.0, %v7664_v60 }
 0x815   : > { %3783 = vrot.lane.b32.xlu1 %v3753_v31, %s5254_s22 }
 0x88a   : > { %v3632_v21 = vpop.f32.mrb[0].mxu0 }
 0x88b   : > { %v3633_v11 = vadd.f32 %v3632_v21, %v7555_v24  ;;  %v3634_v48 = vpop.f32.mrb[1].mxu0 }
 0x88c   : > { %v3635_v34 = vadd.f32 %v3634_v48, %v7555_v24  ;;  %v3636_v58 = vpop.f32.mrb[2].mxu0 }
 0x88d   : > { %v7670_v56 = vmax.f32 %v3633_v11, 0.0  ;;  %v3637_v43 = vadd.f32 %v3636_v58, %v7567_v59  ;;  %v3638_v20 = vpop.f32.mrb[3].mxu0 }
 0x88e   : > { %v3639_v27 = vadd.f32 %v3638_v20, %v7567_v59  ;;  %v7680_v12 = vmax.f32 %v3635_v34, 0.0 }
 0x88f   : > { %v7674_v47 = vmax.f32 %v3637_v43, 0.0  ;;  %v4203_v19 = vmul.f32 %v7576_v55, %v7670_v56  ;;  %v3991_v32 = vmul.f32 %v7572_v41, %v7670_v56  ;;  %v4067_v16 = vmul.f32 %v7597_v1, %v7670_v56  ;;  %v7740_v43 = vpop.permute.xlu1 %3848 }
 0x890   : > { %v7682_v23 = vmax.f32 %v3639_v27, 0.0  ;;  %v3748_v37 = vmul.f32 %v7640_v38, %v7670_v56  ;;  %v3855_v31 = vmul.f32 %v7638_v44, %v7670_v56  ;;  %v3749_v11 = vmul.f32 %v7640_v38, %v7680_v12  ;;  %v7750_v27 = vpop.permute.xlu0 %3744 }
 0x891   : > { %4227 = vrot.lane.b32.xlu0 %v4203_v19, %s5254_s22  ;;  %4007 = vrot.lane.b32.xlu1 %v3991_v32, %s5254_s22  ;;  %v3659_v24 = vpack.c.bf16 %v7674_v47, %v7670_v56  ;;  %v3992_v48 = vmul.f32 %v7572_v41, %v7680_v12  ;;  %v3856_v34 = vmul.f32 %v7638_v44, %v7680_v12 }
 0x892   : > { %v3642_v59 = vpop.f32.mrb[4].mxu0  ;;  %v3660_v54 = vpack.c.bf16 %v7682_v23, %v7680_v12  ;;  %v4204_v58 = vmul.f32 %v7576_v55, %v7680_v12  ;;  %v3993_v38 = vmul.f32 %v7579_v57, %v7674_v47  ;;  %v4068_v41 = vmul.f32 %v7597_v1, %v7680_v12 }
 0x893   : > { %v3643_v62 = vadd.f32 %v3642_v59, %v7565_v5  ;;  %v3644_v28 = vpop.f32.mrb[5].mxu0  ;;  %v3858_v44 = vmul.f32 %v7631_v17, %v7674_v47  ;;  %v4300_v55 = vmul.f32 %v7595_v45, %v7680_v12  ;;  %v4207_v20 = vmul.f32 %v7582_v36, %v7682_v23  ;;  %v7752_v19 = vpop.permute.xlu1 %3852 }
 0x894   : > { %v3645_v4 = vadd.f32 %v3644_v28, %v7565_v5  ;;  %v3646_v26 = vpop.f32.mrb[6].mxu0  ;;  %4765 = vmatprep.subr.bf16.mxu0 %v3660_v54  ;;  %v4299_v5 = vmul.f32 %v7595_v45, %v7670_v56  ;;  %v4206_v1 = vmul.f32 %v7582_v36, %v7674_v47  ;;  %v4071_v45 = vmul.f32 %v7588_v6, %v7682_v23  ;;  %v7764_v59 = vpop.permute.xlu0 %3944 }
 0x895   : > { %v3647_v42 = vadd.f32 %v3646_v26, %v7574_v30  ;;  %v3648_v10 = vpop.f32.mrb[7].mxu0  ;;  %4766 = vmatpush1.bf16.msra.mxu0 %v3659_v24  ;;  %4091 = vrot.lane.b32.xlu0 %v4067_v16, %s5255_s23  ;;  %v7700_v7 = vmax.f32 %v3643_v62, 0.0  ;;  %v4070_v32 = vmul.f32 %v7588_v6, %v7674_v47  ;;  %v4303_v36 = vmul.f32 %v7585_v18, %v7682_v23 }
 0x896   : > { %v3649_v49 = vadd.f32 %v3648_v10, %v7574_v30  ;;  %3773 = vrot.lane.b32.xlu1 %v3748_v37, %s5254_s22  ;;  %v7706_v63 = vmax.f32 %v3645_v4, 0.0  ;;  %v4302_v24 = vmul.f32 %v7585_v18, %v7674_v47  ;;  %v3752_v6 = vmul.f32 %v7633_v29, %v7682_v23 }
 0x897   : > { %v7702_v14 = vmax.f32 %v3647_v42, 0.0  ;;  %v7766_v54 = vpop.permute.xlu1 %3948  ;;  %v3751_v62 = vmul.f32 %v7633_v29, %v7674_v47  ;;  %v3995_v16 = vmul.f32 %v7602_v51, %v7700_v7  ;;  %v3994_v4 = vmul.f32 %v7579_v57, %v7682_v23 }
 0x898   : > { %v7708_v35 = vmax.f32 %v3649_v49, 0.0  ;;  %v7776_v28 = vpop.permute.xlu0 %4148  ;;  %v4209_v29 = vmul.f32 %v7591_v0, %v7700_v7  ;;  %v3859_v26 = vmul.f32 %v7631_v17, %v7682_v23  ;;  %v4073_v57 = vmul.f32 %v7617_v15, %v7700_v7 }
 0x899   : > { %4323 = vrot.lane.b32.xlu0 %v4299_v5, %s5255_s23  ;;  %v3661_v30 = vpack.c.bf16 %v7702_v14, %v7700_v7  ;;  %v3754_v10 = vmul.f32 %v7664_v60, %v7700_v7  ;;  %v4305_v5 = vmul.f32 %v7622_v52, %v7700_v7 }
 0x89a   : > { %3879 = vrot.lane.b32.xlu1 %v3855_v31, %s5255_s23  ;;  %v3662_v21 = vpack.c.bf16 %v7708_v35, %v7706_v63  ;;  %v3996_v31 = vmul.f32 %v7602_v51, %v7706_v63  ;;  %v3997_v51 = vmul.f32 %v7606_v53, %v7702_v14 }
 0x89b   : > { %v7778_v18 = vpop.permute.xlu1 %4156 }
 0x89c   : > { %4767 = vmatprep.subr.bf16.mxu0 %v3662_v21  ;;  %v7790_v37 = vpop.permute.xlu0 %4160  ;;  %v4210_v21 = vmul.f32 %v7591_v0, %v7706_v63 }
 0x89d   : > { %4768 = vmatpush1.bf16.msra.mxu0 %v3661_v30  ;;  %3775 = vrot.lane.b32.xlu0 %v3749_v11, %s5254_s22  ;;  %v3755_v30 = vmul.f32 %v7664_v60, %v7706_v63 }
 0x89e   : > { %4009 = vrot.lane.b32.xlu1 %v3992_v48, %s5254_s22 }
 0x89f   : > { %v7792_v42 = vpop.permute.xlu1 %4237 }
 0x8a0   : > { %v7802_v49 = vpop.permute.xlu0 %4231 }
 0x8a1   : > { %3881 = vrot.lane.b32.xlu0 %v3856_v34, %s5255_s23  ;;  %v4074_v34 = vmul.f32 %v7617_v15, %v7706_v63  ;;  %v4213_v15 = vmul.f32 %v7610_v3, %v7708_v35 }
 0x8a2   : > { %4229 = vrot.lane.b32.xlu1 %v4204_v58, %s5254_s22  ;;  %v3861_v58 = vmul.f32 %v7740_v43, %v7700_v7 }
 0x8a3   : > { %v7804_v17 = vpop.permute.xlu1 %4101 }
 0x8a4   : > { %v7816_v11 = vpop.permute.xlu0 %4095 }
 0x8a5   : > { %4011 = vrot.lane.b32.xlu0 %v3993_v38, %s5254_s22  ;;  %v4306_v38 = vmul.f32 %v7622_v52, %v7706_v63  ;;  %v4077_v52 = vmul.f32 %v7612_v61, %v7708_v35 }
 0x8a6   : > { %4093 = vrot.lane.b32.xlu1 %v4068_v41, %s5255_s23  ;;  %v4212_v41 = vmul.f32 %v7610_v3, %v7702_v14 }
 0x8a7   : > { %v7818_v48 = vpop.permute.xlu1 %4333 }
 0x8a8   : > { %v7828_v60 = vpop.permute.xlu0 %4327 }
 0x8a9   : > { %3885 = vrot.lane.b32.xlu0 %v3858_v44, %s5255_s23 }
 0x8aa   : > { %4325 = vrot.lane.b32.xlu1 %v4300_v55, %s5255_s23 }
 0x8ab   : > { %v7830_v0 = vpop.permute.xlu1 %4249 }
 0x8ac   : > { %v7842_v44 = vpop.permute.xlu0 %4243 }
 0x8ad   : > { %4235 = vrot.lane.b32.xlu0 %v4207_v20, %s5254_s22  ;;  %v4076_v20 = vmul.f32 %v7612_v61, %v7702_v14  ;;  %v3863_v61 = vmul.f32 0.0, %v7740_v43 }
 0x8ae   : > { %4233 = vrot.lane.b32.xlu1 %v4206_v1, %s5254_s22 }
 0x8af   : > { %v7844_v55 = vpop.permute.xlu1 %4113 }
 0x8b0   : > { %v7854_v1 = vpop.permute.xlu0 %4107 }
 0x8b1   : > { %4099 = vrot.lane.b32.xlu0 %v4071_v45, %s5255_s23  ;;  %v4309_v45 = vmul.f32 %v7626_v25, %v7708_v35 }
 0x8b2   : > { %4097 = vrot.lane.b32.xlu1 %v4070_v32, %s5255_s23  ;;  %v4308_v32 = vmul.f32 %v7626_v25, %v7702_v14  ;;  %v4541_v25 = vld [vmem:[%s8358_s2 + $0x10] sm:$0xff] }
 0x8b3   : > { %v7856_v3 = vpop.permute.xlu1 %4345 }
 0x8b5   : > { %4331 = vrot.lane.b32.xlu0 %v4303_v36, %s5255_s23  ;;  %v3757_v36 = vmul.f32 %v7750_v27, %v7702_v14 }
 0x8b6   : > { %4329 = vrot.lane.b32.xlu1 %v4302_v24, %s5255_s23  ;;  %v7867_v24 = vpop.permute.xlu0 %4339 }
 0x8b9   : > { %3781 = vrot.lane.b32.xlu0 %v3752_v6, %s5254_s22  ;;  %v7869_v6 = vpop.permute.xlu1 %3694 }
 0x8ba   : > { %3779 = vrot.lane.b32.xlu1 %v3751_v62, %s5254_s22  ;;  %v3998_v62 = vmul.f32 %v7606_v53, %v7708_v35  ;;  %v3865_v53 = vmul.f32 %v7752_v19, %v7708_v35 }
 0x8bd   : > { %4015 = vrot.lane.b32.xlu0 %v3995_v16, %s5254_s22  ;;  %v7878_v16 = vpop.permute.xlu1 %3699 }
 0x8be   : > { %4013 = vrot.lane.b32.xlu1 %v3994_v4, %s5254_s22  ;;  %v7881_v4 = vpop.permute.xlu0 %3689 }
 0x8c1   : > { %4239 = vrot.lane.b32.xlu0 %v4209_v29, %s5254_s22  ;;  %v3758_v29 = vmul.f32 %v7750_v27, %v7708_v35 }
 0x8c2   : > { %3887 = vrot.lane.b32.xlu1 %v3859_v26, %s5255_s23  ;;  %v3756_v26 = vmul.f32 0.0, %v7750_v27 }
 0x8c5   : > { %4103 = vrot.lane.b32.xlu0 %v4073_v57, %s5255_s23  ;;  %v7886_v57 = vpop.permute.xlu1 %3771 }
 0x8c6   : > { %3785 = vrot.lane.b32.xlu1 %v3754_v10, %s5254_s22  ;;  %v7890_v10 = vpop.permute.xlu0 %3704 }
 0x8c9   : > { %4335 = vrot.lane.b32.xlu0 %v4305_v5, %s5255_s23  ;;  %v3862_v5 = vmul.f32 %v7740_v43, %v7706_v63  ;;  %v3884_v27 = vpop.permute.xlu1 %3883  ;;  %v4542_v43 = vld [vmem:[%s8358_s2 + $0x18] sm:$0xff] }
 0x8ca   : > { %4017 = vrot.lane.b32.xlu1 %v3996_v31, %s5254_s22  ;;  %v7898_v31 = vpop.permute.xlu0 %3777 }
 0x8cd   : > { %3787 = vrot.lane.b32.xlu0 %v3755_v30, %s5254_s22  ;;  %v3864_v30 = vmul.f32 %v7752_v19, %v7702_v14 }
 0x8ce   : > { %4241 = vrot.lane.b32.xlu1 %v4210_v21, %s5254_s22  ;;  %v7903_v21 = vpop.permute.xlu1 %4545 }
 0x8cf   : > { %8492 = vst [vmem:[#allocation16_spill] sm:$0xff] %v7903_v21  ;;  %v4163_v21 = vmul.f32 0.0, %v7776_v28 }
 0x8d1   : > { %4019 = vrot.lane.b32.xlu0 %v3997_v51, %s5254_s22  ;;  %v3866_v51 = vmul.f32 0.0, %v7752_v19 }
 0x8d2   : > { %4105 = vrot.lane.b32.xlu1 %v4074_v34, %s5255_s23  ;;  %v7906_v34 = vpop.permute.xlu0 %3889 }
 0x8d5   : > { %3891 = vrot.lane.b32.xlu0 %v3861_v58, %s5255_s23 }
 0x8d6   : > { %4337 = vrot.lane.b32.xlu1 %v4306_v38, %s5255_s23  ;;  %v7912_v58 = vpop.permute.xlu0 %4550  ;;  %v7914_v38 = vpop.permute.xlu1 %3783 }
 0x8d7   : > { %8493 = vst [vmem:[#allocation20_spill] sm:$0xff] %v7912_v58 }
 0x8d9   : > { %4247 = vrot.lane.b32.xlu0 %v4213_v15, %s5254_s22 }
 0x8da   : > { %4245 = vrot.lane.b32.xlu1 %v4212_v41, %s5254_s22 }
 0x8dd   : > { %4111 = vrot.lane.b32.xlu0 %v4077_v52, %s5255_s23  ;;  %v3951_v52 = vmul.f32 0.0, %v7648_v13 }
 0x8de   : > { %4109 = vrot.lane.b32.xlu1 %v4076_v20, %s5255_s23 }
 0x8e1   : > { %4343 = vrot.lane.b32.xlu0 %v4309_v45, %s5255_s23 }
 0x8e2   : > { %4341 = vrot.lane.b32.xlu1 %v4308_v32, %s5255_s23 }
 0x8e5   : > { %3895 = vrot.lane.b32.xlu0 %v3863_v61, %s5255_s23 }
 0x8e6   : > { %3791 = vrot.lane.b32.xlu1 %v3757_v36, %s5254_s22 }
 0x8e9   : > { %4555 = vperm.xlu0 %5208, %v4541_v25   ;;  %v3709_v25 = vmul.f32 %v7881_v4, %v7680_v12 }
 0x8ea   : > { %4021 = vrot.lane.b32.xlu1 %v3998_v62, %s5254_s22  ;;  %v3708_v62 = vmul.f32 %v7881_v4, %v7670_v56 }
 0x8ed   : > { %3793 = vrot.lane.b32.xlu0 %v3758_v29, %s5254_s22 }
 0x8ee   : > { %3789 = vrot.lane.b32.xlu1 %v3756_v26, %s5254_s22 }
 0x8f1   : > { %3899 = vrot.lane.b32.xlu0 %v3865_v53, %s5255_s23 }
 0x8f2   : > { %3893 = vrot.lane.b32.xlu1 %v3862_v5, %s5255_s23 }
 0x8f6   : > { %3897 = vrot.lane.b32.xlu1 %v3864_v30, %s5255_s23 }
 0x8fa   : > { %3901 = vrot.lane.b32.xlu1 %v3866_v51, %s5255_s23 }
 0x8fe   : > { %4560 = vperm.xlu1 %5207, %v4542_v43  }
 0x903   : > { %v7916_v15 = vpop.permute.xlu0 %4227  ;;  %v4008_v41 = vpop.permute.xlu1 %4007 }
 0x904   : > { %v4039_v20 = vadd.f32 %v4008_v41, %v3951_v52 }
 0x907   : > { %v4092_v19 = vpop.permute.xlu0 %4091 }
 0x908   : > { %v4135_v45 = vadd.f32 %v4092_v19, %v4039_v20  ;;  %v7919_v32 = vpop.permute.xlu1 %3773 }
 0x90a   : > { %4403 = vrot.lane.b32.xlu0 %v4135_v45, %s5258_s20 }
 0x90b   : > { %v7922_v61 = vpop.permute.xlu0 %4323 }
 0x90c   : > { %v7924_v36 = vpop.permute.xlu1 %3879 }
 0x90d   : > { %8494 = vst [vmem:[#allocation19_spill] sm:$0xff] %v7924_v36 }
 0x90f   : > { %v3776_v29 = vpop.permute.xlu0 %3775 }
 0x910   : > { %v3796_v26 = vsel %vm592_vm1, %v7919_v32, %v3776_v29  ;;  %v3817_v53 = vadd.f32 %v3776_v29, %v3709_v25  ;;  %v4010_v5 = vpop.permute.xlu1 %4009  ;;  %v3952_v25 = vmul.f32 %v7648_v13, %v7670_v56 }
 0x911   : > { %v3816_v30 = vadd.f32 %v3796_v26, %v3708_v62  ;;  %v4023_v45 = vsel %vm592_vm1, %v4008_v41, %v4010_v5  ;;  %v3953_v62 = vmul.f32 %v7648_v13, %v7680_v12  ;;  %v4271_v26 = vadd.f32 %v7916_v15, %v4163_v21 }
 0x912   : > { %v4040_v39 = vadd.f32 %v4023_v45, %v3952_v25 }
 0x913   : > { %v3882_v51 = vpop.permute.xlu0 %3881 }
 0x914   : > { %v3903_v43 = vsel %vm701_vm0, %v7924_v36, %v3882_v51  ;;  %v3904_v52 = vsel %vm701_vm0, %v3882_v51, %v3884_v27  ;;  %v4230_v20 = vpop.permute.xlu1 %4229  ;;  %v4041_v27 = vadd.f32 %v4010_v5, %v3953_v62  ;;  %v4165_v36 = vmul.f32 %v7776_v28, %v7680_v12 }
 0x915   : > { %v7936_v9 = vadd.f32 %v3903_v43, %v3816_v30  ;;  %v7938_v58 = vadd.f32 %v3904_v52, %v3817_v53  ;;  %v4367_v30 = vadd.f32 %v7922_v61, %v4271_v26 }
 0x917   : > { %8495 = vst [vmem:[#allocation24_spill] sm:$0xff] %v7936_v9  ;;  %8496 = vst [vmem:[#allocation15_spill] sm:$0xff] %v7938_v58  ;;  %v4012_v29 = vpop.permute.xlu0 %4011  ;;  %v4459_v21 = vmul.f32 %v4367_v30, %v5732_v8  ;;  %v3710_v30 = vmul.f32 0.0, %v7869_v6 }
 0x918   : > { %v4094_v51 = vpop.permute.xlu1 %4093 }
 0x919   : > { %v4115_v41 = vsel %vm701_vm0, %v4092_v19, %v4094_v51  ;;  %v4116_v53 = vsel %vm701_vm0, %v4094_v51, %v7816_v11  ;;  %v3954_v19 = vmul.f32 0.0, %v7656_v50  ;;  %v3712_v51 = vmul.f32 %v7869_v6, %v7682_v23 }
 0x91a   : > { %v4136_v43 = vadd.f32 %v4115_v41, %v4040_v39  ;;  %v4137_v52 = vadd.f32 %v4116_v53, %v4041_v27 }
 0x91b   : > { %v3886_v9 = vpop.permute.xlu0 %3885  ;;  %v4042_v25 = vadd.f32 %v4012_v29, %v3954_v19 }
 0x91c   : > { %4407 = vrot.lane.b32.xlu1 %v4137_v52, %s5258_s20  ;;  %4405 = vrot.lane.b32.xlu0 %v4136_v43, %s5258_s20  ;;  %v4326_v13 = vpop.permute.xlu1 %4325  ;;  %v3711_v43 = vmul.f32 %v7869_v6, %v7674_v47  ;;  %v3956_v6 = vmul.f32 %v7656_v50, %v7682_v23 }
 0x91f   : > { %v4236_v45 = vpop.permute.xlu0 %4235 }
 0x920   : > { %4483 = vrot.lane.b32.xlu0 %v4459_v21, %s5259_s21  ;;  %v4234_v5 = vpop.permute.xlu1 %4233 }
 0x923   : > { %v4100_v11 = vpop.permute.xlu0 %4099 }
 0x924   : > { %v4098_v62 = vpop.permute.xlu1 %4097 }
 0x925   : > { %v4138_v26 = vadd.f32 %v4098_v62, %v4042_v25  ;;  %v4252_v25 = vsel %vm592_vm1, %v4230_v20, %v7802_v49 }
 0x927   : > { %4409 = vrot.lane.b32.xlu1 %v4138_v26, %s5258_s20  ;;  %v4332_v39 = vpop.permute.xlu0 %4331 }
 0x928   : > { %v4330_v27 = vpop.permute.xlu1 %4329 }
 0x92b   : > { %v3782_v41 = vpop.permute.xlu0 %3781 }
 0x92c   : > { %v3820_v53 = vadd.f32 %v3782_v41, %v3712_v51  ;;  %v3780_v52 = vpop.permute.xlu1 %3779  ;;  %v4251_v51 = vsel %vm592_vm1, %v7916_v15, %v4230_v20  ;;  %v4347_v15 = vsel %vm701_vm0, %v7922_v61, %v4326_v13  ;;  %v4167_v61 = vmul.f32 %v7662_v33, %v7674_v47 }
 0x92d   : > { %v3797_v21 = vsel %vm592_vm1, %v7898_v31, %v3780_v52  ;;  %v3798_v19 = vsel %vm592_vm1, %v3780_v52, %v3782_v41  ;;  %v4164_v31 = vmul.f32 %v7776_v28, %v7670_v56  ;;  %v4348_v41 = vsel %vm701_vm0, %v4326_v13, %v7828_v60 }
 0x92e   : > { %v3818_v26 = vadd.f32 %v3797_v21, %v3710_v30  ;;  %v3819_v22 = vadd.f32 %v3798_v19, %v3711_v43  ;;  %v3955_v30 = vmul.f32 %v7656_v50, %v7674_v47  ;;  %v4273_v43 = vadd.f32 %v4252_v25, %v4165_v36 }
 0x92f   : > { %v7970_v58 = vpop.permute.xlu0 %4015  ;;  %v4272_v21 = vadd.f32 %v4251_v51, %v4164_v31  ;;  %v4166_v19 = vmul.f32 0.0, %v7662_v33  ;;  %v4118_v56 = vsel %vm701_vm0, %v4100_v11, %v7804_v17  ;;  %v4117_v50 = vsel %vm701_vm0, %v4098_v62, %v4100_v11 }
 0x930   : > { %v7978_v49 = vadd.f32 %v3886_v9, %v3818_v26  ;;  %v4014_v12 = vpop.permute.xlu1 %4013  ;;  %v4369_v60 = vadd.f32 %v4348_v41, %v4273_v43  ;;  %v4253_v26 = vsel %vm592_vm1, %v4234_v5, %v4236_v45  ;;  %v4254_v11 = vsel %vm592_vm1, %v4236_v45, %v7792_v42 }
 0x931   : > { %v4024_v20 = vsel %vm592_vm1, %v4012_v29, %v4014_v12  ;;  %v4044_v52 = vadd.f32 %v4014_v12, %v3956_v6  ;;  %v4368_v25 = vadd.f32 %v4347_v15, %v4272_v21  ;;  %v4274_v51 = vadd.f32 %v4234_v5, %v4166_v19 }
 0x932   : > { %8497 = vst [vmem:[#allocation4_spill] sm:$0xff] %v7978_v49  ;;  %v4043_v28 = vadd.f32 %v4024_v20, %v3955_v30  ;;  %v4349_v6 = vsel %vm701_vm0, %v4330_v27, %v4332_v39  ;;  %v4275_v62 = vadd.f32 %v4253_v26, %v4167_v61  ;;  %v4461_v47 = vmul.f32 %v4369_v60, %v5751_v40 }
 0x933   : > { %v4140_v49 = vadd.f32 %v4118_v56, %v4044_v52  ;;  %v7990_v36 = vpop.permute.xlu0 %4239  ;;  %v4370_v5 = vadd.f32 %v4330_v27, %v4274_v51  ;;  %v3714_v21 = vmul.f32 %v7878_v16, %v7700_v7  ;;  %v3959_v61 = vmul.f32 %v7764_v59, %v7706_v63 }
 0x934   : > { %v4139_v29 = vadd.f32 %v4117_v50, %v4043_v28  ;;  %v3888_v13 = vpop.permute.xlu1 %3887  ;;  %v4371_v42 = vadd.f32 %v4349_v6, %v4275_v62  ;;  %v3713_v51 = vmul.f32 0.0, %v7878_v16 }
 0x935   : > { %v3905_v17 = vsel %vm701_vm0, %v3886_v9, %v3888_v13  ;;  %v3906_v31 = vsel %vm701_vm0, %v3888_v13, %v7906_v34  ;;  %4413 = vrot.lane.b32.xlu1 %v4140_v49, %s5258_s20  ;;  %v4168_v9 = vmul.f32 %v7662_v33, %v7682_v23  ;;  %v4460_v34 = vmul.f32 %v4368_v25, %v5758_v46 }
 0x936   : > { %v8001_v41 = vadd.f32 %v3905_v17, %v3819_v22  ;;  %v8003_v30 = vadd.f32 %v3906_v31, %v3820_v53  ;;  %4411 = vrot.lane.b32.xlu0 %v4139_v29, %s5258_s20  ;;  %v4350_v49 = vsel %vm701_vm0, %v4332_v39, %v7818_v48  ;;  %v4462_v43 = vmul.f32 %v4370_v5, %v5732_v8 }
 0x937   : > { %v4104_v12 = vpop.permute.xlu0 %4103  ;;  %v4276_v22 = vadd.f32 %v4254_v11, %v4168_v9  ;;  %v4463_v33 = vmul.f32 %v4371_v42, %v5758_v46  ;;  %v3957_v23 = vmul.f32 0.0, %v7764_v59  ;;  %v3715_v39 = vmul.f32 %v7878_v16, %v7706_v63 }
 0x938   : > { %v3786_v45 = vpop.permute.xlu1 %3785  ;;  %v3958_v25 = vmul.f32 %v7764_v59, %v7700_v7 }
 0x939   : > { %4487 = vrot.lane.b32.xlu1 %v4461_v47, %s5259_s21  ;;  %v4372_v53 = vadd.f32 %v4350_v49, %v4276_v22  ;;  %v4045_v48 = vadd.f32 %v7970_v58, %v3957_v23  ;;  %v3799_v29 = vsel %vm592_vm1, %v7914_v38, %v3786_v45 }
 0x93a   : > { %4485 = vrot.lane.b32.xlu0 %v4460_v34, %s5259_s21  ;;  %v3821_v62 = vadd.f32 %v3799_v29, %v3713_v51  ;;  %v3960_v34 = vmul.f32 0.0, %v7766_v54 }
 0x93b   : > { %v8015_v15 = vpop.permute.xlu0 %4335  ;;  %v4464_v20 = vmul.f32 %v4372_v53, %v5751_v40  ;;  %v4141_v19 = vadd.f32 %v4104_v12, %v4045_v48  ;;  %v4170_v48 = vmul.f32 %v7778_v18, %v7700_v7 }
 0x93c   : > { %v4018_v27 = vpop.permute.xlu1 %4017 }
 0x93d   : > { %4489 = vrot.lane.b32.xlu1 %v4462_v43, %s5259_s21  ;;  %v4025_v26 = vsel %vm592_vm1, %v7970_v58, %v4018_v27  ;;  %v4047_v58 = vadd.f32 %v4018_v27, %v3959_v61  ;;  %v3962_v27 = vmul.f32 %v7766_v54, %v7708_v35 }
 0x93e   : > { %4491 = vrot.lane.b32.xlu0 %v4463_v33, %s5259_s21  ;;  %v4046_v6 = vadd.f32 %v4025_v26, %v3958_v25  ;;  %v4171_v33 = vmul.f32 %v7778_v18, %v7706_v63 }
 0x93f   : > { %v3788_v52 = vpop.permute.xlu0 %3787 }
 0x940   : > { %v3800_v56 = vsel %vm592_vm1, %v3786_v45, %v3788_v52  ;;  %v8028_v28 = vadd.f32 %v3788_v52, %v3715_v39  ;;  %v4242_v60 = vpop.permute.xlu1 %4241 }
 0x941   : > { %v8032_v50 = vadd.f32 %v3800_v56, %v3714_v21  ;;  %4493 = vrot.lane.b32.xlu1 %v4464_v20, %s5259_s21  ;;  %v4256_v43 = vsel %vm592_vm1, %v4242_v60, %v7842_v44  ;;  %v4255_v23 = vsel %vm592_vm1, %v7990_v36, %v4242_v60  ;;  %v4174_v20 = vmul.f32 %v7790_v37, %v7708_v35 }
 0x942   : > { %4415 = vrot.lane.b32.xlu0 %v4141_v19, %s5258_s20  ;;  %v3961_v44 = vmul.f32 %v7766_v54, %v7702_v14  ;;  %v4279_v63 = vadd.f32 %v4256_v43, %v4171_v33  ;;  %v4278_v26 = vadd.f32 %v4255_v23, %v4170_v48 }
 0x943   : > { %v4020_v13 = vpop.permute.xlu0 %4019 }
 0x944   : > { %v4106_v17 = vpop.permute.xlu1 %4105  ;;  %v4048_v49 = vadd.f32 %v4020_v13, %v3960_v34 }
 0x945   : > { %v4119_v31 = vsel %vm701_vm0, %v4104_v12, %v4106_v17  ;;  %v4120_v11 = vsel %vm701_vm0, %v4106_v17, %v7854_v1 }
 0x946   : > { %v4142_v47 = vadd.f32 %v4119_v31, %v4046_v6  ;;  %v4143_v9 = vadd.f32 %v4120_v11, %v4047_v58  ;;  %v4173_v58 = vmul.f32 %v7790_v37, %v7702_v14 }
 0x947   : > { %v3892_v59 = vpop.permute.xlu0 %3891 }
 0x948   : > { %v8046_v5 = vadd.f32 %v3892_v59, %v3821_v62  ;;  %4419 = vrot.lane.b32.xlu1 %v4143_v9, %s5258_s20  ;;  %4417 = vrot.lane.b32.xlu0 %v4142_v47, %s5258_s20  ;;  %v4338_v38 = vpop.permute.xlu1 %4337  ;;  %v4172_v9 = vmul.f32 0.0, %v7790_v37 }
 0x949   : > { %v4352_v39 = vsel %vm701_vm0, %v4338_v38, %v7867_v24  ;;  %v4351_v21 = vsel %vm701_vm0, %v8015_v15, %v4338_v38 }
 0x94a   : > { %v4375_v61 = vadd.f32 %v4352_v39, %v4279_v63  ;;  %v4374_v6 = vadd.f32 %v4351_v21, %v4278_v26 }
 0x94b   : > { %v4248_v12 = vpop.permute.xlu0 %4247 }
 0x94c   : > { %v4246_v16 = vpop.permute.xlu1 %4245  ;;  %v4258_v7 = vsel %vm592_vm1, %v4248_v12, %v7830_v0  ;;  %v4467_v47 = vmul.f32 %v4375_v61, %v5751_v40  ;;  %v4466_v34 = vmul.f32 %v4374_v6, %v5758_v46  ;;  %v3707_v61 = vmul.f32 0.0, %v7881_v4  ;;  %v8498_v6 = vld [vmem:[#allocation15_spill] sm:$0xff] }
 0x94d   : > { %v4257_v54 = vsel %vm592_vm1, %v4246_v16, %v4248_v12  ;;  %v4282_v0 = vadd.f32 %v4258_v7, %v4174_v20 }
 0x94e   : > { %v4281_v62 = vadd.f32 %v4257_v54, %v4173_v58  ;;  %v4381_v58 = vmul.f32 %v8498_v6, %v8466_v2 }
 0x94f   : > { %v4112_v22 = vpop.permute.xlu0 %4111 }
 0x950   : > { %v4110_v42 = vpop.permute.xlu1 %4109  ;;  %v4122_v24 = vsel %vm701_vm0, %v4112_v22, %v7844_v55 }
 0x951   : > { %v4144_v45 = vadd.f32 %v4110_v42, %v4048_v49  ;;  %v4121_v29 = vsel %vm701_vm0, %v4110_v42, %v4112_v22  ;;  %v3716_v22 = vmul.f32 0.0, %v7890_v10 }
 0x953   : > { %4421 = vrot.lane.b32.xlu1 %v4144_v45, %s5258_s20  ;;  %v4344_v19 = vpop.permute.xlu0 %4343  ;;  %v4280_v45 = vadd.f32 %v4246_v16, %v4172_v9 }
 0x954   : > { %v4342_v1 = vpop.permute.xlu1 %4341 }
 0x955   : > { %v4353_v11 = vsel %vm701_vm0, %v4342_v1, %v4344_v19 }
 0x956   : > { %v4377_v49 = vadd.f32 %v4353_v11, %v4281_v62  ;;  %v8501_v11 = vld [vmem:[#allocation24_spill] sm:$0xff]  ;;  %v4384_v62 = vmul.f32 %v8003_v30, %v8466_v2 }
 0x957   : > { %v3896_v42 = vpop.permute.xlu0 %3895 }
 0x958   : > { %v8052_v53 = vpop.permute.xlu1 %3791  ;;  %v4469_v39 = vmul.f32 %v4377_v49, %v5758_v46  ;;  %v8503_v49 = vld [vmem:[#allocation4_spill] sm:$0xff] }
 0x95c   : > { %v4022_v52 = vpop.permute.xlu1 %4021 }
 0x95d   : > { %v4026_v56 = vsel %vm592_vm1, %v4020_v13, %v4022_v52  ;;  %v4050_v60 = vadd.f32 %v4022_v52, %v3962_v27  ;;  %v4354_v13 = vsel %vm701_vm0, %v4344_v19, %v7856_v3  ;;  %v4169_v3 = vmul.f32 0.0, %v7778_v18 }
 0x95e   : > { %v4049_v25 = vadd.f32 %v4026_v56, %v3961_v44  ;;  %v4378_v38 = vadd.f32 %v4354_v13, %v4282_v0  ;;  %v4376_v27 = vadd.f32 %v4342_v1, %v4280_v45  ;;  %v8500_v0 = vld [vmem:[#allocation6_spill] sm:$0xff] }
 0x95f   : > { %v4146_v51 = vadd.f32 %v4122_v24, %v4050_v60  ;;  %v4277_v23 = vadd.f32 %v7990_v36, %v4169_v3  ;;  %v3795_v24 = vsel %vm592_vm1, %v7886_v57, %v7919_v32 }
 0x960   : > { %v4145_v17 = vadd.f32 %v4121_v29, %v4049_v25  ;;  %v3790_v31 = vpop.permute.xlu1 %3789  ;;  %v4470_v16 = vmul.f32 %v4378_v38, %v5751_v40  ;;  %v3717_v40 = vmul.f32 %v7890_v10, %v7702_v14  ;;  %v3815_v54 = vadd.f32 %v3795_v24, %v3707_v61 }
 0x961   : > { %v3801_v55 = vsel %vm592_vm1, %v3790_v31, %v8052_v53  ;;  %4425 = vrot.lane.b32.xlu1 %v4146_v51, %s5258_s20 }
 0x962   : > { %4423 = vrot.lane.b32.xlu0 %v4145_v17, %s5258_s20  ;;  %v3824_v48 = vadd.f32 %v3801_v55, %v3716_v22  ;;  %v8499_v17 = vld [vmem:[#allocation19_spill] sm:$0xff]  ;;  %v4380_v55 = vmul.f32 %v8501_v11, %v8500_v0 }
 0x963   : > { %v3923_v31 = vadd.f32 %v8499_v17, %v3815_v54 }
 0x964   : > { %v3894_v12 = vpop.permute.xlu1 %3893 }
 0x965   : > { %v3907_v43 = vsel %vm701_vm0, %v3892_v59, %v3894_v12  ;;  %v3908_v33 = vsel %vm701_vm0, %v3894_v12, %v3896_v42  ;;  %4499 = vrot.lane.b32.xlu1 %v4467_v47, %s5259_s21  ;;  %v4373_v59 = vadd.f32 %v8015_v15, %v4277_v23  ;;  %v4383_v12 = vmul.f32 %v8001_v41, %v8500_v0 }
 0x966   : > { %v8098_v37 = vadd.f32 %v3907_v43, %v8032_v50  ;;  %v8101_v18 = vadd.f32 %v3908_v33, %v8028_v28  ;;  %4497 = vrot.lane.b32.xlu0 %v4466_v34, %s5259_s21  ;;  %v4468_v28 = vmul.f32 %v4376_v27, %v5732_v8  ;;  %v8502_v34 = vld [vmem:[#allocation5_spill] sm:$0xff] }
 0x967   : > { %v4465_v50 = vmul.f32 %v4373_v59, %v5732_v8  ;;  %v4382_v42 = vmul.f32 %v8503_v49, %v8502_v34  ;;  %v4379_v33 = vmul.f32 %v3923_v31, %v8502_v34 }
 0x968   : > { %v3898_v20 = vpop.permute.xlu1 %3897  ;;  %v8107_v44 = vpop.permute.xlu0 %4555 }
 0x969   : > { %v8109_v36 = vadd.f32 %v3898_v20, %v3824_v48  ;;  %4505 = vrot.lane.b32.xlu1 %v4470_v16, %s5259_s21 }
 0x96a   : > { %4503 = vrot.lane.b32.xlu0 %v4469_v39, %s5259_s21 }
 0x96c   : > { %v8117_v1 = vpop.permute.xlu0 %3793  ;;  %v3902_v21 = vpop.permute.xlu1 %3901 }
 0x96d   : > { %v3802_v46 = vsel %vm592_vm1, %v8052_v53, %v8117_v1  ;;  %4501 = vrot.lane.b32.xlu1 %v4468_v28, %s5259_s21 }
 0x96e   : > { %v3825_v15 = vadd.f32 %v3802_v46, %v3717_v40  ;;  %4495 = vrot.lane.b32.xlu0 %v4465_v50, %s5259_s21  ;;  %v8504_v40 = vld [vmem:[#allocation16_spill] sm:$0xff] }
 0x970   : > { %v8124_v52 = vpop.permute.xlu0 %3899 }
 0x971   : > { %v3909_v63 = vsel %vm701_vm0, %v3898_v20, %v8124_v52 }
 0x972   : > { %v8128_v8 = vadd.f32 %v3909_v63, %v3825_v15  ;;  %v8505_v15 = vld [vmem:[#allocation20_spill] sm:$0xff] }
 0x97c   : > { %v4404_v14 = vpop.permute.xlu0 %4403 }
 0x97d   : > { %v8130_v19 = vpop.permute.xlu1 %4560 }
 0x98e   : > { %v4406_v56 = vpop.permute.xlu0 %4405  ;;  %v4408_v60 = vpop.permute.xlu1 %4407 }
 0x98f   : > { %v4428_v13 = vsel %vm1244_vm4, %v4406_v56, %v4408_v60  ;;  %v4449_v32 = vadd.f32 %v4408_v60, %v4381_v58  ;;  %v4427_v45 = vsel %vm1244_vm4, %v4404_v14, %v4406_v56  ;;  %v3910_v58 = vsel %vm701_vm0, %v8124_v52, %v3902_v21 }
 0x990   : > { %v4448_v3 = vadd.f32 %v4428_v13, %v4380_v55  ;;  %v4447_v28 = vadd.f32 %v4427_v45, %v4379_v33  ;;  %v4387_v55 = vmul.f32 %v8101_v18, %v8466_v2  ;;  %v4385_v45 = vmul.f32 %v8046_v5, %v8502_v34 }
 0x992   : > { %v4484_v53 = vpop.permute.xlu0 %4483 }
 0x999   : > { %v4410_v26 = vpop.permute.xlu1 %4409 }
 0x9a7   : > { %v4414_v7 = vpop.permute.xlu1 %4413 }
 0x9a8   : > { %v4412_v25 = vpop.permute.xlu0 %4411  ;;  %v4452_v22 = vadd.f32 %v4414_v7, %v4384_v62 }
 0x9a9   : > { %v4429_v4 = vsel %vm1244_vm4, %v4410_v26, %v4412_v25  ;;  %v4430_v47 = vsel %vm1244_vm4, %v4412_v25, %v4414_v7 }
 0x9aa   : > { %v4450_v23 = vadd.f32 %v4429_v4, %v4382_v42  ;;  %v4451_v16 = vadd.f32 %v4430_v47, %v4383_v12 }
 0x9ab   : > { %v4488_v29 = vpop.permute.xlu1 %4487 }
 0x9ac   : > { %v4486_v51 = vpop.permute.xlu0 %4485  ;;  %v4529_v30 = vadd.f32 %v4488_v29, %v4449_v32  ;;  %v4386_v32 = vmul.f32 %v8098_v37, %v8500_v0 }
 0x9ad   : > { %v4508_v9 = vsel %vm1343_vm5, %v4486_v51, %v4488_v29  ;;  %v4507_v59 = vsel %vm1343_vm5, %v4484_v53, %v4486_v51  ;;  %v3718_v51 = vmul.f32 %v7890_v10, %v7708_v35 }
 0x9ae   : > { %v4528_v27 = vadd.f32 %v4508_v9, %v4448_v3  ;;  %v4565_v46 = vadd.f32 %v8504_v40, %v4529_v30  ;;  %v4527_v14 = vadd.f32 %v4507_v59, %v4447_v28  ;;  %v4389_v9 = vmul.f32 %v8128_v8, %v8500_v0 }
 0x9af   : > { %v4490_v57 = vpop.permute.xlu1 %4489  ;;  %v3826_v13 = vadd.f32 %v8117_v1, %v3718_v51  ;;  %v5218_v51 = vld [vmem:[%s8359_s3 + $0x38] sm:$0xff]  }
 0x9b0   : > { %v4492_v38 = vpop.permute.xlu0 %4491  ;;  %v4564_v56 = vadd.f32 %v8504_v40, %v4528_v27  ;;  %v4563_v53 = vadd.f32 %v8504_v40, %v4527_v14 }
 0x9b1   : > { %v4509_v43 = vsel %vm1343_vm5, %v4490_v57, %v4492_v38  ;;  %v3934_v31 = vadd.f32 %v3910_v58, %v3826_v13  ;;  %v4722_v58 = vld [vmem:[%s8362_s6 + $0x8] sm:$0xff]  ;;  %v4723_v13 = vld [vmem:[%s8362_s6 + $0x10] sm:$0xff] }
 0x9b2   : > { %v4530_v50 = vadd.f32 %v4509_v43, %v4450_v23 }
 0x9b3   : > { %v4494_v48 = vpop.permute.xlu1 %4493  ;;  %v4390_v35 = vmul.f32 %v3934_v31, %v8466_v2 }
 0x9b4   : > { %v4510_v39 = vsel %vm1343_vm5, %v4492_v38, %v4494_v48  ;;  %v4532_v20 = vadd.f32 %v4494_v48, %v4452_v22  ;;  %v4566_v7 = vadd.f32 %v8505_v15, %v4530_v50  ;;  %v4416_v54 = vpop.permute.xlu0 %4415  ;;  %v4388_v22 = vmul.f32 %v8109_v36, %v8502_v34 }
 0x9b5   : > { %v4531_v41 = vadd.f32 %v4510_v39, %v4451_v16 }
 0x9b6   : > { %v4568_v63 = vadd.f32 %v8505_v15, %v4532_v20  ;;  %v4580_v25 = vpack.c.bf16 %v4566_v7, %v4563_v53 }
 0x9b7   : > { %v4567_v60 = vadd.f32 %v8505_v15, %v4531_v41  ;;  %v4586_v41 = vld [vmem:[%s8360_s4] sm:$0xff]  ;;  %v4588_v15 = vld [vmem:[%s8360_s4 + $0x10] sm:$0xff] }
 0x9b8   : > { %v4582_v26 = vpack.c.bf16 %v4568_v63, %v4565_v46  ;;  %v8506_v63 = vmov 0  }
 0x9b9   : > { %v4581_v24 = vpack.c.bf16 %v4567_v60, %v4564_v56 }
 0x9ba   : > { %4630 = vrot.lane.b32.xlu1 %v4582_v26, %s5260_s30  ;;  %v4420_v61 = vpop.permute.xlu1 %4419  ;;  %v4418_v6 = vpop.permute.xlu0 %4417 }
 0x9bb   : > { %4628 = vrot.lane.b32.xlu0 %v4581_v24, %s5260_s30  ;;  %v4432_v62 = vsel %vm1244_vm4, %v4418_v6, %v4420_v61  ;;  %v4455_v4 = vadd.f32 %v4420_v61, %v4387_v55  ;;  %v4431_v38 = vsel %vm1244_vm4, %v4416_v54, %v4418_v6  ;;  %v4721_v6 = vld [vmem:[%s8362_s6] sm:$0xff] }
 0x9bc   : > { %v4454_v21 = vadd.f32 %v4432_v62, %v4386_v32  ;;  %v4453_v33 = vadd.f32 %v4431_v38, %v4385_v45 }
 0x9bf   : > { %4626 = vrot.lane.b32.xlu0 %v4580_v25, %s5260_s30 }
 0x9c5   : > { %v4422_v29 = vpop.permute.xlu1 %4421 }
 0x9d3   : > { %v4426_v17 = vpop.permute.xlu1 %4425 }
 0x9d4   : > { %v4424_v11 = vpop.permute.xlu0 %4423  ;;  %v4458_v47 = vadd.f32 %v4426_v17, %v4390_v35 }
 0x9d5   : > { %v4434_v52 = vsel %vm1244_vm4, %v4424_v11, %v4426_v17  ;;  %v4433_v49 = vsel %vm1244_vm4, %v4422_v29, %v4424_v11  ;;  %v5217_v29 = vld [vmem:[%s8359_s3 + $0x30] sm:$0xff]   ;;  %v4724_v17 = vld [vmem:[%s8362_s6 + $0x18] sm:$0xff] }
 0x9d6   : > { %v4457_v37 = vadd.f32 %v4434_v52, %v4389_v9  ;;  %v4456_v23 = vadd.f32 %v4433_v49, %v4388_v22 }
 0x9d7   : > { %v4500_v57 = vpop.permute.xlu1 %4499 }
 0x9d8   : > { %v4498_v10 = vpop.permute.xlu0 %4497  ;;  %v4535_v18 = vadd.f32 %v4500_v57, %v4455_v4 }
 0x9d9   : > { %v4512_v1 = vsel %vm1343_vm5, %v4498_v10, %v4500_v57 }
 0x9da   : > { %v4534_v42 = vadd.f32 %v4512_v1, %v4454_v21  ;;  %v4571_v8 = vadd.f32 %v8107_v44, %v4535_v18 }
 0x9db   : > { %v4506_v3 = vpop.permute.xlu1 %4505 }
 0x9dc   : > { %v4538_v12 = vadd.f32 %v4506_v3, %v4458_v47  ;;  %v4504_v2 = vpop.permute.xlu0 %4503  ;;  %v4570_v27 = vadd.f32 %v8107_v44, %v4534_v42 }
 0x9dd   : > { %v4514_v30 = vsel %vm1343_vm5, %v4504_v2, %v4506_v3 }
 0x9de   : > { %v4574_v0 = vadd.f32 %v8130_v19, %v4538_v12  ;;  %v4537_v43 = vadd.f32 %v4514_v30, %v4457_v37 }
 0x9df   : > { %v4502_v16 = vpop.permute.xlu1 %4501 }
 0x9e0   : > { %v4585_v48 = vpack.c.bf16 %v4574_v0, %v4571_v8  ;;  %v4573_v59 = vadd.f32 %v8130_v19, %v4537_v43  ;;  %v4513_v5 = vsel %vm1343_vm5, %v4502_v16, %v4504_v2  ;;  %v4496_v39 = vpop.permute.xlu0 %4495 }
 0x9e1   : > { %v4536_v20 = vadd.f32 %v4513_v5, %v4456_v23  ;;  %v4511_v36 = vsel %vm1343_vm5, %v4496_v39, %v4498_v10 }
 0x9e2   : > { %v4584_v34 = vpack.c.bf16 %v4573_v59, %v4570_v27  ;;  %v4533_v28 = vadd.f32 %v4511_v36, %v4453_v33  ;;  %4636 = vrot.lane.b32.xlu0 %v4585_v48, %s5260_s30  ;;  %v5219_v48 = vld [vmem:[%s8361_s5] sm:$0xff]   ;;  %v5220_v59 = vld [vmem:[%s8361_s5 + $0x8] sm:$0xff]  }
 0x9e3   : > { %v4572_v50 = vadd.f32 %v8130_v19, %v4536_v20  ;;  %v4587_v19 = vld [vmem:[%s8360_s4 + $0x8] sm:$0xff] }
 0x9e4   : > { %v4569_v40 = vadd.f32 %v8107_v44, %v4533_v28  ;;  %4634 = vrot.lane.b32.xlu1 %v4584_v34, %s5260_s30  ;;  %v4589_v44 = vld [vmem:[%s8360_s4 + $0x18] sm:$0xff] }
 0x9e6   : > { %v4583_v46 = vpack.c.bf16 %v4572_v50, %v4569_v40  ;;  %4592 = vperm.xlu0 %5208, %v4586_v41  }
 0x9e8   : > { %4632 = vrot.lane.b32.xlu1 %v4583_v46, %s5260_s30 }
 0x9ea   : > { %4602 = vperm.xlu0 %5208, %v4588_v15  }
 0x9ec   : > { %4597 = vperm.xlu1 %5207, %v4587_v19  }
 0x9ee   : > { %5209 = vset.pattern.permute.xlu0 %v8506_v63 }
 0x9ef   : > { %4727 = vperm.xlu0 %5209, %v4721_v6  }
 0x9f0   : > { %4607 = vperm.xlu1 %5207, %v4589_v44  }
 0x9f3   : > { %4742 = vperm.xlu0 %5209, %v4724_v17  }
 0x9f4   : > { %5210 = vset.pattern.permute.xlu1 %v8506_v63 }
 0x9f5   : > { %4732 = vperm.xlu1 %5210, %v4722_v58  }
 0x9f9   : > { %4737 = vperm.xlu1 %5210, %v4723_v13  }
 0xa2c   : > { %v4631_v14 = vpop.permute.xlu1 %4630 }
 0xa2d   : > { %v4629_v56 = vpop.permute.xlu0 %4628 }
 0xa2e   : > { %v4639_v60 = vsel %vm1474_vm6, %v4629_v56, %v4631_v14 }
 0xa2f   : > { %4652 = vmatprep.subr.bf16.mxu1 %v4639_v60 }
 0xa31   : > { %v4627_v26 = vpop.permute.xlu0 %4626 }
 0xa32   : > { %v4638_v7 = vsel %vm1474_vm6, %v4627_v26, %v4629_v56 }
 0xa33   : > { %4653 = vmatpush1.bf16.msra.mxu1 %v4638_v7 }
 0xa54   : > { %v4637_v24 = vpop.permute.xlu0 %4636 }
 0xa56   : > { %v4635_v53 = vpop.permute.xlu1 %4634 }
 0xa57   : > { %v4641_v25 = vsel %vm1474_vm6, %v4635_v53, %v4637_v24 }
 0xa58   : > { %4654 = vmatprep.subr.bf16.mxu1 %v4641_v25 }
 0xa5a   : > { %v4633_v61 = vpop.permute.xlu1 %4632 }
 0xa5b   : > { %v4640_v54 = vsel %vm1474_vm6, %v4633_v61, %v4635_v53 }
 0xa5c   : > { %4655 = vmatpush1.bf16.msra.mxu1 %v4640_v54 }
 0xa5f   : > { %5041 = vmatmul.mubr.msk.bf16.vlgmr.msra.gmra.mrb[16].mxu1 %vm1483_vm7, %v5217_v29 }
 0xa60   : > { %4694 = vmatprep.mubr.bf16.mxu1 %v8506_v63 }
 0xa65   : > { %v4593_v31 = vpop.permute.xlu0 %4592 }
 0xa67   : > { %5042 = vmatmul.mubr.msk.bf16.gmra.mrb[20].mxu1 %vm1483_vm7, %v5218_v51 }
 0xa69   : > { %v4603_v38 = vpop.permute.xlu0 %4602 }
 0xa6b   : > { %v4598_v57 = vpop.permute.xlu1 %4597 }
 0xa6e   : > { %v4728_v5 = vpop.permute.xlu0 %4727 }
 0xa6f   : > { %v4608_v12 = vpop.permute.xlu1 %4607 }
 0xa72   : > { %v4743_v61 = vpop.permute.xlu0 %4742 }
 0xa74   : > { %v4733_v20 = vpop.permute.xlu1 %4732 }
 0xa78   : > { %v4738_v60 = vpop.permute.xlu1 %4737 }
 0xb32   : > { %v4686_v11 = vpop.f32.mrb[16].mxu1 }
 0xb33   : > { %v4687_v55 = vadd.f32 %v4686_v11, %v4593_v31  ;;  %v4688_v62 = vpop.f32.mrb[17].mxu1 }
 0xb34   : > { %v4689_v32 = vadd.f32 %v4688_v62, %v4593_v31  ;;  %v4690_v4 = vpop.f32.mrb[18].mxu1  ;;  %v4835_v62 = vld [vmem:[%s8363_s7 + $0x8] sm:$0xff] }
 0xb35   : > { %v4691_v35 = vadd.f32 %v4690_v4, %v4598_v57  ;;  %v4692_v10 = vpop.f32.mrb[19].mxu1  ;;  %v4705_v1 = vmax.f32 %v4687_v55, 0.0 }
 0xb36   : > { %v4693_v52 = vadd.f32 %v4692_v10, %v4598_v57  ;;  %v4706_v47 = vmax.f32 %v4689_v32, 0.0 }
 0xb37   : > { %v4707_v21 = vmax.f32 %v4691_v35, 0.0  ;;  %v4834_v35 = vld [vmem:[%s8363_s7] sm:$0xff] }
 0xb38   : > { %v4708_v9 = vmax.f32 %v4693_v52, 0.0 }
 0xb39   : > { %v4713_v18 = vpack.c.bf16 %v4707_v21, %v4705_v1  ;;  %v4836_v1 = vld [vmem:[%s8363_s7 + $0x10] sm:$0xff] }
 0xb3a   : > { %v4714_v3 = vpack.c.bf16 %v4708_v9, %v4706_v47  ;;  %v4696_v49 = vpop.f32.mrb[20].mxu1 }
 0xb3b   : > { %v4697_v37 = vadd.f32 %v4696_v49, %v4603_v38  ;;  %v4698_v42 = vpop.f32.mrb[21].mxu1 }
 0xb3c   : > { %v4699_v2 = vadd.f32 %v4698_v42, %v4603_v38  ;;  %v4700_v45 = vpop.f32.mrb[22].mxu1  ;;  %4769 = vmatprep.subr.bf16.mxu0 %v4714_v3 }
 0xb3d   : > { %v4701_v22 = vadd.f32 %v4700_v45, %v4608_v12  ;;  %v4702_v30 = vpop.f32.mrb[23].mxu1  ;;  %4770 = vmatpush1.bf16.msra.mxu0 %v4713_v18  ;;  %v4709_v0 = vmax.f32 %v4697_v37, 0.0  ;;  %v4837_v18 = vld [vmem:[%s8363_s7 + $0x18] sm:$0xff] }
 0xb3e   : > { %v4703_v8 = vadd.f32 %v4702_v30, %v4608_v12  ;;  %v4710_v33 = vmax.f32 %v4699_v2, 0.0 }
 0xb3f   : > { %v4711_v43 = vmax.f32 %v4701_v22, 0.0 }
 0xb40   : > { %v4712_v23 = vmax.f32 %v4703_v8, 0.0 }
 0xb41   : > { %v4715_v16 = vpack.c.bf16 %v4711_v43, %v4709_v0 }
 0xb42   : > { %v4716_v27 = vpack.c.bf16 %v4712_v23, %v4710_v33 }
 0xb44   : > { %4771 = vmatprep.subr.bf16.mxu0 %v4716_v27 }
 0xb45   : > { %4772 = vmatpush1.bf16.msra.mxu0 %v4715_v16  ;;  %v4856_v16 = vld [vmem:[%s8364_s8] sm:$0x1] }
 0xb48   : > { %4790 = vmatmul.mubr.bf16.vlgmr.msra.gmra.mrb[8].mxu0 %v5219_v48 }
 0xb49   : > { %4799 = vmatprep.mubr.bf16.mxu0 %v8506_v63 }
 0xb50   : > { %4800 = vmatmul.mubr.bf16.gmra.mrb[12].mxu0 %v5220_v59 }
 0xc1b   : > { %v4791_v39 = vpop.f32.mrb[8].mxu0 }
 0xc1c   : > { %v4793_v36 = vpop.f32.mrb[9].mxu0  ;;  %v8244_v34 = vadd.f32 %v4791_v39, %v4728_v5  ;;  %v4859_v39 = vld [vmem:[%s8365_s9] sm:$0xff] }
 0xc1d   : > { %v4795_v28 = vpop.f32.mrb[10].mxu0  ;;  %v8246_v50 = vadd.f32 %v4793_v36, %v4728_v5  ;;  %v4860_v5 = vld [vmem:[%s8365_s9 + $0x8] sm:$0xff] }
 0xc1e   : > { %v4810_v41 = vmax.f32 %v8244_v34, 0.0  ;;  %v4797_v40 = vpop.f32.mrb[11].mxu0  ;;  %v8249_v46 = vadd.f32 %v4795_v28, %v4733_v20  ;;  %v4862_v28 = vld [vmem:[%s8365_s9 + $0x18] sm:$0xff] }
 0xc1f   : > { %v4811_v15 = vmax.f32 %v8246_v50, 0.0  ;;  %v8252_v19 = vadd.f32 %v4797_v40, %v4733_v20  ;;  %v8507_v20 = vld [vmem:[#allocation3_spill] sm:$0xff]  ;;  %v4861_v40 = vld [vmem:[%s8365_s9 + $0x10] sm:$0xff] }
 0xc20   : > { %v4812_v44 = vmax.f32 %v8249_v46, 0.0 }
 0xc21   : > { %v4813_v63 = vmax.f32 %v8252_v19, 0.0  ;;  %v4818_v14 = vadd.f32 %v4811_v15, %v4810_v41 }
 0xc23   : > { %v4801_v56 = vpop.f32.mrb[12].mxu0  ;;  %4819 = vadd.xlane.f32.xlu1 %v4818_v14  ;;  %v4821_v26 = vadd.f32 %v4813_v63, %v4812_v44 }
 0xc24   : > { %v4803_v7 = vpop.f32.mrb[13].mxu0  ;;  %v8264_v24 = vadd.f32 %v4801_v56, %v4738_v60 }
 0xc25   : > { %v8266_v53 = vadd.f32 %v4803_v7, %v4738_v60  ;;  %v4805_v25 = vpop.f32.mrb[14].mxu0  ;;  %4822 = vadd.xlane.f32.xlu0 %v4821_v26 }
 0xc26   : > { %v4814_v54 = vmax.f32 %v8264_v24, 0.0  ;;  %v8269_v29 = vadd.f32 %v4805_v25, %v4743_v61  ;;  %v4807_v51 = vpop.f32.mrb[15].mxu0 }
 0xc27   : > { %v4815_v6 = vmax.f32 %v8266_v53, 0.0  ;;  %v8272_v58 = vadd.f32 %v4807_v51, %v4743_v61 }
 0xc28   : > { %v4816_v13 = vmax.f32 %v8269_v29, 0.0 }
 0xc29   : > { %v4817_v17 = vmax.f32 %v8272_v58, 0.0  ;;  %v4824_v31 = vadd.f32 %v4815_v6, %v4814_v54 }
 0xc2b   : > { %v4827_v11 = vadd.f32 %v4817_v17, %v4816_v13  ;;  %4825 = vadd.xlane.f32.xlu0 %v4824_v31  ;;  %v4884_v31 = vld [vmem:[%s8366_s10 + $0x8] sm:$0xff] }
 0xc2d   : > { %4828 = vadd.xlane.f32.xlu1 %v4827_v11  ;;  %v4883_v11 = vld [vmem:[%s8366_s10] sm:$0xff] }
 0xcb0   : > { %v4820_v55 = vpop.xlane.xlu1 %4819 }
 0xcb1   : > { %v4830_v4 = vmul.f32 0.00390625, %v4820_v55 }
 0xcb2   : > { %v4823_v57 = vpop.xlane.xlu0 %4822 }
 0xcb3   : > { %v4831_v32 = vmul.f32 0.00390625, %v4823_v57  ;;  %v4838_v52 = vmul.f32 %v4834_v35, %v4830_v4  ;;  %v4886_v4 = vld [vmem:[%s8366_s10 + $0x18] sm:$0xff]  ;;  %v4885_v35 = vld [vmem:[%s8366_s10 + $0x10] sm:$0xff] }
 0xcb5   : > { %v4839_v10 = vmul.f32 %v4835_v62, %v4831_v32  ;;  %v4843_v3 = vsel %vm4842_vm8, %v4838_v52, 0.0 }
 0xcb7   : > { %v4844_v47 = vsel %vm4842_vm8, %v4839_v10, 0.0 }
 0xcb8   : > { %v4826_v21 = vpop.xlane.xlu0 %4825  ;;  %v4845_v42 = vadd.f32 %v4844_v47, %v4843_v3 }
 0xcb9   : > { %v4832_v9 = vmul.f32 0.00390625, %v4826_v21 }
 0xcba   : > { %v4829_v38 = vpop.xlane.xlu1 %4828 }
 0xcbb   : > { %v4840_v49 = vmul.f32 %v4836_v1, %v4832_v9  ;;  %v4833_v37 = vmul.f32 0.00390625, %v4829_v38 }
 0xcbd   : > { %v4846_v12 = vsel %vm4842_vm8, %v4840_v49, 0.0  ;;  %v4841_v2 = vmul.f32 %v4837_v18, %v4833_v37 }
 0xcbe   : > { %v4847_v45 = vadd.f32 %v4846_v12, %v4845_v42 }
 0xcbf   : > { %v4848_v22 = vsel %vm4842_vm8, %v4841_v2, 0.0 }
 0xcc0   : > { %v4849_v30 = vadd.f32 %v4848_v22, %v4847_v45 }
 0xcc2   : > { %v4850_v8 = vrot.slane %v4849_v30, 4 }
 0xcc4   : > { %v4851_v0 = vadd.f32 %v4850_v8, %v4849_v30 }
 0xcc6   : > { %v4852_v43 = vrot.slane %v4851_v0, 2 }
 0xcc8   : > { %v4853_v33 = vadd.f32 %v4852_v43, %v4851_v0 }
 0xcca   : > { %v4854_v23 = vrot.slane %v4853_v33, 1 }
 0xccc   : > { %v4855_v27 = vadd.f32 %v4854_v23, %v4853_v33 }
 0xcce   : > { %v4857_v48 = vadd.f32 %v4856_v16, %v4855_v27 }
 0xcd0   : > { %v4858_v59 = vmax.f32 %v4857_v48, 0.0 }
 0xcd2   : > { %v4866_v36 = vrot.slane %v4858_v59, %v8507_v20 }
 0xcd4   : > { %v4868_v14 = vmul.f32 %v4866_v36, %v4860_v5  ;;  %v4867_v56 = vmul.f32 %v4866_v36, %v4859_v39  ;;  %v4870_v7 = vmul.f32 %v4866_v36, %v4862_v28  ;;  %v4869_v25 = vmul.f32 %v4866_v36, %v4861_v40 }
 0xcd6   : > { %v4874_v60 = vsel %vm4842_vm8, %v4868_v14, 0.0  ;;  %v4871_v26 = vsel %vm4842_vm8, %v4867_v56, 0.0  ;;  %v4880_v61 = vsel %vm4842_vm8, %v4870_v7, 0.0  ;;  %v4877_v51 = vsel %vm4842_vm8, %v4869_v25, 0.0 }
 0xcd7   : > { %4875 = vadd.xlane.f32.xlu1 %v4874_v60  ;;  %4872 = vadd.xlane.f32.xlu0 %v4871_v26 }
 0xcdb   : > { %4881 = vadd.xlane.f32.xlu1 %v4880_v61  ;;  %4878 = vadd.xlane.f32.xlu0 %v4877_v51 }
 0xd64   : > { %v4876_v55 = vpop.xlane.xlu1 %4875  ;;  %v4873_v62 = vpop.xlane.xlu0 %4872 }
 0xd65   : > { %v4888_v57 = vadd.f32 %v4884_v31, %v4876_v55  ;;  %v4887_v32 = vadd.f32 %v4883_v11, %v4873_v62 }
 0xd67   : > { %v4892_v10 = vsub.f32 0.0, %v4888_v57  ;;  %v4891_v52 = vsub.f32 0.0, %v4887_v32 }
 0xd68   : > { %v4882_v1 = vpop.xlane.xlu1 %4881  ;;  %v4879_v21 = vpop.xlane.xlu0 %4878 }
 0xd69   : > { %v4897_v47 = vmul.f32 1.442695, %v4892_v10  ;;  %v4895_v9 = vmul.f32 1.442695, %v4891_v52  ;;  %v4890_v18 = vadd.f32 %v4886_v4, %v4882_v1  ;;  %v4889_v38 = vadd.f32 %v4885_v35, %v4879_v21 }
 0xd6b   : > { %5221 = vpow2.f32 %v4897_v47  ;;  %v4894_v3 = vsub.f32 0.0, %v4890_v18  ;;  %v4893_v49 = vsub.f32 0.0, %v4889_v38 }
 0xd6c   : > { %5223 = vpow2.f32 %v4895_v9 }
 0xd6d   : > { %v4901_v37 = vmul.f32 1.442695, %v4894_v3  ;;  %v4899_v42 = vmul.f32 1.442695, %v4893_v49 }
 0xd6f   : > { %5225 = vpow2.f32 %v4901_v37 }
 0xd70   : > { %5227 = vpow2.f32 %v4899_v42 }
 0xd75   : > { %v5222_v12 = vpop.eup %5221 }
 0xd76   : > { %v5224_v2 = vpop.eup %5223  ;;  %v4904_v45 = vadd.f32 1.0, %v5222_v12 }
 0xd77   : > { %v4903_v22 = vadd.f32 1.0, %v5224_v2 }
 0xd78   : > { %5229 = vrcp.f32 %v4904_v45 }
 0xd79   : > { %v5226_v30 = vpop.eup %5225  ;;  %5231 = vrcp.f32 %v4903_v22 }
 0xd7a   : > { %v5228_v8 = vpop.eup %5227  ;;  %v4906_v0 = vadd.f32 1.0, %v5226_v30 }
 0xd7b   : > { %v4905_v43 = vadd.f32 1.0, %v5228_v8 }
 0xd7c   : > { %5233 = vrcp.f32 %v4906_v0 }
 0xd7d   : > { %5235 = vrcp.f32 %v4905_v43 }
 0xd82   : > { %v5230_v33 = vpop.eup %5229 }
 0xd83   : > { %v5232_v23 = vpop.eup %5231  ;;  %4922 = vperm.xlu1 %5210, %v5230_v33  }
 0xd84   : > { %4917 = vperm.xlu0 %5209, %v5232_v23  }
 0xd86   : > { %v5234_v16 = vpop.eup %5233 }
 0xd87   : > { %v5236_v27 = vpop.eup %5235 }
 0xd88   : > { %4932 = vperm.xlu0 %5209, %v5234_v16   ;;  %4927 = vperm.xlu1 %5210, %v5236_v27  }
 0xe02   : > { %v4923_v48 = vpop.permute.xlu1 %4922 }
 0xe03   : > { %v4937_v59 = vmul.f32 %v4923_v48, %v4812_v44  ;;  %v4938_v5 = vmul.f32 %v4923_v48, %v4813_v63  ;;  %v4918_v39 = vpop.permute.xlu0 %4917 }
 0xe04   : > { %v4935_v20 = vmul.f32 %v4918_v39, %v4810_v41  ;;  %v4936_v36 = vmul.f32 %v4918_v39, %v4811_v15 }
 0xe05   : > { %4945 = vst [vmem:[%s440_s29 + $0x10] sm:$0xff] %v4937_v59  ;;  %4946 = vst [vmem:[%s440_s29 + $0x18] sm:$0xff] %v4938_v5 }
 0xe06   : > { %4943 = vst [vmem:[%s440_s29] sm:$0xff] %v4935_v20  ;;  %4944 = vst [vmem:[%s440_s29 + $0x8] sm:$0xff] %v4936_v36 }
 0xe07   : > { %v4928_v28 = vpop.permute.xlu1 %4927  ;;  %v4933_v40 = vpop.permute.xlu0 %4932 }
 0xe08   : > { %v4939_v46 = vmul.f32 %v4928_v28, %v4814_v54  ;;  %v4940_v19 = vmul.f32 %v4928_v28, %v4815_v6  ;;  %v4941_v44 = vmul.f32 %v4933_v40, %v4816_v13  ;;  %v4942_v34 = vmul.f32 %v4933_v40, %v4817_v17 }
 0xe0a   : > { %4947 = vst [vmem:[%s440_s29 + $0x20] sm:$0xff] %v4939_v46  ;;  %4948 = vst [vmem:[%s440_s29 + $0x28] sm:$0xff] %v4940_v19 }
 0xe0b   : > { %4949 = vst [vmem:[%s440_s29 + $0x30] sm:$0xff] %v4941_v44  ;;  %4950 = vst [vmem:[%s440_s29 + $0x38] sm:$0xff] %v4942_v34 }
 0xe0c PF: > { %s23_s25 = sadd.s32 1, %s5243_s25  }
 0xe0d   : > { %p20_p4 = scmp.ge.s32.totalorder %s23_s25, 4  }
 0xe0f   :  { %22 = sbr.rel (!%p20_p4) target bundleno = 1 (0x1), region = 105 }

</bundles_post_ra>
